<compile_context>
chip_gen: v5e
topology: v5e:2x2
jax: 0.10.0
libtpu: 0.0.40
codegen_flags: <defaults>
</compile_context>

<pallas_src>
import jax
import jax.numpy as jnp
from jax import lax
from jax.experimental import pallas as pl
from jax.experimental.pallas import tpu as pltpu

LN_EPS = 1e-5  # PyTorch nn.LayerNorm default eps


def _layer_norm(x, gamma, beta):
    """Two-pass LayerNorm (matches PyTorch semantics, avoids cancellation)."""
    mu = jnp.mean(x, axis=-1, keepdims=True)
    xc = x - mu
    var = jnp.mean(xc * xc, axis=-1, keepdims=True)
    return xc * lax.rsqrt(var + LN_EPS) * gamma + beta


def residual_block_kernel(x_ref, w1_ref, w2_ref, vec_ref, o_ref):
    x = x_ref[...].astype(jnp.float32)          # (tb, D) f32 for LN math

    v = vec_ref[...]                            # (8, D) f32: packed vectors
    g1, be1, b1 = v[0:1, :], v[1:2, :], v[2:3, :]
    g2, be2, b2 = v[3:4, :], v[4:5, :], v[5:6, :]

    # norm1 (f32)
    h = _layer_norm(x, g1, be1)
    # linear1 + ReLU  (bf16 MXU operands, f32 accumulation)
    h = jnp.dot(h.astype(jnp.bfloat16), w1_ref[...],
                preferred_element_type=jnp.float32) + b1
    h = jnp.maximum(h, 0.0)
    # norm2 (f32)
    h = _layer_norm(h, g2, be2)
    # linear2
    h = jnp.dot(h.astype(jnp.bfloat16), w2_ref[...],
                preferred_element_type=jnp.float32) + b2

    # Residual add: re-read the still-resident VMEM input tile here instead of
    # keeping a (tb, D) f32 "identity" live across the whole kernel.
    o_ref[...] = (h + x_ref[...].astype(jnp.float32)).astype(o_ref.dtype)


def _num_tensorcores():
    """2 TensorCores per chip on v7x, otherwise 1 (v5e/v6e)."""
    try:
        kind = jax.devices()[0].device_kind.lower()
        return 2 if "v7" in kind else 1
    except Exception:
        return 1


def _vmem_capacity_bytes():
    try:
        return int(pltpu.get_tpu_info().vmem_capacity_bytes)
    except Exception:
        return 64 << 20   # conservative (v7x per-core budget)


def _choose_tb(B, D, *, num_tc=1):
    """Batch-tile rows.  Activation tiles are the only per-step HBM traffic
    (weights resident), so target ~1 MiB f32 input tiles; only force >=2 grid
    steps on multi-TensorCore chips where 'parallel' actually shards."""
    target_rows = (1 << 20) // max(D * 4, 1)
    cap = 1024 if num_tc == 1 else 512       # smaller cap under v7x's 64 MiB
    target_rows = max(128, min(cap, target_rows))

    Bp = ((B + 7) // 8) * 8                  # sublane-aligned batch extent
    tb = max(8, (min(target_rows, Bp) // 8) * 8)

    if num_tc >= 2 and Bp > 8 and pl.cdiv(Bp, tb) < 2:
        tb = max(8, ((Bp // 2 + 7) // 8) * 8)  # give megacore 2 steps
    return tb


def residual_block(x, params, *, tb=None):
    """x: (B, D) float32 (bf16 also accepted to halve activation HBM traffic).
    params from init_params(): w1, w2 pre-transposed (D_in, D_out); 'vecs' is
    the packed (8, D) small-vector array."""
    B, D = x.shape
    num_tc = _num_tensorcores()
    if tb is None:
        tb = _choose_tb(B, D, num_tc=num_tc)

    grid = pl.cdiv(B, tb)   # partial last block is masked by Pallas (no pad op)

    # bf16 weights for the MXU (halves weight DMA and VMEM footprint).
    w1 = params["w1"].astype(jnp.bfloat16)
    w2 = params["w2"].astype(jnp.bfloat16)
    vecs = params["vecs"]            # (8, D) f32

    row_spec = pl.BlockSpec((tb, D), lambda i: (i, 0))
    # Grid-invariant blocks: fetched once, never re-fetched -> single buffer.
    mat_spec = pl.BlockSpec((D, D), lambda i: (0, 0),
                            pipeline_mode=pl.Buffered(1))
    vec_spec = pl.BlockSpec((8, D), lambda i: (0, 0),
                            pipeline_mode=pl.Buffered(1))

    # Scoped-VMEM budget from the actual tile footprint, capped at physical.
    est = (2 * (tb * D * 4) * 2        # x + out f32 tiles, double-buffered
           + 2 * (D * D * 2) * 1       # w1 + w2 bf16, single-buffered
           + 8 * D * 4 * 1)            # packed vectors, single-buffered
    vmem_cap = _vmem_capacity_bytes() - (8 << 20)
    vmem_limit = min(max(int(est * 1.4) + (8 << 20), 32 << 20), vmem_cap)

    out = pl.pallas_call(
        residual_block_kernel,
        out_shape=jax.ShapeDtypeStruct((B, D), x.dtype),
        grid_spec=pltpu.PrefetchScalarGridSpec(
            num_scalar_prefetch=0,
            grid=(grid,),
            in_specs=[row_spec,   # x
                      mat_spec,   # w1 (D_in, D_out)
                      mat_spec,   # w2 (D_in, D_out)
                      vec_spec],  # packed [g1, be1, b1, g2, be2, b2, 0, 0]
            out_specs=row_spec),
        compiler_params=pltpu.CompilerParams(
            dimension_semantics=("parallel",),
            vmem_limit_bytes=vmem_limit),
    )(x, w1, w2, vecs)
    return out


def init_params(key, dim):
    """Deterministic init mirroring nn.Linear / nn.LayerNorm shapes."""
    k1, k2, k3, k4 = jax.random.split(key, 4)
    bound = 1.0 / jnp.sqrt(dim)
    # PyTorch Linear weight is (out, in); we store its transpose (in, out).
    w1 = jax.random.uniform(k1, (dim, dim), jnp.float32, -bound, bound)
    b1 = jax.random.uniform(k2, (1, dim), jnp.float32, -bound, bound)
    w2 = jax.random.uniform(k3, (dim, dim), jnp.float32, -bound, bound)
    b2 = jax.random.uniform(k4, (1, dim), jnp.float32, -bound, bound)
    g1 = jnp.ones((1, dim), jnp.float32)
    be1 = jnp.zeros((1, dim), jnp.float32)
    g2 = jnp.ones((1, dim), jnp.float32)
    be2 = jnp.zeros((1, dim), jnp.float32)
    # Pack the six small vectors into one lane-dense (8, dim) array.
    vecs = jnp.concatenate(
        [g1, be1, b1, g2, be2, b2, jnp.zeros((2, dim), jnp.float32)], axis=0)
    return dict(w1=w1, b1=b1, w2=w2, b2=b2,
                g1=g1, be1=be1, g2=g2, be2=be2, vecs=vecs)


def residual_block_ref(x, p):
    """Pure-JAX f32 reference for correctness check."""
    h = _layer_norm(x, p["g1"], p["be1"])
    h = jnp.maximum(h @ p["w1"] + p["b1"], 0.0)
    h = _layer_norm(h, p["g2"], p["be2"])
    h = h @ p["w2"] + p["b2"]
    return h + x


if __name__ == "__main__":
    key = jax.random.PRNGKey(0)
    kx, kp = jax.random.split(key)

    B, D = 256, 256
    x = jax.random.normal(kx, (B, D), jnp.float32)
    params = init_params(kp, D)

    out = residual_block(x, params)
    out = jax.block_until_ready(out)

    ref = residual_block_ref(x, params)
    assert out.shape == (B, D)
    # Tolerance loosened for bf16 MXU operands (f32 accumulation).
    assert jnp.allclose(out, ref, atol=3e-2, rtol=3e-2), (
        "mismatch vs reference; max abs err = "
        f"{float(jnp.max(jnp.abs(out - ref)))}")

    print("KERNEL_OK")
</pallas_src>

<mosaic_0001>
module attributes {stable_mosaic.version = 11 : i64} {
  func.func @residual_block_kernel(%arg0: i32, %arg1: memref<256x256xf32, #tpu.memory_space<vmem>>, %arg2: memref<256x256xbf16, #tpu.memory_space<vmem>>, %arg3: memref<256x256xbf16, #tpu.memory_space<vmem>>, %arg4: memref<8x256xf32, #tpu.memory_space<vmem>>, %arg5: memref<256x256xf32, #tpu.memory_space<vmem>>) attributes {dimension_semantics = [#tpu.dimension_semantics<parallel>], iteration_bounds = array<i64: 1>, scalar_prefetch = 0 : i64, scratch_operands = 0 : i64, tpu.core_type = #tpu.core_type<tc>, window_params = [{transform_indices = @transform_0, window_bounds = array<i64: 256, 256>}, {pipeline_mode = #tpu.pipeline_mode<synchronous>, transform_indices = @transform_1, window_bounds = array<i64: 256, 256>}, {pipeline_mode = #tpu.pipeline_mode<synchronous>, transform_indices = @transform_2, window_bounds = array<i64: 256, 256>}, {pipeline_mode = #tpu.pipeline_mode<synchronous>, transform_indices = @transform_3, window_bounds = array<i64: 8, 256>}, {transform_indices = @transform_4, window_bounds = array<i64: 256, 256>}]} {
    %c0 = arith.constant 0 : index
    %c0_0 = arith.constant 0 : index
    %0 = vector.load %arg1[%c0, %c0_0] : memref<256x256xf32, #tpu.memory_space<vmem>>, vector<256x256xf32>
    %c0_1 = arith.constant 0 : index
    %c0_2 = arith.constant 0 : index
    %1 = vector.load %arg4[%c0_1, %c0_2] : memref<8x256xf32, #tpu.memory_space<vmem>>, vector<8x256xf32>
    %2 = vector.extract_strided_slice %1 {offsets = [0, 0], sizes = [1, 256], strides = [1, 1]} : vector<8x256xf32> to vector<1x256xf32>
    %3 = vector.extract_strided_slice %1 {offsets = [1, 0], sizes = [1, 256], strides = [1, 1]} : vector<8x256xf32> to vector<1x256xf32>
    %4 = vector.extract_strided_slice %1 {offsets = [2, 0], sizes = [1, 256], strides = [1, 1]} : vector<8x256xf32> to vector<1x256xf32>
    %5 = vector.extract_strided_slice %1 {offsets = [3, 0], sizes = [1, 256], strides = [1, 1]} : vector<8x256xf32> to vector<1x256xf32>
    %6 = vector.extract_strided_slice %1 {offsets = [4, 0], sizes = [1, 256], strides = [1, 1]} : vector<8x256xf32> to vector<1x256xf32>
    %7 = vector.extract_strided_slice %1 {offsets = [5, 0], sizes = [1, 256], strides = [1, 1]} : vector<8x256xf32> to vector<1x256xf32>
    %cst = arith.constant dense<0.000000e+00> : vector<256xf32>
    %8 = vector.multi_reduction <add>, %0, %cst [1] : vector<256x256xf32> to vector<256xf32>
    %9 = vector.shape_cast %8 : vector<256xf32> to vector<256x1xf32>
    %cst_3 = arith.constant 2.560000e+02 : f32
    %10 = vector.broadcast %cst_3 : f32 to vector<256x1xf32>
    %11 = arith.divf %9, %10 : vector<256x1xf32>
    %12 = vector.broadcast %11 : vector<256x1xf32> to vector<256x256xf32>
    %13 = arith.subf %0, %12 : vector<256x256xf32>
    %14 = arith.mulf %13, %13 : vector<256x256xf32>
    %cst_4 = arith.constant dense<0.000000e+00> : vector<256xf32>
    %15 = vector.multi_reduction <add>, %14, %cst_4 [1] : vector<256x256xf32> to vector<256xf32>
    %16 = vector.shape_cast %15 : vector<256xf32> to vector<256x1xf32>
    %cst_5 = arith.constant 2.560000e+02 : f32
    %17 = vector.broadcast %cst_5 : f32 to vector<256x1xf32>
    %18 = arith.divf %16, %17 : vector<256x1xf32>
    %cst_6 = arith.constant 9.99999974E-6 : f32
    %19 = vector.broadcast %cst_6 : f32 to vector<256x1xf32>
    %20 = arith.addf %18, %19 : vector<256x1xf32>
    %21 = math.rsqrt %20 : vector<256x1xf32>
    %22 = vector.broadcast %21 : vector<256x1xf32> to vector<256x256xf32>
    %23 = arith.mulf %13, %22 : vector<256x256xf32>
    %24 = vector.broadcast %2 : vector<1x256xf32> to vector<256x256xf32>
    %25 = arith.mulf %23, %24 : vector<256x256xf32>
    %26 = vector.broadcast %3 : vector<1x256xf32> to vector<256x256xf32>
    %27 = arith.addf %25, %26 : vector<256x256xf32>
    %28 = arith.truncf %27 : vector<256x256xf32> to vector<256x256xbf16>
    %c0_7 = arith.constant 0 : index
    %c0_8 = arith.constant 0 : index
    %29 = vector.load %arg2[%c0_7, %c0_8] : memref<256x256xbf16, #tpu.memory_space<vmem>>, vector<256x256xbf16>
    %cst_9 = arith.constant dense<0.000000e+00> : vector<256x256xf32>
    %30 = tpu.matmul %28, %29, %cst_9 {dimension_numbers = #tpu.dot_dimension_numbers<[1], [0], [0], [1], [0, 0, 1, 1], [], []>} : vector<256x256xbf16>, vector<256x256xbf16>, vector<256x256xf32> -> vector<256x256xf32>
    %31 = vector.broadcast %4 : vector<1x256xf32> to vector<256x256xf32>
    %32 = arith.addf %30, %31 : vector<256x256xf32>
    %cst_10 = arith.constant 0.000000e+00 : f32
    %33 = vector.broadcast %cst_10 : f32 to vector<256x256xf32>
    %34 = arith.maximumf %32, %33 : vector<256x256xf32>
    %cst_11 = arith.constant dense<0.000000e+00> : vector<256xf32>
    %35 = vector.multi_reduction <add>, %34, %cst_11 [1] : vector<256x256xf32> to vector<256xf32>
    %36 = vector.shape_cast %35 : vector<256xf32> to vector<256x1xf32>
    %cst_12 = arith.constant 2.560000e+02 : f32
    %37 = vector.broadcast %cst_12 : f32 to vector<256x1xf32>
    %38 = arith.divf %36, %37 : vector<256x1xf32>
    %39 = vector.broadcast %38 : vector<256x1xf32> to vector<256x256xf32>
    %40 = arith.subf %34, %39 : vector<256x256xf32>
    %41 = arith.mulf %40, %40 : vector<256x256xf32>
    %cst_13 = arith.constant dense<0.000000e+00> : vector<256xf32>
    %42 = vector.multi_reduction <add>, %41, %cst_13 [1] : vector<256x256xf32> to vector<256xf32>
    %43 = vector.shape_cast %42 : vector<256xf32> to vector<256x1xf32>
    %cst_14 = arith.constant 2.560000e+02 : f32
    %44 = vector.broadcast %cst_14 : f32 to vector<256x1xf32>
    %45 = arith.divf %43, %44 : vector<256x1xf32>
    %cst_15 = arith.constant 9.99999974E-6 : f32
    %46 = vector.broadcast %cst_15 : f32 to vector<256x1xf32>
    %47 = arith.addf %45, %46 : vector<256x1xf32>
    %48 = math.rsqrt %47 : vector<256x1xf32>
    %49 = vector.broadcast %48 : vector<256x1xf32> to vector<256x256xf32>
    %50 = arith.mulf %40, %49 : vector<256x256xf32>
    %51 = vector.broadcast %5 : vector<1x256xf32> to vector<256x256xf32>
    %52 = arith.mulf %50, %51 : vector<256x256xf32>
    %53 = vector.broadcast %6 : vector<1x256xf32> to vector<256x256xf32>
    %54 = arith.addf %52, %53 : vector<256x256xf32>
    %55 = arith.truncf %54 : vector<256x256xf32> to vector<256x256xbf16>
    %c0_16 = arith.constant 0 : index
    %c0_17 = arith.constant 0 : index
    %56 = vector.load %arg3[%c0_16, %c0_17] : memref<256x256xbf16, #tpu.memory_space<vmem>>, vector<256x256xbf16>
    %cst_18 = arith.constant dense<0.000000e+00> : vector<256x256xf32>
    %57 = tpu.matmul %55, %56, %cst_18 {dimension_numbers = #tpu.dot_dimension_numbers<[1], [0], [0], [1], [0, 0, 1, 1], [], []>} : vector<256x256xbf16>, vector<256x256xbf16>, vector<256x256xf32> -> vector<256x256xf32>
    %58 = vector.broadcast %7 : vector<1x256xf32> to vector<256x256xf32>
    %59 = arith.addf %57, %58 : vector<256x256xf32>
    %c0_19 = arith.constant 0 : index
    %c0_20 = arith.constant 0 : index
    %60 = vector.load %arg1[%c0_19, %c0_20] : memref<256x256xf32, #tpu.memory_space<vmem>>, vector<256x256xf32>
    %61 = arith.addf %59, %60 : vector<256x256xf32>
    %c0_21 = arith.constant 0 : index
    %c0_22 = arith.constant 0 : index
    %62 = vector.load %arg5[%c0_21, %c0_22] : memref<256x256xf32, #tpu.memory_space<vmem>>, vector<256x256xf32>
    tpu.vector_store %arg5[%c0_21, %c0_22], %61 {strides = array<i32>} : memref<256x256xf32, #tpu.memory_space<vmem>>, vector<256x256xf32>,
    return
  }
  func.func @transform_0(%arg0: i32) -> (i32, i32) {
    %c0_i32 = arith.constant 0 : i32
    %c0_i32_0 = arith.constant 0 : i32
    return %arg0, %c0_i32 : i32, i32
  }
  func.func @transform_1(%arg0: i32) -> (i32, i32) {
    %c0_i32 = arith.constant 0 : i32
    %c0_i32_0 = arith.constant 0 : i32
    %c0_i32_1 = arith.constant 0 : i32
    return %c0_i32, %c0_i32_0 : i32, i32
  }
  func.func @transform_2(%arg0: i32) -> (i32, i32) {
    %c0_i32 = arith.constant 0 : i32
    %c0_i32_0 = arith.constant 0 : i32
    %c0_i32_1 = arith.constant 0 : i32
    return %c0_i32, %c0_i32_0 : i32, i32
  }
  func.func @transform_3(%arg0: i32) -> (i32, i32) {
    %c0_i32 = arith.constant 0 : i32
    %c0_i32_0 = arith.constant 0 : i32
    %c0_i32_1 = arith.constant 0 : i32
    return %c0_i32, %c0_i32_0 : i32, i32
  }
  func.func @transform_4(%arg0: i32) -> (i32, i32) {
    %c0_i32 = arith.constant 0 : i32
    %c0_i32_0 = arith.constant 0 : i32
    return %arg0, %c0_i32 : i32, i32
  }
}

</mosaic_0001>

<bundles_post_ra>
// kernel: tpu_custom_call.1
= control target key start
LH: loop header
LB: loop body
LE: loop exit
PB: predicated region body
PF: predicated region fallthrough
CT: control target
= control target key end

     0   :  { %9 = vsyncpa [#allocation3], 0  ;;  %s6883_s0 = inlined_call_operand.hbm [shape: f32[256,256], index: 0, kind: input, shape index: {}]   ;;  %s6884_s1 = inlined_call_operand.hbm [shape: bf16[256,256], index: 1, kind: input, shape index: {}]   ;;  %s6885_s2 = inlined_call_operand.hbm [shape: bf16[256,256], index: 2, kind: input, shape index: {}]   ;;  %s6886_s3 = inlined_call_operand.hbm [shape: f32[8,256], index: 3, kind: input, shape index: {}]   ;;  %s6887_s4 = inlined_call_operand.hbm [shape: f32[256,256], index: 4, kind: output, shape index: {}]  }
   0x1   :  { %10 = vsyncpa [#allocation6], 0 }
   0x2   :  { %11 = vsyncpa [#allocation9], 0  ;;  %s30_s17 = sshll.u32 %s6884_s1, 4  ;;  %s31_s17 = int_to_ptr.hbm [resolvable:$true] %s30_s17 }
   0x3   :  { %12 = vsyncpa [#allocation4], 0  ;;  %s4047_s18 = smov [#allocation5]   ;;  %s17_s22 = sshll.u32 %s6883_s0, 4  ;;  %s18_s22 = int_to_ptr.hbm [resolvable:$true] %s17_s22 }
   0x4   :  { %s32_s19 = sshll.u32 %s4047_s18, 4  ;;  %s4048_s23 = smov 128   ;;  %s33_s19 = int_to_ptr.vmem [resolvable:$true] %s32_s19 }
   0x5   :  { %s4049_s24 = smov 8   ;;  %s4050_s25 = smov [#allocation2]  }
   0x6   :  { %38 = dma.hbm_to_vmem [thread:$0]  %s31_s17, 4096, %s33_s19, [#allocation6], %s4048_s23, %s4048_s23, %s4049_s24  }
   0x7   :  { %s19_s26 = sshll.u32 %s4050_s25, 4  ;;  %s4051_s27 = smov 256   ;;  %s20_s26 = int_to_ptr.vmem [resolvable:$true] %s19_s26 }
   0x8   :  { %s4052_s28 = smov 16   ;;  %s43_s30 = sshll.u32 %s6885_s2, 4  ;;  %s44_s30 = int_to_ptr.hbm [resolvable:$true] %s43_s30 }
   0x9   :  { %25 = dma.hbm_to_vmem [thread:$0]  %s18_s22, 8192, %s20_s26, [#allocation3], %s4051_s27, %s4051_s27, %s4052_s28  }
   0xa   :  { %s4053_s5 = smov [#allocation7]   ;;  %s57_s8 = sshll.u32 %s6886_s3, 4  ;;  %s58_s8 = int_to_ptr.hbm [resolvable:$true] %s57_s8 }
   0xb   :  { %s45_s0 = sshll.u32 %s4053_s5, 4  ;;  %s4054_s9 = smov [#allocation8]   ;;  %s46_s0 = int_to_ptr.vmem [resolvable:$true] %s45_s0 }
   0xc   :  { %51 = dma.hbm_to_vmem [thread:$0]  %s44_s30, 4096, %s46_s0, [#allocation6], %s4048_s23, %s4048_s23, %s4049_s24  }
   0xd   :  { %s59_s10 = sshll.u32 %s4054_s9, 4  ;;  %s60_s10 = int_to_ptr.vmem [resolvable:$true] %s59_s10 }
   0xe   :  { %62 = dma.hbm_to_vmem [thread:$0]  %s58_s8, 256, %s60_s10, [#allocation9]  }
   0xf   :  { %4039 = dma.done.wait [#allocation3], 8192  }
  0x10   :  { %4040 = vsyncadd [#allocation3], 4294959104 }
  0x11   :  { %4041 = dma.done.wait [#allocation6], 8192  }
  0x12   :  { %4042 = vsyncadd [#allocation6], 4294959104 }
  0x13   :  { %4043 = dma.done.wait [#allocation9], 256  }
  0x14   :  { %4044 = vsyncadd [#allocation9], 4294967040  ;;  %v4097_v0 = vld [vmem:[#allocation2 + $0x20] sm:$0xff]  ;;  %v4099_v1 = vld [vmem:[#allocation2 + $0x28] sm:$0xff]  ;;  %v4055_v27 = vmov 256.0   ;;  %s4056_s2 = smov [#allocation10]  }
  0x15   :  { %v79_v2 = vld [vmem:[#allocation2] sm:$0xff]  ;;  %v151_v3 = vadd.f32 %v4099_v1, %v4097_v0  ;;  %v80_v4 = vld [vmem:[#allocation2 + $0x8] sm:$0xff]  ;;  %v85_v8 = vld [vmem:[#allocation2 + $0x30] sm:$0xff]  ;;  %3723 = vrcp.f32 %v4055_v27  ;;  %s3376_s3 = sshll.u32 %s4056_s2, 4  ;;  %s3378_s13 = sshll.u32 %s6887_s4, 4  ;;  %s3377_s3 = int_to_ptr.vmem [resolvable:$true] %s3376_s3  ;;  %s3379_s13 = int_to_ptr.hbm [resolvable:$true] %s3378_s13 }
  0x16   :  { %v145_v5 = vadd.f32 %v80_v4, %v79_v2  ;;  %v87_v6 = vld [vmem:[#allocation2 + $0x40] sm:$0xff]  ;;  %v88_v7 = vld [vmem:[#allocation2 + $0x48] sm:$0xff]  ;;  %v86_v9 = vld [vmem:[#allocation2 + $0x38] sm:$0xff] }
  0x17   :  { %152 = vadd.xlane.f32.xlu1 %v151_v3  ;;  %v157_v10 = vadd.f32 %v88_v7, %v87_v6  ;;  %v81_v11 = vld [vmem:[#allocation2 + $0x10] sm:$0xff]  ;;  %v82_v12 = vld [vmem:[#allocation2 + $0x18] sm:$0xff]  ;;  %v154_v13 = vadd.f32 %v86_v9, %v85_v8  ;;  %v4113_v20 = vld [vmem:[#allocation2 + $0x60] sm:$0xff] }
  0x18   :  { %146 = vadd.xlane.f32.xlu0 %v145_v5  ;;  %v4103_v14 = vld [vmem:[#allocation2 + $0x50] sm:$0xff]  ;;  %v4105_v15 = vld [vmem:[#allocation2 + $0x58] sm:$0xff]  ;;  %v148_v16 = vadd.f32 %v82_v12, %v81_v11  ;;  %v4115_v21 = vld [vmem:[#allocation2 + $0x68] sm:$0xff] }
  0x19   :  { %158 = vadd.xlane.f32.xlu2 %v157_v10  ;;  %v160_v17 = vadd.f32 %v4105_v15, %v4103_v14  ;;  %v4109_v18 = vld [vmem:[#allocation2 + $0x70] sm:$0xff]  ;;  %v4111_v19 = vld [vmem:[#allocation2 + $0x78] sm:$0xff]  ;;  %v163_v23 = vadd.f32 %v4115_v21, %v4113_v20  ;;  %v4121_v24 = vld [vmem:[#allocation2 + $0x80] sm:$0xff] }
  0x1a   :  { %v166_v22 = vadd.f32 %v4111_v19, %v4109_v18  ;;  %v4123_v25 = vld [vmem:[#allocation2 + $0x88] sm:$0xff]  ;;  %v4140_v47 = vld [vmem:[#allocation2 + $0x90] sm:$0xff]  ;;  %v4142_v48 = vld [vmem:[#allocation2 + $0x98] sm:$0xff] }
  0x1b   :  { %v169_v26 = vadd.f32 %v4123_v25, %v4121_v24  ;;  %v3724_v28 = vpop.eup %3723  ;;  %v172_v55 = vadd.f32 %v4142_v48, %v4140_v47  ;;  %v4204_v27 = vld [vmem:[#allocation2 + $0xb0] sm:$0xff] }
  0x1c   :  { %v242_v29 = vmul.f32 256.0, %v3724_v28  ;;  %vm246_vm0 = vweird.f32 %v3724_v28 }
  0x1e   :  { %v243_v30 = vsub.f32 1.0, %v242_v29 }
  0x1f   :  { %155 = vadd.xlane.f32.xlu1 %v154_v13 }
  0x20   :  { %149 = vadd.xlane.f32.xlu0 %v148_v16  ;;  %v244_v31 = vmul.f32 %v3724_v28, %v243_v30 }
  0x21   :  { %161 = vadd.xlane.f32.xlu2 %v160_v17 }
  0x22   :  { %v245_v32 = vadd.f32 %v3724_v28, %v244_v31 }
  0x24   :  { %v4127_v33 = vsel %vm246_vm0, %v3724_v28, %v245_v32  ;;  %v4206_v28 = vld [vmem:[#allocation2 + $0xb8] sm:$0xff] }
  0x27   :  { %167 = vadd.xlane.f32.xlu1 %v166_v22 }
  0x28   :  { %164 = vadd.xlane.f32.xlu0 %v163_v23  ;;  %v4196_v23 = vld [vmem:[#allocation2 + $0xd0] sm:$0xff] }
  0x2f   :  { %170 = vadd.xlane.f32.xlu1 %v169_v26  ;;  %v4198_v26 = vld [vmem:[#allocation2 + $0xd8] sm:$0xff] }
  0x30   :  { %v184_v29 = vadd.f32 %v4198_v26, %v4196_v23 }
  0x8a   :  { %v153_v34 = vpop.xlane.xlu1 %152 }
  0x8b   :  { %v147_v35 = vpop.xlane.xlu0 %146  ;;  %v250_v49 = vmul.f32 %v4127_v33, %v153_v34 }
  0x8c   :  { %v248_v36 = vmul.f32 %v4127_v33, %v147_v35  ;;  %v159_v39 = vpop.xlane.xlu2 %158  ;;  %v178_v35 = vadd.f32 %v4206_v28, %v4204_v27 }
  0x8d   :  { %v252_v46 = vmul.f32 %v4127_v33, %v159_v39  ;;  %v4165_v60 = vsub.f32 %v4097_v0, %v250_v49  ;;  %v4168_v61 = vsub.f32 %v4099_v1, %v250_v49  ;;  %v4219_v39 = vld [vmem:[#allocation2 + $0xe0] sm:$0xff] }
  0x8e   :  { %v4130_v37 = vsub.f32 %v79_v2, %v248_v36  ;;  %v4132_v38 = vsub.f32 %v80_v4, %v248_v36 }
  0x8f   :  { %v4156_v56 = vsub.f32 %v87_v6, %v252_v46  ;;  %v4158_v57 = vsub.f32 %v88_v7, %v252_v46  ;;  %v348_v6 = vmul.f32 %v4165_v60, %v4165_v60  ;;  %v349_v7 = vmul.f32 %v4168_v61, %v4168_v61 }
  0x90   :  { %v344_v40 = vmul.f32 %v4130_v37, %v4130_v37  ;;  %v345_v41 = vmul.f32 %v4132_v38, %v4132_v38 }
  0x91   :  { %v352_v5 = vmul.f32 %v4156_v56, %v4156_v56  ;;  %v353_v0 = vmul.f32 %v4158_v57, %v4158_v57  ;;  %v414_v16 = vadd.f32 %v349_v7, %v348_v6  ;;  %v4268_v6 = vld [vmem:[#allocation2 + $0x110] sm:$0xff]  ;;  %v4270_v7 = vld [vmem:[#allocation2 + $0x118] sm:$0xff] }
  0x92   :  { %v156_v42 = vpop.xlane.xlu1 %155  ;;  %v408_v43 = vadd.f32 %v345_v41, %v344_v40  ;;  %v4221_v40 = vld [vmem:[#allocation2 + $0xe8] sm:$0xff]  ;;  %v4227_v41 = vld [vmem:[#allocation2 + $0xc0] sm:$0xff] }
  0x93   :  { %v251_v44 = vmul.f32 %v4127_v33, %v156_v42  ;;  %v150_v45 = vpop.xlane.xlu0 %149  ;;  %v420_v10 = vadd.f32 %v353_v0, %v352_v5  ;;  %v4229_v42 = vld [vmem:[#allocation2 + $0xc8] sm:$0xff]  ;;  %v4262_v0 = vld [vmem:[#allocation2 + $0x100] sm:$0xff] }
  0x94   :  { %v249_v50 = vmul.f32 %v4127_v33, %v150_v45  ;;  %409 = vadd.xlane.f32.xlu2 %v408_v43  ;;  %v162_v3 = vpop.xlane.xlu2 %161  ;;  %v187_v43 = vadd.f32 %v4221_v40, %v4219_v39  ;;  %v181_v46 = vadd.f32 %v4229_v42, %v4227_v41 }
  0x95   :  { %v4146_v51 = vsub.f32 %v85_v8, %v251_v44  ;;  %v4148_v52 = vsub.f32 %v86_v9, %v251_v44  ;;  %v253_v1 = vmul.f32 %v4127_v33, %v162_v3  ;;  %v4183_v8 = vld [vmem:[#allocation2 + $0xa0] sm:$0xff]  ;;  %v4185_v9 = vld [vmem:[#allocation2 + $0xa8] sm:$0xff] }
  0x96   :  { %v4150_v53 = vsub.f32 %v81_v11, %v249_v50  ;;  %v4152_v54 = vsub.f32 %v82_v12, %v249_v50  ;;  %v175_v13 = vadd.f32 %v4185_v9, %v4183_v8 }
  0x97   :  { %v350_v58 = vmul.f32 %v4146_v51, %v4146_v51  ;;  %v351_v59 = vmul.f32 %v4148_v52, %v4148_v52  ;;  %v4188_v11 = vsub.f32 %v4103_v14, %v253_v1  ;;  %v4191_v12 = vsub.f32 %v4105_v15, %v253_v1  ;;  %v4264_v1 = vld [vmem:[#allocation2 + $0x108] sm:$0xff] }
  0x98   :  { %v346_v62 = vmul.f32 %v4150_v53, %v4150_v53  ;;  %v347_v63 = vmul.f32 %v4152_v54, %v4152_v54 }
  0x99   :  { %v417_v2 = vadd.f32 %v351_v59, %v350_v58  ;;  %v354_v14 = vmul.f32 %v4188_v11, %v4188_v11  ;;  %v355_v15 = vmul.f32 %v4191_v12, %v4191_v12  ;;  %v4246_v59 = vld [vmem:[#allocation2 + $0xf0] sm:$0xff] }
  0x9a   :  { %v411_v4 = vadd.f32 %v347_v63, %v346_v62  ;;  %v168_v30 = vpop.xlane.xlu1 %167 }
  0x9b   :  { %418 = vadd.xlane.f32.xlu1 %v417_v2  ;;  %v165_v17 = vpop.xlane.xlu0 %164  ;;  %v423_v34 = vadd.f32 %v355_v15, %v354_v14  ;;  %v255_v36 = vmul.f32 %v4127_v33, %v168_v30  ;;  %v3664_v14 = vld [vmem:[#allocation5 + $0x74] sm:$0xf0]  ;;  %v3515_v15 = vld [vmem:[#allocation5 + $0xf0] sm:$0xf] }
  0x9c   :  { %173 = vadd.xlane.f32.xlu2 %v172_v55  ;;  %412 = vadd.xlane.f32.xlu0 %v411_v4  ;;  %v254_v22 = vmul.f32 %v4127_v33, %v165_v17  ;;  %v3680_v30 = vld [vmem:[#allocation5 + $0xf4] sm:$0xf0] }
  0x9d   :  { %v4234_v44 = vsub.f32 %v4109_v18, %v255_v36  ;;  %v4237_v45 = vsub.f32 %v4111_v19, %v255_v36  ;;  %v4248_v19 = vld [vmem:[#allocation2 + $0xf8] sm:$0xff]  ;;  %v3516_v36 = vor.u32 %v3680_v30, %v3515_v15  ;;  %v3659_v30 = vld [vmem:[#allocation5 + $0x54] sm:$0xf] }
  0x9e   :  { %v4211_v31 = vsub.f32 %v4113_v20, %v254_v22  ;;  %v4214_v32 = vsub.f32 %v4115_v21, %v254_v22  ;;  %v190_v3 = vadd.f32 %v4248_v19, %v4246_v59  ;;  %v3451_v22 = vld [vmem:[#allocation5 + $0x70] sm:$0xf] }
  0x9f   :  { %v358_v58 = vmul.f32 %v4234_v44, %v4234_v44  ;;  %v359_v18 = vmul.f32 %v4237_v45, %v4237_v45  ;;  %1399 = vmatpush.bf16.msra.mxu1 %v3516_v36 }
  0xa0   :  { %v356_v20 = vmul.f32 %v4211_v31, %v4211_v31  ;;  %v357_v21 = vmul.f32 %v4214_v32, %v4214_v32 }
  0xa1   :  { %v429_v2 = vadd.f32 %v359_v18, %v358_v58  ;;  %v3678_v18 = vld [vmem:[#allocation5 + $0xe4] sm:$0xf0] }
  0xa2   :  { %v426_v49 = vadd.f32 %v357_v21, %v356_v20  ;;  %v171_v50 = vpop.xlane.xlu1 %170  ;;  %v3679_v21 = vld [vmem:[#allocation5 + $0xf4] sm:$0xf] }
  0xa3   :  { %421 = vadd.xlane.f32.xlu1 %v420_v10  ;;  %v256_v55 = vmul.f32 %v4127_v33, %v171_v50  ;;  %v196_v10 = vadd.f32 %v4270_v7, %v4268_v6  ;;  %v3662_v50 = vld [vmem:[#allocation5 + $0x64] sm:$0xf0] }
  0xa4   :  { %176 = vadd.xlane.f32.xlu2 %v175_v13  ;;  %415 = vadd.xlane.f32.xlu0 %v414_v16  ;;  %v4274_v13 = vld [vmem:[#allocation2 + $0x120] sm:$0xff]  ;;  %v4276_v16 = vld [vmem:[#allocation2 + $0x128] sm:$0xff] }
  0xa5   :  { %v4251_v62 = vsub.f32 %v4121_v24, %v256_v55  ;;  %v4254_v63 = vsub.f32 %v4123_v25, %v256_v55  ;;  %v193_v25 = vadd.f32 %v4264_v1, %v4262_v0  ;;  %v199_v17 = vadd.f32 %v4276_v16, %v4274_v13  ;;  %v3507_v55 = vld [vmem:[#allocation5 + $0xe0] sm:$0xf] }
  0xa7   :  { %7027 = vst [vmem:[#allocation15_spill] sm:$0xff] %v4251_v62  ;;  %v360_v4 = vmul.f32 %v4251_v62, %v4251_v62  ;;  %v361_v5 = vmul.f32 %v4254_v63, %v4254_v63 }
  0xa8   :  { %7028 = vst [vmem:[#allocation16_spill] sm:$0xff] %v4254_v63 }
  0xa9   :  { %v432_v24 = vadd.f32 %v361_v5, %v360_v4  ;;  %v3508_v4 = vor.u32 %v3678_v18, %v3507_v55  ;;  %v3657_v18 = vld [vmem:[#allocation5 + $0x44] sm:$0xf] }
  0xab   :  { %185 = vadd.xlane.f32.xlu1 %v184_v29  ;;  %v3452_v29 = vor.u32 %v3664_v14, %v3451_v22  ;;  %1400 = vmatpush.bf16.msra.mxu1 %v3508_v4  ;;  %v3660_v22 = vld [vmem:[#allocation5 + $0x54] sm:$0xf0]  ;;  %v3499_v14 = vld [vmem:[#allocation5 + $0xd0] sm:$0xf] }
  0xac   :  { %424 = vadd.xlane.f32.xlu2 %v423_v34  ;;  %179 = vadd.xlane.f32.xlu0 %v178_v35  ;;  %v3663_v34 = vld [vmem:[#allocation5 + $0x74] sm:$0xf]  ;;  %v3453_v35 = vld [vmem:[#allocation5 + $0x78] sm:$0xf0] }
  0xad   :  { %v3456_v20 = vor.u32 %v3663_v34, %v3453_v35  ;;  %1310 = vmatpush.bf16.msra.mxu0 %v3452_v29  ;;  %v3676_v29 = vld [vmem:[#allocation5 + $0xd4] sm:$0xf0]  ;;  %v3437_v34 = vld [vmem:[#allocation5 + $0x58] sm:$0xf0] }
  0xae   :  { %v3500_v35 = vor.u32 %v3676_v29, %v3499_v14  ;;  %v3440_v36 = vor.u32 %v3659_v30, %v3437_v34  ;;  %v3655_v29 = vld [vmem:[#allocation5 + $0x34] sm:$0xf]  ;;  %v3421_v30 = vld [vmem:[#allocation5 + $0x38] sm:$0xf0] }
  0xaf   :  { %1488 = vmatpush.bf16.msra.mxu2 %v3456_v20  ;;  %v3675_v20 = vld [vmem:[#allocation5 + $0xd4] sm:$0xf] }
  0xb0   :  { %1401 = vmatpush.bf16.msra.mxu1 %v3500_v35  ;;  %v3424_v35 = vor.u32 %v3655_v29, %v3421_v30  ;;  %v3651_v29 = vld [vmem:[#allocation5 + $0x14] sm:$0xf]  ;;  %v3405_v30 = vld [vmem:[#allocation5 + $0x18] sm:$0xf0] }
  0xb3   :  { %188 = vadd.xlane.f32.xlu1 %v187_v43  ;;  %v3517_v43 = vld [vmem:[#allocation5 + $0xf8] sm:$0xf0] }
  0xb4   :  { %182 = vadd.xlane.f32.xlu0 %v181_v46  ;;  %427 = vadd.xlane.f32.xlu2 %v426_v49  ;;  %v3520_v46 = vor.u32 %v3679_v21, %v3517_v43  ;;  %v3443_v49 = vld [vmem:[#allocation5 + $0x60] sm:$0xf]  ;;  %v3501_v21 = vld [vmem:[#allocation5 + $0xd8] sm:$0xf0] }
  0xb5   :  { %v3444_v58 = vor.u32 %v3662_v50, %v3443_v49  ;;  %v3504_v43 = vor.u32 %v3675_v20, %v3501_v21  ;;  %v3658_v49 = vld [vmem:[#allocation5 + $0x44] sm:$0xf0]  ;;  %v3491_v50 = vld [vmem:[#allocation5 + $0xc0] sm:$0xf]  ;;  %v3485_v20 = vld [vmem:[#allocation5 + $0xb8] sm:$0xf0] }
  0xb6   :  { %1577 = vmatpush.bf16.msra.mxu3 %v3520_v46  ;;  %v3427_v46 = vld [vmem:[#allocation5 + $0x40] sm:$0xf] }
  0xb7   :  { %1311 = vmatpush.bf16.msra.mxu0 %v3444_v58  ;;  %v3428_v55 = vor.u32 %v3658_v49, %v3427_v46  ;;  %v3674_v58 = vld [vmem:[#allocation5 + $0xc4] sm:$0xf0]  ;;  %v3475_v49 = vld [vmem:[#allocation5 + $0xa0] sm:$0xf] }
  0xb8   :  { %v3654_v46 = vld [vmem:[#allocation5 + $0x24] sm:$0xf0] }
  0xbc   :  { %430 = vadd.xlane.f32.xlu0 %v429_v2  ;;  %191 = vadd.xlane.f32.xlu2 %v190_v3  ;;  %v3661_v2 = vld [vmem:[#allocation5 + $0x64] sm:$0xf]  ;;  %v3445_v3 = vld [vmem:[#allocation5 + $0x68] sm:$0xf0] }
  0xbd   :  { %v3448_v5 = vor.u32 %v3661_v2, %v3445_v3  ;;  %v3429_v2 = vld [vmem:[#allocation5 + $0x48] sm:$0xf0]  ;;  %v3492_v3 = vor.u32 %v3674_v58, %v3491_v50  ;;  %v3653_v58 = vld [vmem:[#allocation5 + $0x24] sm:$0xf] }
  0xbe   :  { %v3432_v4 = vor.u32 %v3657_v18, %v3429_v2  ;;  %v3413_v18 = vld [vmem:[#allocation5 + $0x28] sm:$0xf0] }
  0xbf   :  { %1489 = vmatpush.bf16.msra.mxu2 %v3448_v5  ;;  %v3673_v5 = vld [vmem:[#allocation5 + $0xc4] sm:$0xf]  ;;  %1402 = vmatpush.bf16.msra.mxu1 %v3492_v3  ;;  %v3416_v3 = vor.u32 %v3653_v58, %v3413_v18  ;;  %v3459_v58 = vld [vmem:[#allocation5 + $0x80] sm:$0xf]  ;;  %v3666_v18 = vld [vmem:[#allocation5 + $0x84] sm:$0xf0] }
  0xc3   :  { %1490 = vmatpush.bf16.msra.mxu2 %v3440_v36  ;;  %v3671_v36 = vld [vmem:[#allocation5 + $0xb4] sm:$0xf] }
  0xc4   :  { %433 = vadd.xlane.f32.xlu0 %v432_v24  ;;  %194 = vadd.xlane.f32.xlu2 %v193_v25  ;;  %v3677_v24 = vld [vmem:[#allocation5 + $0xe4] sm:$0xf]  ;;  %v3509_v25 = vld [vmem:[#allocation5 + $0xe8] sm:$0xf0]  ;;  %v3488_v21 = vor.u32 %v3671_v36, %v3485_v20  ;;  %v3408_v36 = vor.u32 %v3651_v29, %v3405_v30  ;;  %v3667_v20 = vld [vmem:[#allocation5 + $0x94] sm:$0xf] }
  0xc7   :  { %1491 = vmatpush.bf16.msra.mxu2 %v3432_v4  ;;  %v3669_v4 = vld [vmem:[#allocation5 + $0xa4] sm:$0xf] }
  0xcb   :  { %1492 = vmatpush.bf16.msra.mxu2 %v3424_v35 }
  0xcc   :  { %197 = vadd.xlane.f32.xlu0 %v196_v10  ;;  %v3512_v10 = vor.u32 %v3677_v24, %v3509_v25  ;;  %v3493_v24 = vld [vmem:[#allocation5 + $0xc8] sm:$0xf0] }
  0xcd   :  { %v3496_v25 = vor.u32 %v3673_v5, %v3493_v24  ;;  %v3477_v5 = vld [vmem:[#allocation5 + $0xa8] sm:$0xf0] }
  0xce   :  { %1578 = vmatpush.bf16.msra.mxu3 %v3512_v10  ;;  %v3419_v10 = vld [vmem:[#allocation5 + $0x30] sm:$0xf]  ;;  %v3480_v24 = vor.u32 %v3669_v4, %v3477_v5  ;;  %v3397_v4 = vld [vmem:[#allocation5 + $0x8] sm:$0xf0]  ;;  %v3665_v5 = vld [vmem:[#allocation5 + $0x84] sm:$0xf] }
  0xcf   :  { %1493 = vmatpush.bf16.msra.mxu2 %v3416_v3  ;;  %v3460_v3 = vor.u32 %v3666_v18, %v3459_v58 }
  0xd2   :  { %1579 = vmatpush.bf16.msra.mxu3 %v3504_v43  ;;  %v3411_v43 = vld [vmem:[#allocation5 + $0x20] sm:$0xf] }
  0xd3   :  { %v3412_v50 = vor.u32 %v3654_v46, %v3411_v43  ;;  %1494 = vmatpush.bf16.msra.mxu2 %v3408_v36 }
  0xd4   :  { %200 = vadd.xlane.f32.xlu0 %v199_v17  ;;  %v3435_v17 = vld [vmem:[#allocation5 + $0x50] sm:$0xf] }
  0xd5   :  { %v3436_v15 = vor.u32 %v3660_v22, %v3435_v17  ;;  %v3656_v17 = vld [vmem:[#allocation5 + $0x34] sm:$0xf0]  ;;  %v3483_v22 = vld [vmem:[#allocation5 + $0xb0] sm:$0xf] }
  0xd6   :  { %1580 = vmatpush.bf16.msra.mxu3 %v3496_v25  ;;  %v3420_v14 = vor.u32 %v3656_v17, %v3419_v10  ;;  %v3403_v25 = vld [vmem:[#allocation5 + $0x10] sm:$0xf]  ;;  %v3652_v10 = vld [vmem:[#allocation5 + $0x14] sm:$0xf0] }
  0xd7   :  { %1312 = vmatpush.bf16.msra.mxu0 %v3436_v15  ;;  %v3672_v15 = vld [vmem:[#allocation5 + $0xb4] sm:$0xf0]  ;;  %v3467_v17 = vld [vmem:[#allocation5 + $0x90] sm:$0xf] }
  0xd8   :  { %v3484_v34 = vor.u32 %v3672_v15, %v3483_v22  ;;  %v3668_v15 = vld [vmem:[#allocation5 + $0x94] sm:$0xf0] }
  0xd9   :  { %v3468_v35 = vor.u32 %v3668_v15, %v3467_v17 }
  0xda   :  { %1403 = vmatpush.bf16.msra.mxu1 %v3484_v34  ;;  %1581 = vmatpush.bf16.msra.mxu3 %v3488_v21  ;;  %v3469_v21 = vld [vmem:[#allocation5 + $0x98] sm:$0xf0] }
  0xdb   :  { %1313 = vmatpush.bf16.msra.mxu0 %v3428_v55  ;;  %v3670_v55 = vld [vmem:[#allocation5 + $0xa4] sm:$0xf0]  ;;  %v3472_v43 = vor.u32 %v3667_v20, %v3469_v21 }
  0xdc   :  { %v3476_v2 = vor.u32 %v3670_v55, %v3475_v49  ;;  %v3395_v49 = vld [vmem:[#allocation5] sm:$0xf] }
  0xde   :  { %1404 = vmatpush.bf16.msra.mxu1 %v3476_v2  ;;  %1582 = vmatpush.bf16.msra.mxu3 %v3480_v24  ;;  %v3649_v2 = vld [vmem:[#allocation5 + $0x4] sm:$0xf]  ;;  %v3461_v24 = vld [vmem:[#allocation5 + $0x88] sm:$0xf0] }
  0xdf   :  { %1314 = vmatpush.bf16.msra.mxu0 %v3420_v14  ;;  %v3404_v14 = vor.u32 %v3652_v10, %v3403_v25  ;;  %v3400_v25 = vor.u32 %v3649_v2, %v3397_v4  ;;  %v3464_v10 = vor.u32 %v3665_v5, %v3461_v24 }
  0xe1   :  { %1495 = vmatpush.bf16.msra.mxu2 %v3400_v25 }
  0xe2   :  { %1405 = vmatpush.bf16.msra.mxu1 %v3468_v35  ;;  %1583 = vmatpush.bf16.msra.mxu3 %v3472_v43 }
  0xe3   :  { %1315 = vmatpush.bf16.msra.mxu0 %v3412_v50  ;;  %v3650_v50 = vld [vmem:[#allocation5 + $0x4] sm:$0xf0] }
  0xe4   :  { %v3396_v55 = vor.u32 %v3650_v50, %v3395_v49 }
  0xe6   :  { %1406 = vmatpush.bf16.msra.mxu1 %v3460_v3  ;;  %1584 = vmatpush.bf16.msra.mxu3 %v3464_v10 }
  0xe7   :  { %1316 = vmatpush.bf16.msra.mxu0 %v3404_v14 }
  0xeb   :  { %1317 = vmatpush.bf16.msra.mxu0 %v3396_v55 }
 0x107   :  { %v410_v22 = vpop.xlane.xlu2 %409 }
 0x108   :  { %v504_v34 = vmul.f32 %v410_v22, %v4127_v33 }
 0x10a   :  { %v4281_v46 = vadd.f32 1e-05, %v504_v34 }
 0x10c   :  { %3725 = vrsqrt.f32 %v4281_v46  ;;  %vm574_vm2 = vweird.f32 %v4281_v46 }
 0x10e   :  { %v419_v17 = vpop.xlane.xlu1 %418 }
 0x10f   :  { %v507_v22 = vmul.f32 %v419_v17, %v4127_v33  ;;  %v174_v14 = vpop.xlane.xlu2 %173  ;;  %v413_v15 = vpop.xlane.xlu0 %412  ;;  %v4311_v17 = vld [vmem:[#allocation8] sm:$0xff] }
 0x110   :  { %v257_v29 = vmul.f32 %v4127_v33, %v174_v14  ;;  %v505_v30 = vmul.f32 %v413_v15, %v4127_v33  ;;  %7031 = vst [vmem:[#allocation19_spill] sm:$0xff] %v4311_v17 }
 0x111   :  { %v4287_v34 = vadd.f32 1e-05, %v507_v22 }
 0x112   :  { %v3726_v35 = vpop.eup %3725  ;;  %v4290_v36 = vsub.f32 %v4140_v47, %v257_v29  ;;  %v4293_v20 = vsub.f32 %v4142_v48, %v257_v29  ;;  %v4295_v21 = vadd.f32 1e-05, %v505_v30 }
 0x113   :  { %v569_v43 = vmul.f32 %v3726_v35, %v4281_v46  ;;  %3727 = vrsqrt.f32 %v4287_v34  ;;  %vm575_vm1 = vweird.f32 %v3726_v35  ;;  %vm604_vm5 = vweird.f32 %v4287_v34 }
 0x114   :  { %7029 = vst [vmem:[#allocation17_spill] sm:$0xff] %v4290_v36  ;;  %3729 = vrsqrt.f32 %v4295_v21  ;;  %v362_v49 = vmul.f32 %v4290_v36, %v4290_v36  ;;  %v363_v50 = vmul.f32 %v4293_v20, %v4293_v20  ;;  %vm576_vm3 = vmor %vm574_vm2, %vm575_vm1  ;;  %vm584_vm4 = vweird.f32 %v4295_v21 }
 0x115   :  { %7030 = vst [vmem:[#allocation18_spill] sm:$0xff] %v4293_v20  ;;  %v570_v55 = vmul.f32 %v3726_v35, %v569_v43 }
 0x116   :  { %v422_v47 = vpop.xlane.xlu1 %421  ;;  %v435_v58 = vadd.f32 %v363_v50, %v362_v49  ;;  %v4325_v49 = vld [vmem:[#allocation8 + $0x8] sm:$0xff] }
 0x117   :  { %v571_v18 = vmul.f32 0.5, %v570_v55  ;;  %v508_v48 = vmul.f32 %v422_v47, %v4127_v33  ;;  %v177_v2 = vpop.xlane.xlu2 %176  ;;  %v416_v3 = vpop.xlane.xlu0 %415  ;;  %7034 = vst [vmem:[#allocation22_spill] sm:$0xff] %v4325_v49  ;;  %v4332_v47 = vperm.slane %v4311_v17, 0  ;;  %v4349_v46 = vperm.slane %v4325_v49, 0 }
 0x118   :  { %v258_v4 = vmul.f32 %v4127_v33, %v177_v2  ;;  %v506_v5 = vmul.f32 %v416_v3, %v4127_v33  ;;  %436 = vadd.xlane.f32.xlu1 %v435_v58  ;;  %v4339_v58 = vld [vmem:[#allocation2 + $0x130] sm:$0xff]  ;;  %v4346_v3 = vperm.slane %v4311_v17, 1  ;;  %v4357_v17 = vperm.slane %v4325_v49, 1 }
 0x119   :  { %v4307_v24 = vpop.eup %3727  ;;  %v572_v25 = vsub.f32 1.5, %v571_v18  ;;  %v4309_v10 = vadd.f32 1e-05, %v508_v48  ;;  %v4341_v18 = vld [vmem:[#allocation2 + $0x138] sm:$0xff] }
 0x11a   :  { %v4313_v22 = vpop.eup %3729  ;;  %v599_v14 = vmul.f32 %v4307_v24, %v4287_v34  ;;  %v4318_v15 = vsub.f32 %v4183_v8, %v258_v4  ;;  %v4321_v29 = vsub.f32 %v4185_v9, %v258_v4  ;;  %v4327_v50 = vadd.f32 1e-05, %v506_v5  ;;  %7035 = vst [vmem:[#allocation23_spill] sm:$0xff] %v4341_v18 }
 0x11b   :  { %v573_v30 = vmul.f32 %v3726_v35, %v572_v25  ;;  %v579_v43 = vmul.f32 %v4313_v22, %v4295_v21  ;;  %3731 = vrsqrt.f32 %v4309_v10  ;;  %v202_v36 = vadd.f32 %v4341_v18, %v4339_v58 }
 0x11c   :  { %7032 = vst [vmem:[#allocation20_spill] sm:$0xff] %v4318_v15  ;;  %v364_v55 = vmul.f32 %v4318_v15, %v4318_v15  ;;  %v365_v9 = vmul.f32 %v4321_v29, %v4321_v29  ;;  %v600_v48 = vmul.f32 %v4307_v24, %v599_v14  ;;  %3733 = vrsqrt.f32 %v4327_v50 }
 0x11d   :  { %7033 = vst [vmem:[#allocation21_spill] sm:$0xff] %v4321_v29  ;;  %v580_v8 = vmul.f32 %v4313_v22, %v579_v43  ;;  %v577_v15 = vsel %vm576_vm3, %v3726_v35, %v573_v30  ;;  %v4366_v35 = vld [vmem:[#allocation2 + $0x140] sm:$0xff]  ;;  %v4368_v30 = vld [vmem:[#allocation2 + $0x148] sm:$0xff]  ;;  %vm585_vm6 = vweird.f32 %v4313_v22  ;;  %vm605_vm7 = vweird.f32 %v4307_v24 }
 0x11e   :  { %v186_v2 = vpop.xlane.xlu1 %185  ;;  %v438_v29 = vadd.f32 %v365_v9, %v364_v55  ;;  %7038 = vst [vmem:[#allocation26_spill] sm:$0xff] %v4366_v35  ;;  %v601_v55 = vmul.f32 0.5, %v600_v48  ;;  %vm586_vm8 = vmor %vm584_vm4, %vm585_vm6  ;;  %vm594_vm10 = vweird.f32 %v4327_v50  ;;  %vm614_vm15 = vweird.f32 %v4309_v10 }
 0x11f   :  { %v581_v4 = vmul.f32 0.5, %v580_v8  ;;  %v261_v5 = vmul.f32 %v4127_v33, %v186_v2  ;;  %v425_v25 = vpop.xlane.xlu2 %424  ;;  %v180_v43 = vpop.xlane.xlu0 %179  ;;  %7039 = vst [vmem:[#allocation27_spill] sm:$0xff] %v4368_v30  ;;  %vm4437_vm11 = vmor %vm604_vm5, %vm605_vm7 }
 0x120   :  { %v509_v20 = vmul.f32 %v425_v25, %v4127_v33  ;;  %v259_v14 = vmul.f32 %v4127_v33, %v180_v43  ;;  %439 = vadd.xlane.f32.xlu1 %v438_v29 }
 0x121   :  { %v582_v63 = vsub.f32 1.5, %v581_v4  ;;  %v4361_v8 = vsub.f32 %v4196_v23, %v261_v5  ;;  %v4364_v2 = vsub.f32 %v4198_v26, %v261_v5  ;;  %v888_v4 = vmul.f32 %v577_v15, %v4130_v37  ;;  %v4375_v25 = vpop.eup %3731 }
 0x122   :  { %v4372_v9 = vadd.f32 1e-05, %v509_v20  ;;  %v4379_v26 = vsub.f32 %v4204_v27, %v259_v14  ;;  %v4382_v29 = vsub.f32 %v4206_v28, %v259_v14  ;;  %v3734_v5 = vpop.eup %3733  ;;  %v889_v37 = vmul.f32 %v577_v15, %v4132_v38 }
 0x123   :  { %7036 = vst [vmem:[#allocation24_spill] sm:$0xff] %v4361_v8  ;;  %v583_v23 = vmul.f32 %v4313_v22, %v582_v63  ;;  %v370_v48 = vmul.f32 %v4361_v8, %v4361_v8  ;;  %v371_v20 = vmul.f32 %v4364_v2, %v4364_v2  ;;  %v205_v63 = vadd.f32 %v4368_v30, %v4366_v35 }
 0x124   :  { %7037 = vst [vmem:[#allocation25_spill] sm:$0xff] %v4364_v2  ;;  %3735 = vrsqrt.f32 %v4372_v9  ;;  %v589_v27 = vmul.f32 %v3734_v5, %v4327_v50  ;;  %v366_v28 = vmul.f32 %v4379_v26, %v4379_v26  ;;  %v367_v43 = vmul.f32 %v4382_v29, %v4382_v29 }
 0x125   :  { %7040 = vst [vmem:[#allocation28_spill] sm:$0xff] %v4379_v26  ;;  %v602_v14 = vsub.f32 1.5, %v601_v55  ;;  %v447_v8 = vadd.f32 %v371_v20, %v370_v48  ;;  %v587_v38 = vsel %vm586_vm8, %v4313_v22, %v583_v23  ;;  %v954_v15 = vmul.f32 %v4332_v47, %v888_v4 }
 0x126   :  { %7041 = vst [vmem:[#allocation29_spill] sm:$0xff] %v4382_v29  ;;  %v189_v2 = vpop.xlane.xlu1 %188  ;;  %v590_v49 = vmul.f32 %v3734_v5, %v589_v27  ;;  %v441_v62 = vadd.f32 %v367_v43, %v366_v28  ;;  %v890_v18 = vmul.f32 %v587_v38, %v4150_v53  ;;  %v609_v26 = vmul.f32 %v4375_v25, %v4309_v10 }
 0x127   :  { %v262_v30 = vmul.f32 %v4127_v33, %v189_v2  ;;  %v428_v21 = vpop.xlane.xlu2 %427  ;;  %v183_v35 = vpop.xlane.xlu0 %182  ;;  %448 = vadd.xlane.f32.xlu0 %v447_v8  ;;  %v891_v55 = vmul.f32 %v587_v38, %v4152_v54  ;;  %v955_v22 = vmul.f32 %v4349_v46, %v889_v37  ;;  %vm595_vm9 = vweird.f32 %v3734_v5 }
 0x128   :  { %v260_v29 = vmul.f32 %v4127_v33, %v183_v35  ;;  %v591_v23 = vmul.f32 0.5, %v590_v49  ;;  %203 = vadd.xlane.f32.xlu1 %v202_v36  ;;  %442 = vadd.xlane.f32.xlu2 %v441_v62  ;;  %v956_v2 = vmul.f32 %v4332_v47, %v890_v18  ;;  %v1020_v49 = vadd.f32 %v4346_v3, %v954_v15  ;;  %vm596_vm12 = vmor %vm594_vm10, %vm595_vm9 }
 0x129   :  { %v4410_v4 = vsub.f32 %v4219_v39, %v262_v30  ;;  %v4416_v48 = vsub.f32 %v4221_v40, %v262_v30  ;;  %v510_v62 = vmul.f32 %v428_v21, %v4127_v33  ;;  %v603_v18 = vmul.f32 %v4307_v24, %v602_v14 }
 0x12a   :  { %v4413_v53 = vpop.eup %3735  ;;  %v4419_v8 = vsub.f32 %v4227_v41, %v260_v29  ;;  %v4422_v54 = vsub.f32 %v4229_v42, %v260_v29  ;;  %v592_v35 = vsub.f32 1.5, %v591_v23  ;;  %v1022_v36 = vadd.f32 %v4346_v3, %v956_v2 }
 0x12b   :  { %7042 = vst [vmem:[#allocation30_spill] sm:$0xff] %v4416_v48  ;;  %v619_v39 = vmul.f32 %v4413_v53, %v4372_v9  ;;  %v957_v40 = vmul.f32 %v4349_v46, %v891_v55  ;;  %v1021_v41 = vadd.f32 %v4357_v17, %v955_v22  ;;  %v372_v37 = vmul.f32 %v4410_v4, %v4410_v4 }
 0x12c   :  { %v593_v30 = vmul.f32 %v3734_v5, %v592_v35  ;;  %v1084_v20 = vpack.c.bf16 %v1022_v36, %v1020_v49  ;;  %v373_v27 = vmul.f32 %v4416_v48, %v4416_v48  ;;  %v368_v34 = vmul.f32 %v4419_v8, %v4419_v8 }
 0x12d   :  { %v620_v29 = vmul.f32 %v4413_v53, %v619_v39  ;;  %v1023_v50 = vadd.f32 %v4357_v17, %v957_v40  ;;  %v369_v28 = vmul.f32 %v4422_v54, %v4422_v54  ;;  %v610_v43 = vmul.f32 %v4375_v25, %v609_v26  ;;  %v4480_v40 = vld [vmem:[#allocation2 + $0x150] sm:$0xff] }
 0x12e   :  { %v4453_v14 = vadd.f32 1e-05, %v510_v62  ;;  %1318 = vmatmul.bf16.vlgmr.msra.gmra.mxu0 %v1084_v20  ;;  %1496 = vmatmul.bf16.vlgmr.msra.gmra.mxu2 %v1084_v20  ;;  %v597_v21 = vsel %vm596_vm12, %v3734_v5, %v593_v30  ;;  %v450_v2 = vadd.f32 %v373_v27, %v372_v37  ;;  %v607_v35 = vsel %vm4437_vm11, %v4307_v24, %v603_v18  ;;  %v4474_v18 = vld [vmem:[#allocation2 + $0x178] sm:$0xff] }
 0x12f   :  { %v192_v38 = vpop.xlane.xlu2 %191  ;;  %v431_v15 = vpop.xlane.xlu0 %430  ;;  %v1085_v55 = vpack.c.bf16 %v1023_v50, %v1021_v41  ;;  %v444_v49 = vadd.f32 %v369_v28, %v368_v34  ;;  %v892_v26 = vmul.f32 %v597_v21, %v4165_v60  ;;  %v621_v39 = vmul.f32 0.5, %v620_v29  ;;  %v4482_v41 = vld [vmem:[#allocation2 + $0x158] sm:$0xff] }
 0x130   :  { %v263_v22 = vmul.f32 %v4127_v33, %v192_v38  ;;  %v511_v23 = vmul.f32 %v431_v15, %v4127_v33  ;;  %206 = vadd.xlane.f32.xlu1 %v205_v63  ;;  %3737 = vrsqrt.f32 %v4453_v14  ;;  %451 = vadd.xlane.f32.xlu0 %v450_v2  ;;  %v4470_v63 = vld [vmem:[#allocation2 + $0x170] sm:$0xff]  ;;  %v894_v24 = vmul.f32 %v607_v35, %v4146_v51 }
 0x131   :  { %1407 = vmatmul.bf16.vlgmr.msra.gmra.mxu1 %v1085_v55  ;;  %1585 = vmatmul.bf16.vlgmr.msra.gmra.mxu3 %v1085_v55  ;;  %v611_v60 = vmul.f32 0.5, %v610_v43  ;;  %v958_v42 = vmul.f32 %v4332_v47, %v892_v26  ;;  %v893_v30 = vmul.f32 %v597_v21, %v4168_v61  ;;  %v622_v51 = vsub.f32 1.5, %v621_v39 }
 0x132   :  { %v4462_v62 = vsub.f32 %v4246_v59, %v263_v22  ;;  %v4465_v5 = vsub.f32 %v4248_v19, %v263_v22  ;;  %v4467_v36 = vadd.f32 1e-05, %v511_v23  ;;  %445 = vadd.xlane.f32.xlu2 %v444_v49  ;;  %v895_v20 = vmul.f32 %v607_v35, %v4148_v52  ;;  %v4561_v49 = vld [vmem:[#allocation2 + $0x190] sm:$0xff] }
 0x133   :  { %vm624_vm13 = vweird.f32 %v4372_v9  ;;  %v214_v27 = vadd.f32 %v4474_v18, %v4470_v63  ;;  %v208_v34 = vadd.f32 %v4482_v41, %v4480_v40  ;;  %v960_v28 = vmul.f32 %v4332_v47, %v894_v24  ;;  %v4528_v24 = vld [vmem:[#allocation2 + $0x188] sm:$0xff] }
 0x134   :  { %3739 = vrsqrt.f32 %v4467_v36  ;;  %v374_v59 = vmul.f32 %v4462_v62, %v4462_v62  ;;  %v375_v19 = vmul.f32 %v4465_v5, %v4465_v5  ;;  %v612_v43 = vsub.f32 1.5, %v611_v60 }
 0x135   :  { %vm625_vm14 = vweird.f32 %v4413_v53  ;;  %v959_v52 = vmul.f32 %v4349_v46, %v893_v30  ;;  %vm615_vm0 = vweird.f32 %v4375_v25  ;;  %v1024_v15 = vadd.f32 %v4346_v3, %v958_v42 }
 0x136   :  { %v453_v29 = vadd.f32 %v375_v19, %v374_v59  ;;  %v4498_v38 = vpop.eup %3737  ;;  %v623_v55 = vmul.f32 %v4413_v53, %v622_v51  ;;  %v961_v2 = vmul.f32 %v4349_v46, %v895_v20  ;;  %vm4515_vm1 = vmor %vm624_vm13, %vm625_vm14  ;;  %v1026_v26 = vadd.f32 %v4346_v3, %v960_v28  ;;  %v4532_v59 = vld [vmem:[#allocation2 + $0x160] sm:$0xff]  ;;  %v4534_v19 = vld [vmem:[#allocation2 + $0x168] sm:$0xff] }
 0x137   :  { %v195_v37 = vpop.xlane.xlu2 %194  ;;  %v4488_v50 = vpop.xlane.xlu0 %433  ;;  %v629_v39 = vmul.f32 %v4498_v38, %v4453_v14  ;;  %v1025_v9 = vadd.f32 %v4357_v17, %v959_v52  ;;  %vm616_vm2 = vmor %vm614_vm15, %vm615_vm0  ;;  %vm644_vm3 = vweird.f32 %v4467_v36  ;;  %vm634_vm5 = vweird.f32 %v4453_v14 }
 0x138   :  { %v264_v61 = vmul.f32 %v4127_v33, %v195_v37  ;;  %454 = vadd.xlane.f32.xlu1 %v453_v29  ;;  %215 = vadd.xlane.f32.xlu0 %v214_v27  ;;  %v1086_v42 = vpack.c.bf16 %v1026_v26, %v1024_v15  ;;  %v1027_v29 = vadd.f32 %v4357_v17, %v961_v2  ;;  %vm635_vm6 = vweird.f32 %v4498_v38 }
 0x139   :  { %v627_v20 = vsel %vm4515_vm1, %v4413_v53, %v623_v55  ;;  %v630_v28 = vmul.f32 %v4498_v38, %v629_v39  ;;  %vm636_vm8 = vmor %vm634_vm5, %vm635_vm6 }
 0x13a   :  { %v4503_v21 = vpop.eup %3739  ;;  %v4507_v22 = vsub.f32 %v4262_v0, %v264_v61  ;;  %v4510_v23 = vsub.f32 %v4264_v1, %v264_v61  ;;  %209 = vadd.xlane.f32.xlu2 %v208_v34  ;;  %v4522_v0 = vld [vmem:[#allocation2 + $0x180] sm:$0xff]  ;;  %v613_v1 = vmul.f32 %v4375_v25, %v612_v43  ;;  %v211_v34 = vadd.f32 %v4534_v19, %v4532_v59 }
 0x13b   :  { %v639_v35 = vmul.f32 %v4503_v21, %v4467_v36  ;;  %v217_v27 = vadd.f32 %v4528_v24, %v4522_v0  ;;  %v1087_v43 = vpack.c.bf16 %v1027_v29, %v1025_v9  ;;  %v898_v53 = vmul.f32 %v627_v20, %v4188_v11 }
 0x13c   :  { %7045 = vst [vmem:[#allocation31_spill] sm:$0xff] %v4507_v22  ;;  %v376_v60 = vmul.f32 %v4507_v22, %v4507_v22  ;;  %v377_v30 = vmul.f32 %v4510_v23, %v4510_v23  ;;  %v617_v52 = vsel %vm616_vm2, %v4375_v25, %v613_v1  ;;  %v631_v26 = vmul.f32 0.5, %v630_v28  ;;  %v4593_v28 = vld [vmem:[#allocation2 + $0x1a8] sm:$0xff] }
 0x13d   :  { %7046 = vst [vmem:[#allocation32_spill] sm:$0xff] %v4510_v23  ;;  %v640_v51 = vmul.f32 %v4503_v21, %v639_v35  ;;  %v4563_v35 = vld [vmem:[#allocation2 + $0x198] sm:$0xff]  ;;  %v896_v25 = vmul.f32 %v617_v52, %v4156_v56  ;;  %v964_v39 = vmul.f32 %v4332_v47, %v898_v53  ;;  %vm645_vm4 = vweird.f32 %v4503_v21 }
 0x13e   :  { %1323 = vmatmul.bf16.gmra.mxu0 %v1086_v42  ;;  %1501 = vmatmul.bf16.gmra.mxu2 %v1086_v42  ;;  %v456_v10 = vadd.f32 %v377_v30, %v376_v60  ;;  %v897_v60 = vmul.f32 %v617_v52, %v4158_v57  ;;  %vm646_vm7 = vmor %vm644_vm3, %vm645_vm4 }
 0x13f   :  { %v198_v37 = vpop.xlane.xlu0 %197  ;;  %v641_v15 = vmul.f32 0.5, %v640_v51  ;;  %v962_v30 = vmul.f32 %v4332_v47, %v896_v25  ;;  %v632_v51 = vsub.f32 1.5, %v631_v26  ;;  %v1030_v57 = vadd.f32 %v4346_v3, %v964_v39  ;;  %v4617_v39 = vld [vmem:[#allocation2 + $0x1b8] sm:$0xff] }
 0x140   :  { %v265_v61 = vmul.f32 %v4127_v33, %v198_v37  ;;  %457 = vadd.xlane.f32.xlu1 %v456_v10  ;;  %218 = vadd.xlane.f32.xlu0 %v217_v27  ;;  %v963_v10 = vmul.f32 %v4349_v46, %v897_v60 }
 0x141   :  { %1412 = vmatmul.bf16.gmra.mxu1 %v1087_v43  ;;  %1590 = vmatmul.bf16.gmra.mxu3 %v1087_v43  ;;  %v642_v9 = vsub.f32 1.5, %v641_v15  ;;  %v1028_v43 = vadd.f32 %v4346_v3, %v962_v30 }
 0x142   :  { %v4556_v55 = vsub.f32 %v4268_v6, %v265_v61  ;;  %v4559_v2 = vsub.f32 %v4270_v7, %v265_v61  ;;  %212 = vadd.xlane.f32.xlu2 %v211_v34  ;;  %v899_v6 = vmul.f32 %v627_v20, %v4191_v12  ;;  %v220_v7 = vadd.f32 %v4563_v35, %v4561_v49  ;;  %v4591_v34 = vld [vmem:[#allocation2 + $0x1a0] sm:$0xff] }
 0x143   :  { %v643_v20 = vmul.f32 %v4503_v21, %v642_v9  ;;  %v633_v61 = vmul.f32 %v4498_v38, %v632_v51  ;;  %v1088_v36 = vpack.c.bf16 %v1030_v57, %v1028_v43  ;;  %v223_v53 = vadd.f32 %v4593_v28, %v4591_v34  ;;  %v4630_v51 = vld [vmem:[#allocation2 + $0x1c0] sm:$0xff] }
 0x144   :  { %7049 = vst [vmem:[#allocation33_spill] sm:$0xff] %v4556_v55  ;;  %v378_v11 = vmul.f32 %v4556_v55, %v4556_v55  ;;  %v379_v1 = vmul.f32 %v4559_v2, %v4559_v2  ;;  %v965_v12 = vmul.f32 %v4349_v46, %v899_v6  ;;  %v1029_v15 = vadd.f32 %v4357_v17, %v963_v10 }
 0x145   :  { %7050 = vst [vmem:[#allocation34_spill] sm:$0xff] %v4559_v2  ;;  %v647_v25 = vsel %vm646_vm7, %v4503_v21, %v643_v20  ;;  %v512_v10 = vmul.f32 %v4488_v50, %v4127_v33 }
 0x146   :  { %v459_v42 = vadd.f32 %v379_v1, %v378_v11  ;;  %v637_v1 = vsel %vm636_vm8, %v4498_v38, %v633_v61  ;;  %v902_v6 = vmul.f32 %v647_v25, %v4234_v44  ;;  %v903_v21 = vmul.f32 %v647_v25, %v4237_v45 }
 0x147   :  { %v201_v56 = vpop.xlane.xlu0 %200  ;;  %v900_v14 = vmul.f32 %v637_v1, %v4211_v31  ;;  %v901_v60 = vmul.f32 %v637_v1, %v4214_v32  ;;  %v544_v43 = vadd.f32 1e-05, %v512_v10 }
 0x148   :  { %v266_v29 = vmul.f32 %v4127_v33, %v201_v56  ;;  %221 = vadd.xlane.f32.xlu1 %v220_v7  ;;  %v4615_v7 = vld [vmem:[#allocation2 + $0x1b0] sm:$0xff]  ;;  %v968_v9 = vmul.f32 %v4332_v47, %v902_v6  ;;  %v969_v56 = vmul.f32 %v4349_v46, %v903_v21 }
 0x149   :  { %v226_v38 = vadd.f32 %v4617_v39, %v4615_v7  ;;  %v966_v44 = vmul.f32 %v4332_v47, %v900_v14  ;;  %v967_v31 = vmul.f32 %v4349_v46, %v901_v60  ;;  %3741 = vrsqrt.f32 %v544_v43 }
 0x14a   :  { %v4585_v37 = vsub.f32 %v4274_v13, %v266_v29  ;;  %v4588_v27 = vsub.f32 %v4276_v16, %v266_v29  ;;  %460 = vadd.xlane.f32.xlu2 %v459_v42  ;;  %v1031_v13 = vadd.f32 %v4357_v17, %v965_v12  ;;  %v1034_v42 = vadd.f32 %v4346_v3, %v968_v9  ;;  %v4632_v29 = vld [vmem:[#allocation2 + $0x1c8] sm:$0xff] }
 0x14b   :  { %v1032_v30 = vadd.f32 %v4346_v3, %v966_v44  ;;  %v1035_v45 = vadd.f32 %v4357_v17, %v969_v56  ;;  %v1033_v12 = vadd.f32 %v4357_v17, %v967_v31  ;;  %v229_v57 = vadd.f32 %v4632_v29, %v4630_v51 }
 0x14c   :  { %7051 = vst [vmem:[#allocation35_spill] sm:$0xff] %v4585_v37  ;;  %v380_v16 = vmul.f32 %v4585_v37, %v4585_v37  ;;  %v381_v52 = vmul.f32 %v4588_v27, %v4588_v27  ;;  %v1089_v11 = vpack.c.bf16 %v1031_v13, %v1029_v15  ;;  %vm654_vm9 = vweird.f32 %v544_v43  ;;  %v7076_v37 = vld [vmem:[#allocation22_spill] sm:$0xff] }
 0x14d   :  { %7052 = vst [vmem:[#allocation36_spill] sm:$0xff] %v4588_v27  ;;  %v1090_v32 = vpack.c.bf16 %v1034_v42, %v1032_v30  ;;  %v1091_v20 = vpack.c.bf16 %v1035_v45, %v1033_v12  ;;  %v4787_v23 = vperm.slane %v7076_v37, 2 }
 0x14e   :  { %1328 = vmatmul.bf16.gmra.mxu0 %v1088_v36  ;;  %1506 = vmatmul.bf16.gmra.mxu2 %v1088_v36  ;;  %v462_v26 = vadd.f32 %v381_v52, %v380_v16 }
 0x14f   :  { %v3742_v61 = vpop.eup %3741 }
 0x150   :  { %224 = vadd.xlane.f32.xlu1 %v223_v53  ;;  %v649_v13 = vmul.f32 %v3742_v61, %v544_v43  ;;  %vm655_vm10 = vweird.f32 %v3742_v61 }
 0x151   :  { %1417 = vmatmul.bf16.gmra.mxu1 %v1089_v11  ;;  %1595 = vmatmul.bf16.gmra.mxu3 %v1089_v11  ;;  %vm656_vm11 = vmor %vm654_vm9, %vm655_vm10 }
 0x152   :  { %463 = vadd.xlane.f32.xlu2 %v462_v26  ;;  %v650_v36 = vmul.f32 %v3742_v61, %v649_v13  ;;  %v7056_v13 = vld [vmem:[#allocation15_spill] sm:$0xff] }
 0x154   :  { %v651_v15 = vmul.f32 0.5, %v650_v36 }
 0x156   :  { %v652_v26 = vsub.f32 1.5, %v651_v15 }
 0x158   :  { %v653_v14 = vmul.f32 %v3742_v61, %v652_v26  ;;  %v7058_v26 = vld [vmem:[#allocation17_spill] sm:$0xff] }
 0x15a   :  { %227 = vadd.xlane.f32.xlu2 %v226_v38  ;;  %v657_v30 = vsel %vm656_vm11, %v3742_v61, %v653_v14 }
 0x15e   :  { %1333 = vmatmul.bf16.gmra.mxu0 %v1090_v32  ;;  %1511 = vmatmul.bf16.gmra.mxu2 %v1090_v32 }
 0x161   :  { %1422 = vmatmul.bf16.gmra.mxu1 %v1091_v20  ;;  %1600 = vmatmul.bf16.gmra.mxu3 %v1091_v20 }
 0x162   :  { %230 = vadd.xlane.f32.xlu2 %v229_v57  ;;  %v7054_v57 = vld [vmem:[#allocation23_spill] sm:$0xff] }
 0x18b   :  { %v437_v16 = vpop.xlane.xlu1 %436 }
 0x18c   :  { %v513_v52 = vmul.f32 %v437_v16, %v4127_v33  ;;  %v904_v16 = vmul.f32 %v657_v30, %v7056_v13  ;;  %v7062_v13 = vld [vmem:[#allocation27_spill] sm:$0xff] }
 0x18e   :  { %v545_v53 = vadd.f32 1e-05, %v513_v52  ;;  %v7057_v52 = vld [vmem:[#allocation16_spill] sm:$0xff] }
 0x18f   :  { %v905_v36 = vmul.f32 %v657_v30, %v7057_v52 }
 0x190   :  { %3743 = vrsqrt.f32 %v545_v53  ;;  %vm664_vm13 = vweird.f32 %v545_v53 }
 0x193   :  { %v440_v25 = vpop.xlane.xlu1 %439 }
 0x194   :  { %v514_v11 = vmul.f32 %v440_v25, %v4127_v33 }
 0x196   :  { %v3744_v1 = vpop.eup %3743  ;;  %v4641_v50 = vadd.f32 1e-05, %v514_v11 }
 0x197   :  { %v659_v6 = vmul.f32 %v3744_v1, %v545_v53  ;;  %vm665_vm12 = vweird.f32 %v3744_v1 }
 0x198   :  { %3745 = vrsqrt.f32 %v4641_v50  ;;  %vm666_vm14 = vmor %vm664_vm13, %vm665_vm12  ;;  %vm674_vm15 = vweird.f32 %v4641_v50 }
 0x199   :  { %v660_v21 = vmul.f32 %v3744_v1, %v659_v6  ;;  %v7059_v6 = vld [vmem:[#allocation18_spill] sm:$0xff] }
 0x19a   :  { %v449_v60 = vpop.xlane.xlu0 %448 }
 0x19b   :  { %v661_v9 = vmul.f32 0.5, %v660_v21  ;;  %v204_v38 = vpop.xlane.xlu1 %203  ;;  %v443_v44 = vpop.xlane.xlu2 %442  ;;  %v517_v43 = vmul.f32 %v449_v60, %v4127_v33  ;;  %v970_v60 = vmul.f32 %v4332_v47, %v904_v16 }
 0x19c   :  { %v267_v42 = vmul.f32 %v4127_v33, %v204_v38  ;;  %v515_v31 = vmul.f32 %v443_v44, %v4127_v33  ;;  %v971_v38 = vmul.f32 %v4349_v46, %v905_v36 }
 0x19d   :  { %v662_v56 = vsub.f32 1.5, %v661_v9  ;;  %v4668_v21 = vadd.f32 1e-05, %v517_v43 }
 0x19e   :  { %v4646_v45 = vpop.eup %3745  ;;  %v4649_v12 = vsub.f32 %v4339_v58, %v267_v42  ;;  %v4652_v20 = vsub.f32 %v7054_v57, %v267_v42  ;;  %v4654_v10 = vadd.f32 1e-05, %v515_v31  ;;  %v7060_v57 = vld [vmem:[#allocation26_spill] sm:$0xff] }
 0x19f   :  { %v663_v32 = vmul.f32 %v3744_v1, %v662_v56  ;;  %v669_v61 = vmul.f32 %v4646_v45, %v4641_v50  ;;  %vm675_vm0 = vweird.f32 %v4646_v45  ;;  %vm704_vm5 = vweird.f32 %v4668_v21 }
 0x1a0   :  { %7053 = vst [vmem:[#allocation37_spill] sm:$0xff] %v4649_v12  ;;  %3747 = vrsqrt.f32 %v4654_v10  ;;  %v382_v58 = vmul.f32 %v4649_v12, %v4649_v12  ;;  %v383_v15 = vmul.f32 %v4652_v20, %v4652_v20  ;;  %vm684_vm1 = vweird.f32 %v4654_v10  ;;  %vm676_vm3 = vmor %vm674_vm15, %vm675_vm0 }
 0x1a1   :  { %7055 = vst [vmem:[#allocation23_spill] sm:$0xff] %v4652_v20  ;;  %v667_v25 = vsel %vm666_vm14, %v3744_v1, %v663_v32  ;;  %v670_v44 = vmul.f32 %v4646_v45, %v669_v61  ;;  %v1036_v61 = vadd.f32 %v4346_v3, %v970_v60  ;;  %3749 = vrsqrt.f32 %v4668_v21  ;;  %v7070_v20 = vld [vmem:[#allocation19_spill] sm:$0xff] }
 0x1a2   :  { %v465_v53 = vadd.f32 %v383_v15, %v382_v58  ;;  %v906_v11 = vmul.f32 %v667_v25, %v7058_v26  ;;  %v907_v14 = vmul.f32 %v667_v25, %v7059_v6  ;;  %v1037_v58 = vadd.f32 %v4357_v17, %v971_v38 }
 0x1a3   :  { %v207_v9 = vpop.xlane.xlu1 %206  ;;  %v452_v30 = vpop.xlane.xlu0 %451  ;;  %v671_v15 = vmul.f32 0.5, %v670_v44 }
 0x1a4   :  { %v268_v56 = vmul.f32 %v4127_v33, %v207_v9  ;;  %466 = vadd.xlane.f32.xlu0 %v465_v53  ;;  %v972_v42 = vmul.f32 %v4332_v47, %v906_v11  ;;  %v973_v1 = vmul.f32 %v4349_v46, %v907_v14  ;;  %v518_v9 = vmul.f32 %v452_v30, %v4127_v33 }
 0x1a5   :  { %v446_v31 = vpop.xlane.xlu2 %445 }
 0x1a6   :  { %v4676_v32 = vpop.eup %3747  ;;  %v4679_v43 = vsub.f32 %v7060_v57, %v268_v56  ;;  %v4682_v16 = vsub.f32 %v7062_v13, %v268_v56  ;;  %v516_v36 = vmul.f32 %v446_v31, %v4127_v33  ;;  %v1038_v25 = vadd.f32 %v4346_v3, %v972_v42 }
 0x1a7   :  { %v679_v52 = vmul.f32 %v4676_v32, %v4654_v10  ;;  %v1039_v53 = vadd.f32 %v4357_v17, %v973_v1  ;;  %v672_v57 = vsub.f32 1.5, %v671_v15  ;;  %v4704_v30 = vpop.eup %3749  ;;  %v4715_v15 = vld [vmem:[#allocation2 + $0x1d8] sm:$0xff]  ;;  %vm685_vm2 = vweird.f32 %v4676_v32 }
 0x1a8   :  { %7061 = vst [vmem:[#allocation15_spill] sm:$0xff] %v4679_v43  ;;  %v4693_v11 = vadd.f32 1e-05, %v516_v36  ;;  %v384_v6 = vmul.f32 %v4679_v43, %v4679_v43  ;;  %v385_v14 = vmul.f32 %v4682_v16, %v4682_v16  ;;  %v1092_v60 = vpack.c.bf16 %v1038_v25, %v1036_v61  ;;  %vm686_vm4 = vmor %vm684_vm1, %vm685_vm2 }
 0x1a9   :  { %7063 = vst [vmem:[#allocation16_spill] sm:$0xff] %v4682_v16  ;;  %v680_v26 = vmul.f32 %v4676_v32, %v679_v52  ;;  %v1093_v38 = vpack.c.bf16 %v1039_v53, %v1037_v58  ;;  %v4706_v61 = vadd.f32 1e-05, %v518_v9  ;;  %vm705_vm6 = vweird.f32 %v4704_v30 }
 0x1aa   :  { %3751 = vrsqrt.f32 %v4693_v11  ;;  %v468_v1 = vadd.f32 %v385_v14, %v384_v6  ;;  %1338 = vmatmul.bf16.gmra.mxu0 %v1092_v60  ;;  %1516 = vmatmul.bf16.gmra.mxu2 %v1092_v60  ;;  %7065 = vst [vmem:[#allocation18_spill] sm:$0xff] %v4715_v15  ;;  %vm4871_vm8 = vmor %vm704_vm5, %vm705_vm6  ;;  %vm694_vm9 = vweird.f32 %v4693_v11 }
 0x1ab   :  { %v681_v44 = vmul.f32 0.5, %v680_v26  ;;  %v455_v56 = vpop.xlane.xlu1 %454  ;;  %v4701_v42 = vpop.f32.mrf.mxu0  ;;  %1427 = vmatmul.bf16.gmra.mxu1 %v1093_v38  ;;  %1605 = vmatmul.bf16.gmra.mxu3 %v1093_v38  ;;  %v4713_v26 = vld [vmem:[#allocation2 + $0x1d0] sm:$0xff]  ;;  %v673_v38 = vmul.f32 %v4646_v45, %v672_v57  ;;  %3753 = vrsqrt.f32 %v4706_v61  ;;  %vm714_vm10 = vweird.f32 %v4706_v61 }
 0x1ac   :  { %v519_v31 = vmul.f32 %v455_v56, %v4127_v33  ;;  %v216_v36 = vpop.xlane.xlu0 %215  ;;  %469 = vadd.xlane.f32.xlu0 %v468_v1  ;;  %7064 = vst [vmem:[#allocation17_spill] sm:$0xff] %v4713_v26  ;;  %v699_v1 = vmul.f32 %v4704_v30, %v4668_v21 }
 0x1ad   :  { %v682_v13 = vsub.f32 1.5, %v681_v44  ;;  %v210_v52 = vpop.xlane.xlu2 %209  ;;  %v271_v53 = vmul.f32 %v4127_v33, %v216_v36  ;;  %v677_v16 = vsel %vm676_vm3, %v4646_v45, %v673_v38  ;;  %v4771_v38 = vld [vmem:[#allocation2 + $0x1e0] sm:$0xff] }
 0x1ae   :  { %v4708_v58 = vpop.f32.mrf.mxu1  ;;  %v269_v25 = vmul.f32 %v4127_v33, %v210_v52  ;;  %v4718_v6 = vadd.f32 1e-05, %v519_v31  ;;  %7071 = vst [vmem:[#allocation19_spill] sm:$0xff] %v4771_v38 }
 0x1af   :  { %v683_v44 = vmul.f32 %v4676_v32, %v682_v13  ;;  %v4746_v31 = vsub.f32 %v4470_v63, %v271_v53  ;;  %v4749_v57 = vsub.f32 %v4474_v18, %v271_v53  ;;  %v700_v18 = vmul.f32 %v4704_v30, %v699_v1  ;;  %v7073_v1 = vld [vmem:[#allocation20_spill] sm:$0xff] }
 0x1b0   :  { %v4721_v14 = vsub.f32 %v4480_v40, %v269_v25  ;;  %v4724_v9 = vsub.f32 %v4482_v41, %v269_v25  ;;  %v4726_v60 = vpop.eup %3751  ;;  %v232_v40 = vadd.f32 %v4715_v15, %v4713_v26  ;;  %3755 = vrsqrt.f32 %v4718_v6 }
 0x1b1   :  { %v4732_v56 = vpop.f32.mrf.mxu2  ;;  %v689_v10 = vmul.f32 %v4726_v60, %v4693_v11  ;;  %7068 = vst [vmem:[#allocation38_spill] sm:$0xff] %v4746_v31  ;;  %v687_v63 = vsel %vm686_vm4, %v4676_v32, %v683_v44  ;;  %v390_v15 = vmul.f32 %v4746_v31, %v4746_v31  ;;  %v391_v45 = vmul.f32 %v4749_v57, %v4749_v57  ;;  %v4773_v32 = vld [vmem:[#allocation2 + $0x1e8] sm:$0xff]  ;;  %v4775_v44 = vpop.eup %3753 }
 0x1b2   :  { %7066 = vst [vmem:[#allocation26_spill] sm:$0xff] %v4721_v14  ;;  %v386_v41 = vmul.f32 %v4721_v14, %v4721_v14  ;;  %v387_v36 = vmul.f32 %v4724_v9, %v4724_v9  ;;  %vm695_vm7 = vweird.f32 %v4726_v60  ;;  %vm724_vm12 = vweird.f32 %v4718_v6 }
 0x1b3   :  { %7067 = vst [vmem:[#allocation27_spill] sm:$0xff] %v4724_v9  ;;  %v458_v13 = vpop.xlane.xlu1 %457  ;;  %v4751_v52 = vpop.f32.mrf.mxu0  ;;  %v690_v43 = vmul.f32 %v4726_v60, %v689_v10  ;;  %v4765_v9 = vperm.slane %v7070_v20, 2  ;;  %v7075_v20 = vld [vmem:[#allocation21_spill] sm:$0xff]  ;;  %vm696_vm11 = vmor %vm694_vm9, %vm695_vm7  ;;  %vm715_vm13 = vweird.f32 %v4775_v44 }
 0x1b4   :  { %7069 = vst [vmem:[#allocation39_spill] sm:$0xff] %v4749_v57  ;;  %v4756_v50 = vpop.f32.mrf.mxu3  ;;  %v471_v14 = vadd.f32 %v387_v36, %v386_v41  ;;  %233 = vadd.xlane.f32.xlu0 %v232_v40  ;;  %v219_v12 = vpop.xlane.xlu0 %218  ;;  %v908_v40 = vmul.f32 %v677_v16, %v7073_v1  ;;  %v7074_v41 = vld [vmem:[#allocation28_spill] sm:$0xff]  ;;  %v909_v36 = vmul.f32 %v677_v16, %v7075_v20  ;;  %v701_v57 = vmul.f32 0.5, %v700_v18  ;;  %vm4956_vm15 = vmor %vm714_vm10, %vm715_vm13 }
 0x1b5   :  { %v213_v25 = vpop.xlane.xlu2 %212  ;;  %7072 = vst [vmem:[#allocation40_spill] sm:$0xff] %v4773_v32  ;;  %v910_v10 = vmul.f32 %v687_v63, %v7074_v41  ;;  %v272_v2 = vmul.f32 %v4127_v33, %v219_v12  ;;  %v235_v1 = vadd.f32 %v4773_v32, %v4771_v38  ;;  %v691_v16 = vmul.f32 0.5, %v690_v43  ;;  %v7077_v38 = vld [vmem:[#allocation29_spill] sm:$0xff] }
 0x1b6   :  { %v4761_v53 = vpop.f32.mrf.mxu1  ;;  %472 = vadd.xlane.f32.xlu1 %v471_v14  ;;  %v520_v14 = vmul.f32 %v458_v13, %v4127_v33  ;;  %v270_v26 = vmul.f32 %v4127_v33, %v213_v25  ;;  %v4784_v27 = vpop.eup %3755  ;;  %v709_v13 = vmul.f32 %v4775_v44, %v4706_v61  ;;  %v1320_v25 = vadd.f32 %v4701_v42, %v4765_v9 }
 0x1b7   :  { %v477_v18 = vadd.f32 %v391_v45, %v390_v15  ;;  %v974_v12 = vmul.f32 %v4332_v47, %v908_v40  ;;  %v976_v32 = vmul.f32 %v4332_v47, %v910_v10  ;;  %v911_v22 = vmul.f32 %v687_v63, %v7077_v38 }
 0x1b8   :  { %v975_v43 = vmul.f32 %v4349_v46, %v909_v36  ;;  %v719_v55 = vmul.f32 %v4784_v27, %v4718_v6  ;;  %v4808_v48 = vadd.f32 1e-05, %v520_v14  ;;  %v4811_v42 = vsub.f32 %v4532_v59, %v270_v26 }
 0x1b9   :  { %v4782_v31 = vpop.f32.mrf.mxu2  ;;  %v4814_v15 = vsub.f32 %v4534_v19, %v270_v26  ;;  %478 = vadd.xlane.f32.xlu2 %v477_v18  ;;  %v4817_v40 = vsub.f32 %v4522_v0, %v272_v2  ;;  %v1040_v63 = vadd.f32 %v4346_v3, %v974_v12  ;;  %v1042_v38 = vadd.f32 %v4346_v3, %v976_v32 }
 0x1ba   :  { %v977_v10 = vmul.f32 %v4349_v46, %v911_v22  ;;  %v702_v14 = vsub.f32 1.5, %v701_v57  ;;  %v4825_v59 = vadd.f32 %v4708_v58, %v1320_v25  ;;  %v4828_v19 = vsub.f32 %v4528_v24, %v272_v2 }
 0x1bb   :  { %v222_v41 = vpop.xlane.xlu1 %221  ;;  %v4798_v37 = vpop.f32.mrf.mxu0  ;;  %v692_v0 = vsub.f32 1.5, %v691_v16  ;;  %v1094_v18 = vpack.c.bf16 %v1042_v38, %v1040_v63  ;;  %v1041_v12 = vadd.f32 %v4357_v17, %v975_v43  ;;  %v710_v22 = vmul.f32 %v4775_v44, %v709_v13 }
 0x1bc   :  { %v4800_v20 = vpop.f32.mrf.mxu3  ;;  %236 = vadd.xlane.f32.xlu0 %v235_v1  ;;  %7079 = vst [vmem:[#allocation28_spill] sm:$0xff] %v4828_v19  ;;  %v273_v26 = vmul.f32 %v4127_v33, %v222_v41  ;;  %v1043_v32 = vadd.f32 %v4357_v17, %v977_v10  ;;  %v388_v58 = vmul.f32 %v4811_v42, %v4811_v42  ;;  %3757 = vrsqrt.f32 %v4808_v48 }
 0x1bd   :  { %v461_v45 = vpop.xlane.xlu2 %460  ;;  %1343 = vmatmul.bf16.gmra.mxu0 %v1094_v18  ;;  %1521 = vmatmul.bf16.gmra.mxu2 %v1094_v18  ;;  %v389_v2 = vmul.f32 %v4814_v15, %v4814_v15  ;;  %v392_v16 = vmul.f32 %v4817_v40, %v4817_v40  ;;  %v393_v41 = vmul.f32 %v4828_v19, %v4828_v19  ;;  %vm725_vm14 = vweird.f32 %v4784_v27 }
 0x1be   :  { %v4822_v36 = vpop.f32.mrf.mxu1  ;;  %v521_v57 = vmul.f32 %v461_v45, %v4127_v33  ;;  %v1095_v24 = vpack.c.bf16 %v1043_v32, %v1041_v12  ;;  %v4849_v13 = vsub.f32 %v4563_v35, %v273_v26  ;;  %v693_v45 = vmul.f32 %v4726_v60, %v692_v0  ;;  %vm4975_vm0 = vmor %vm724_vm12, %vm725_vm14 }
 0x1bf   :  { %7078 = vst [vmem:[#allocation20_spill] sm:$0xff] %v4822_v36  ;;  %v720_v36 = vmul.f32 %v4784_v27, %v719_v55  ;;  %v4846_v55 = vsub.f32 %v4561_v49, %v273_v26  ;;  %v1498_v63 = vadd.f32 %v4732_v56, %v4787_v23  ;;  %v474_v49 = vadd.f32 %v389_v2, %v388_v58 }
 0x1c0   :  { %7080 = vst [vmem:[#allocation21_spill] sm:$0xff] %v4849_v13  ;;  %v4851_v25 = vadd.f32 1e-05, %v521_v57  ;;  %1432 = vmatmul.bf16.gmra.mxu1 %v1095_v24  ;;  %1610 = vmatmul.bf16.gmra.mxu3 %v1095_v24  ;;  %v703_v35 = vmul.f32 %v4704_v30, %v702_v14  ;;  %v480_v10 = vadd.f32 %v393_v41, %v392_v16  ;;  %v711_v56 = vmul.f32 0.5, %v710_v22  ;;  %v4887_v22 = vld [vmem:[#allocation2 + $0x1f0] sm:$0xff]  ;;  %v4889_v57 = vld [vmem:[#allocation2 + $0x1f8] sm:$0xff] }
 0x1c1   :  { %v4838_v1 = vpop.f32.mrf.mxu2  ;;  %475 = vadd.xlane.f32.xlu1 %v474_v49  ;;  %v721_v12 = vmul.f32 0.5, %v720_v36  ;;  %v394_v32 = vmul.f32 %v4846_v55, %v4846_v55  ;;  %v395_v11 = vmul.f32 %v4849_v13, %v4849_v13  ;;  %v4895_v36 = vadd.f32 %v4756_v50, %v1498_v63  ;;  %v7083_v63 = vld [vmem:[#allocation24_spill] sm:$0xff] }
 0x1c2   :  { %3759 = vrsqrt.f32 %v4851_v25  ;;  %481 = vadd.xlane.f32.xlu2 %v480_v10  ;;  %v4891_v58 = vpop.eup %3757  ;;  %v697_v2 = vsel %vm696_vm11, %v4726_v60, %v693_v45  ;;  %v1322_v16 = vadd.f32 %v4751_v52, %v4765_v9  ;;  %v707_v10 = vsel %vm4871_vm8, %v4704_v30, %v703_v35  ;;  %v7084_v30 = vld [vmem:[#allocation25_spill] sm:$0xff] }
 0x1c3   :  { %v4855_v43 = vpop.f32.mrf.mxu0  ;;  %v225_v26 = vpop.xlane.xlu1 %224  ;;  %v483_v41 = vadd.f32 %v395_v11, %v394_v32  ;;  %v912_v21 = vmul.f32 %v697_v2, %v4419_v8  ;;  %v712_v13 = vsub.f32 1.5, %v711_v56  ;;  %v238_v50 = vadd.f32 %v4889_v57, %v4887_v22 }
 0x1c4   :  { %v4861_v38 = vpop.f32.mrf.mxu3  ;;  %v274_v24 = vmul.f32 %v4127_v33, %v225_v26  ;;  %v914_v26 = vmul.f32 %v707_v10, %v7083_v63  ;;  %v913_v60 = vmul.f32 %v697_v2, %v4422_v54  ;;  %v722_v52 = vsub.f32 1.5, %v721_v12 }
 0x1c5   :  { %v4865_v18 = vpop.xlane.xlu2 %463  ;;  %v729_v32 = vmul.f32 %v4891_v58, %v4808_v48  ;;  %484 = vadd.xlane.f32.xlu0 %v483_v41  ;;  %v978_v0 = vmul.f32 %v4332_v47, %v912_v21  ;;  %v915_v35 = vmul.f32 %v707_v10, %v7084_v30  ;;  %v713_v19 = vmul.f32 %v4775_v44, %v712_v13  ;;  %v7093_v13 = vld [vmem:[#allocation30_spill] sm:$0xff] }
 0x1c6   :  { %v4877_v14 = vpop.f32.mrf.mxu1  ;;  %v4921_v11 = vsub.f32 %v4591_v34, %v274_v24  ;;  %v980_v54 = vmul.f32 %v4332_v47, %v914_v26  ;;  %v979_v12 = vmul.f32 %v4349_v46, %v913_v60  ;;  %v4930_v21 = vsub.f32 %v4593_v28, %v274_v24 }
 0x1c7   :  { %v1044_v41 = vadd.f32 %v4346_v3, %v978_v0  ;;  %v981_v10 = vmul.f32 %v4349_v46, %v915_v35  ;;  %v723_v28 = vmul.f32 %v4784_v27, %v722_v52  ;;  %v730_v24 = vmul.f32 %v4891_v58, %v729_v32 }
 0x1c8   :  { %v4911_v45 = vpop.eup %3759  ;;  %7085 = vst [vmem:[#allocation22_spill] sm:$0xff] %v4930_v21  ;;  %v1046_v34 = vadd.f32 %v4346_v3, %v980_v54  ;;  %v1045_v26 = vadd.f32 %v4357_v17, %v979_v12  ;;  %v1500_v0 = vadd.f32 %v4782_v31, %v4787_v23  ;;  %v7088_v31 = vmax.f32 %v4825_v59, 0.0 }
 0x1c9   :  { %v4901_v49 = vpop.f32.mrf.mxu2  ;;  %v739_v2 = vmul.f32 %v4911_v45, %v4851_v25  ;;  %239 = vadd.xlane.f32.xlu1 %v238_v50  ;;  %v1047_v50 = vadd.f32 %v4357_v17, %v981_v10  ;;  %v7089_v32 = vmax.f32 %v4895_v36, 0.0  ;;  %vm744_vm1 = vweird.f32 %v4851_v25 }
 0x1ca   :  { %v1096_v35 = vpack.c.bf16 %v1046_v34, %v1044_v41  ;;  %v4983_v34 = vadd.f32 %v4800_v20, %v1500_v0  ;;  %v717_v20 = vsel %vm4956_vm15, %v4775_v44, %v713_v19  ;;  %v727_v0 = vsel %vm4975_vm0, %v4784_v27, %v723_v28 }
 0x1cb   :  { %v4917_v8 = vpop.f32.mrf.mxu0  ;;  %v740_v52 = vmul.f32 %v4911_v45, %v739_v2  ;;  %v1730_v41 = vadd.f32 %v7089_v32, %v7088_v31  ;;  %v4980_v2 = vadd.f32 %v4761_v53, %v1322_v16  ;;  %v919_v19 = vmul.f32 %v727_v0, %v4465_v5 }
 0x1cc   :  { %v4923_v63 = vpop.f32.mrf.mxu3  ;;  %v6933_v44 = vmax.f32 %v4983_v34, 0.0  ;;  %v1325_v27 = vadd.f32 %v4798_v37, %v4765_v9  ;;  %vm745_vm2 = vweird.f32 %v4911_v45  ;;  %vm734_vm3 = vweird.f32 %v4808_v48 }
 0x1cd   :  { %v228_v30 = vpop.xlane.xlu2 %227  ;;  %1348 = vmatmul.bf16.gmra.mxu0 %v1096_v35  ;;  %1526 = vmatmul.bf16.gmra.mxu2 %v1096_v35  ;;  %v741_v16 = vmul.f32 0.5, %v740_v52  ;;  %v916_v52 = vmul.f32 %v717_v20, %v4410_v4  ;;  %v917_v4 = vmul.f32 %v717_v20, %v7093_v13  ;;  %vm735_vm4 = vweird.f32 %v4891_v58  ;;  %v7094_v20 = vld [vmem:[#allocation20_spill] sm:$0xff]  ;;  %vm5053_vm5 = vmor %vm744_vm1, %vm745_vm2 }
 0x1ce   :  { %v4937_v56 = vpop.f32.mrf.mxu1  ;;  %v275_v60 = vmul.f32 %v4127_v33, %v228_v30  ;;  %v1097_v30 = vpack.c.bf16 %v1047_v50, %v1045_v26  ;;  %1731 = vadd.xlane.f32.xlu0 %v1730_v41  ;;  %v1503_v50 = vadd.f32 %v4838_v1, %v4787_v23  ;;  %vm736_vm6 = vmor %vm734_vm3, %vm735_vm4 }
 0x1cf   :  { %v982_v37 = vmul.f32 %v4332_v47, %v916_v52 }
 0x1d0   :  { %v4947_v54 = vsub.f32 %v4615_v7, %v275_v60  ;;  %v4950_v12 = vsub.f32 %v4617_v39, %v275_v60  ;;  %v396_v7 = vmul.f32 %v4921_v11, %v4921_v11  ;;  %v397_v39 = vmul.f32 %v4930_v21, %v4930_v21  ;;  %1437 = vmatmul.bf16.gmra.mxu1 %v1097_v30 }
 0x1d1   :  { %v4969_v10 = vpop.f32.mrf.mxu2  ;;  %v731_v21 = vmul.f32 0.5, %v730_v24  ;;  %1615 = vmatmul.bf16.gmra.mxu3 %v1097_v30  ;;  %v5023_v5 = vadd.f32 %v4861_v38, %v1503_v50 }
 0x1d2   :  { %v486_v60 = vadd.f32 %v397_v39, %v396_v7  ;;  %v398_v6 = vmul.f32 %v4947_v54, %v4947_v54  ;;  %v399_v32 = vmul.f32 %v4950_v12, %v4950_v12  ;;  %v918_v7 = vmul.f32 %v727_v0, %v4462_v62 }
 0x1d3   :  { %v4985_v31 = vpop.f32.mrf.mxu0  ;;  %v6934_v39 = vmax.f32 %v4980_v2, 0.0  ;;  %v732_v61 = vsub.f32 1.5, %v731_v21  ;;  %v742_v62 = vsub.f32 1.5, %v741_v16  ;;  %v1327_v21 = vadd.f32 %v4855_v43, %v4765_v9 }
 0x1d4   :  { %v4991_v53 = vpop.f32.mrf.mxu3  ;;  %v489_v35 = vadd.f32 %v399_v32, %v398_v6  ;;  %487 = vadd.xlane.f32.xlu1 %v486_v60  ;;  %v984_v60 = vmul.f32 %v4332_v47, %v918_v7  ;;  %v5048_v0 = vadd.f32 %v7094_v20, %v1325_v27  ;;  %v1048_v7 = vadd.f32 %v4346_v3, %v982_v37 }
 0x1d5   :  { %v231_v26 = vpop.xlane.xlu2 %230  ;;  %v1733_v6 = vadd.f32 %v6933_v44, %v6934_v39  ;;  %v743_v50 = vmul.f32 %v4911_v45, %v742_v62  ;;  %v733_v27 = vmul.f32 %v4891_v58, %v732_v61  ;;  %v6931_v25 = vmax.f32 %v5023_v5, 0.0 }
 0x1d6   :  { %v5001_v24 = vpop.f32.mrf.mxu1  ;;  %v276_v41 = vmul.f32 %v4127_v33, %v231_v26  ;;  %490 = vadd.xlane.f32.xlu2 %v489_v35  ;;  %v983_v26 = vmul.f32 %v4349_v46, %v917_v4  ;;  %v5067_v62 = vadd.f32 %v4877_v14, %v1327_v21 }
 0x1d7   :  { %v737_v21 = vsel %vm736_vm6, %v4891_v58, %v733_v27 }
 0x1d8   :  { %v5012_v1 = vsub.f32 %v4630_v51, %v276_v41  ;;  %v5015_v28 = vsub.f32 %v4632_v29, %v276_v41  ;;  %v1505_v51 = vadd.f32 %v4901_v49, %v4787_v23  ;;  %v985_v29 = vmul.f32 %v4349_v46, %v919_v19  ;;  %v7099_v41 = vld [vmem:[#allocation34_spill] sm:$0xff] }
 0x1d9   :  { %v5019_v30 = vpop.f32.mrf.mxu2  ;;  %v1050_v49 = vadd.f32 %v4346_v3, %v984_v60 }
 0x1da   :  { %7092 = vst [vmem:[#allocation29_spill] sm:$0xff] %v5015_v28  ;;  %v400_v38 = vmul.f32 %v5012_v1, %v5012_v1  ;;  %v401_v43 = vmul.f32 %v5015_v28, %v5015_v28  ;;  %v5058_v52 = vadd.f32 %v4923_v63, %v1505_v51  ;;  %v1051_v48 = vadd.f32 %v4357_v17, %v985_v29 }
 0x1db   :  { %v1334_v32 = vpop.f32.mrf.mxu0  ;;  %v1098_v60 = vpack.c.bf16 %v1050_v49, %v1048_v7  ;;  %v1049_v63 = vadd.f32 %v4357_v17, %v983_v26  ;;  %v6932_v51 = vmax.f32 %v5048_v0, 0.0  ;;  %v747_v29 = vsel %vm5053_vm5, %v4911_v45, %v743_v50  ;;  %v7097_v26 = vld [vmem:[#allocation33_spill] sm:$0xff] }
 0x1dc   :  { %v5038_v16 = vpop.f32.mrf.mxu3  ;;  %v1335_v35 = vadd.f32 %v1334_v32, %v4765_v9  ;;  %1734 = vadd.xlane.f32.xlu1 %v1733_v6  ;;  %v492_v13 = vadd.f32 %v401_v43, %v400_v38  ;;  %v6929_v61 = vmax.f32 %v5058_v52, 0.0  ;;  %v1508_v6 = vadd.f32 %v4969_v10, %v4787_v23 }
 0x1dd   :  { %1353 = vmatmul.bf16.gmra.mxu0 %v1098_v60  ;;  %v1099_v32 = vpack.c.bf16 %v1051_v48, %v1049_v63  ;;  %1531 = vmatmul.bf16.gmra.mxu2 %v1098_v60  ;;  %v6930_v38 = vmax.f32 %v5067_v62, 0.0  ;;  %v1330_v49 = vadd.f32 %v4917_v8, %v4765_v9  ;;  %v1736_v45 = vadd.f32 %v6931_v25, %v6932_v51  ;;  %v7098_v8 = vld [vmem:[#allocation31_spill] sm:$0xff] }
 0x1de   :  { %v1423_v19 = vpop.f32.mrf.mxu1  ;;  %493 = vadd.xlane.f32.xlu2 %v492_v13  ;;  %v5090_v20 = vadd.f32 %v4991_v53, %v1508_v6  ;;  %v920_v50 = vmul.f32 %v737_v21, %v7098_v8  ;;  %v923_v7 = vmul.f32 %v747_v29, %v7099_v41  ;;  %v7100_v13 = vld [vmem:[#allocation32_spill] sm:$0xff] }
 0x1df   :  { %v5063_v4 = vadd.f32 %v1423_v19, %v1335_v35  ;;  %v922_v35 = vmul.f32 %v747_v29, %v7097_v26  ;;  %v1739_v58 = vadd.f32 %v6929_v61, %v6930_v38  ;;  %v5099_v48 = vadd.f32 %v4937_v56, %v1330_v49 }
 0x1e0   :  { %1442 = vmatmul.bf16.gmra.mxu1 %v1099_v32  ;;  %v921_v27 = vmul.f32 %v737_v21, %v7100_v13  ;;  %v6927_v63 = vmax.f32 %v5090_v20, 0.0  ;;  %v986_v6 = vmul.f32 %v4332_v47, %v920_v50 }
 0x1e1   :  { %v1512_v37 = vpop.f32.mrf.mxu2  ;;  %1620 = vmatmul.bf16.gmra.mxu3 %v1099_v32  ;;  %v988_v19 = vmul.f32 %v4332_v47, %v922_v35  ;;  %v989_v32 = vmul.f32 %v4349_v46, %v923_v7  ;;  %v6928_v29 = vmax.f32 %v5099_v48, 0.0 }
 0x1e2   :  { %v1513_v14 = vadd.f32 %v1512_v37, %v4787_v23  ;;  %v987_v49 = vmul.f32 %v4349_v46, %v921_v27 }
 0x1e3   :  { %v1336_v53 = vpop.f32.mrf.mxu0  ;;  %v1055_v26 = vadd.f32 %v4357_v17, %v989_v32  ;;  %v1742_v35 = vadd.f32 %v6927_v63, %v6928_v29 }
 0x1e4   :  { %v1601_v10 = vpop.f32.mrf.mxu3  ;;  %1737 = vadd.xlane.f32.xlu1 %v1736_v45  ;;  %v1337_v56 = vadd.f32 %v1336_v53, %v4765_v9  ;;  %v1053_v41 = vadd.f32 %v4357_v17, %v987_v49  ;;  %v522_v53 = vmul.f32 %v4865_v18, %v4127_v33 }
 0x1e5   :  { %v5087_v43 = vadd.f32 %v1601_v10, %v1513_v14  ;;  %v1054_v14 = vadd.f32 %v4346_v3, %v988_v19  ;;  %v1052_v10 = vadd.f32 %v4346_v3, %v986_v6 }
 0x1e6   :  { %1740 = vadd.xlane.f32.xlu2 %v1739_v58  ;;  %v1425_v58 = vpop.f32.mrf.mxu1  ;;  %v1101_v19 = vpack.c.bf16 %v1055_v26, %v1053_v41 }
 0x1e7   :  { %v5119_v8 = vadd.f32 %v1425_v58, %v1337_v56  ;;  %v1100_v50 = vpack.c.bf16 %v1054_v14, %v1052_v10 }
 0x1e9   :  { %v1514_v60 = vpop.f32.mrf.mxu2  ;;  %v6926_v13 = vmax.f32 %v5119_v8, 0.0 }
 0x1ea   :  { %v1515_v37 = vadd.f32 %v1514_v60, %v4787_v23  ;;  %v554_v60 = vadd.f32 1e-05, %v522_v53 }
 0x1ec   :  { %v1603_v45 = vpop.f32.mrf.mxu3  ;;  %3761 = vrsqrt.f32 %v554_v60  ;;  %vm754_vm7 = vweird.f32 %v554_v60 }
 0x1ed   :  { %v5111_v21 = vadd.f32 %v1603_v45, %v1515_v37  ;;  %1358 = vmatmul.bf16.gmra.mxu0 %v1100_v50  ;;  %1536 = vmatmul.bf16.gmra.mxu2 %v1100_v50 }
 0x1ee   :  { %1743 = vadd.xlane.f32.xlu2 %v1742_v35 }
 0x1ef   :  { %v6925_v7 = vmax.f32 %v5111_v21, 0.0 }
 0x1f0   :  { %1447 = vmatmul.bf16.gmra.mxu1 %v1101_v19 }
 0x1f1   :  { %1625 = vmatmul.bf16.gmra.mxu3 %v1101_v19  ;;  %v1751_v27 = vadd.f32 %v6925_v7, %v6926_v13  ;;  %v7101_v7 = vld [vmem:[#allocation35_spill] sm:$0xff] }
 0x1f2   :  { %v3762_v37 = vpop.eup %3761 }
 0x1f3   :  { %v749_v6 = vmul.f32 %v3762_v37, %v554_v60  ;;  %vm755_vm8 = vweird.f32 %v3762_v37 }
 0x1f4   :  { %vm756_vm9 = vmor %vm754_vm7, %vm755_vm8 }
 0x1f5   :  { %v750_v56 = vmul.f32 %v3762_v37, %v749_v6 }
 0x1f6   :  { %1752 = vadd.xlane.f32.xlu2 %v1751_v27 }
 0x1f7   :  { %v751_v45 = vmul.f32 0.5, %v750_v56 }
 0x1f9   :  { %v752_v10 = vsub.f32 1.5, %v751_v45 }
 0x1fb   :  { %v753_v18 = vmul.f32 %v3762_v37, %v752_v10 }
 0x1fd   :  { %v757_v53 = vsel %vm756_vm9, %v3762_v37, %v753_v18 }
 0x1fe   :  { %v924_v10 = vmul.f32 %v757_v53, %v7101_v7 }
 0x217   :  { %v467_v32 = vpop.xlane.xlu0 %466 }
 0x218   :  { %v523_v14 = vmul.f32 %v467_v32, %v4127_v33 }
 0x21a   :  { %v555_v49 = vadd.f32 1e-05, %v523_v14 }
 0x21c   :  { %3763 = vrsqrt.f32 %v555_v49  ;;  %vm764_vm11 = vweird.f32 %v555_v49 }
 0x21f   :  { %v470_v26 = vpop.xlane.xlu0 %469 }
 0x220   :  { %v524_v58 = vmul.f32 %v470_v26, %v4127_v33 }
 0x222   :  { %v3764_v35 = vpop.eup %3763  ;;  %v5132_v41 = vadd.f32 1e-05, %v524_v58 }
 0x223   :  { %v759_v50 = vmul.f32 %v3764_v35, %v555_v49  ;;  %vm765_vm10 = vweird.f32 %v3764_v35 }
 0x224   :  { %3765 = vrsqrt.f32 %v5132_v41  ;;  %vm766_vm12 = vmor %vm764_vm11, %vm765_vm10  ;;  %vm774_vm14 = vweird.f32 %v5132_v41 }
 0x225   :  { %v760_v19 = vmul.f32 %v3764_v35, %v759_v50  ;;  %v7102_v50 = vld [vmem:[#allocation36_spill] sm:$0xff] }
 0x226   :  { %v925_v13 = vmul.f32 %v757_v53, %v7102_v50 }
 0x227   :  { %v761_v27 = vmul.f32 0.5, %v760_v19  ;;  %v1339_v32 = vpop.f32.mrf.mxu0  ;;  %v234_v14 = vpop.xlane.xlu0 %233 }
 0x228   :  { %v277_v26 = vmul.f32 %v4127_v33, %v234_v14  ;;  %v1340_v19 = vadd.f32 %v1339_v32, %v4765_v9  ;;  %v1428_v49 = vpop.f32.mrf.mxu1 }
 0x229   :  { %v762_v6 = vsub.f32 1.5, %v761_v27  ;;  %v473_v56 = vpop.xlane.xlu1 %472  ;;  %v7103_v27 = vld [vmem:[#allocation17_spill] sm:$0xff] }
 0x22a   :  { %v525_v60 = vmul.f32 %v473_v56, %v4127_v33  ;;  %v5138_v58 = vpop.eup %3765  ;;  %v7105_v56 = vld [vmem:[#allocation18_spill] sm:$0xff] }
 0x22b   :  { %v763_v45 = vmul.f32 %v3764_v35, %v762_v6  ;;  %v769_v37 = vmul.f32 %v5138_v58, %v5132_v41  ;;  %v5147_v6 = vsub.f32 %v7103_v27, %v277_v26  ;;  %v5150_v14 = vsub.f32 %v7105_v56, %v277_v26  ;;  %v7107_v27 = vld [vmem:[#allocation37_spill] sm:$0xff]  ;;  %v7108_v26 = vld [vmem:[#allocation23_spill] sm:$0xff] }
 0x22c   :  { %v5143_v18 = vadd.f32 1e-05, %v525_v60  ;;  %v990_v60 = vmul.f32 %v4332_v47, %v924_v10  ;;  %v479_v50 = vpop.xlane.xlu2 %478  ;;  %v1332_v10 = vadd.f32 %v4985_v31, %v4765_v9  ;;  %vm775_vm13 = vweird.f32 %v5138_v58 }
 0x22d   :  { %7104 = vst [vmem:[#allocation24_spill] sm:$0xff] %v5147_v6  ;;  %v767_v7 = vsel %vm766_vm12, %v3764_v35, %v763_v45  ;;  %v770_v63 = vmul.f32 %v5138_v58, %v769_v37  ;;  %v402_v53 = vmul.f32 %v5147_v6, %v5147_v6  ;;  %v1517_v29 = vpop.f32.mrf.mxu2  ;;  %v403_v32 = vmul.f32 %v5150_v14, %v5150_v14  ;;  %vm776_vm15 = vmor %vm774_vm14, %vm775_vm13 }
 0x22e   :  { %7106 = vst [vmem:[#allocation25_spill] sm:$0xff] %v5150_v14  ;;  %3767 = vrsqrt.f32 %v5143_v18  ;;  %v926_v61 = vmul.f32 %v767_v7, %v7107_v27  ;;  %v927_v56 = vmul.f32 %v767_v7, %v7108_v26  ;;  %v991_v35 = vmul.f32 %v4349_v46, %v925_v13  ;;  %v1606_v51 = vpop.f32.mrf.mxu3 }
 0x22f   :  { %v771_v45 = vmul.f32 0.5, %v770_v63  ;;  %v5162_v37 = vadd.f32 %v1428_v49, %v1340_v19  ;;  %v527_v38 = vmul.f32 %v479_v50, %v4127_v33  ;;  %v1518_v25 = vadd.f32 %v1517_v29, %v4787_v23  ;;  %v237_v44 = vpop.xlane.xlu0 %236 }
 0x230   :  { %v495_v39 = vadd.f32 %v403_v32, %v402_v53  ;;  %v992_v14 = vmul.f32 %v4332_v47, %v926_v61  ;;  %v993_v27 = vmul.f32 %v4349_v46, %v927_v56  ;;  %v278_v13 = vmul.f32 %v4127_v33, %v237_v44 }
 0x231   :  { %v772_v7 = vsub.f32 1.5, %v771_v45  ;;  %v5170_v26 = vadd.f32 1e-05, %v527_v38  ;;  %v5172_v63 = vadd.f32 %v1606_v51, %v1518_v25  ;;  %v1510_v29 = vadd.f32 %v5019_v30, %v4787_v23  ;;  %v7109_v30 = vld [vmem:[#allocation19_spill] sm:$0xff] }
 0x232   :  { %496 = vadd.xlane.f32.xlu0 %v495_v39  ;;  %v1056_v31 = vadd.f32 %v4346_v3, %v990_v60  ;;  %v1058_v19 = vadd.f32 %v4346_v3, %v992_v14  ;;  %v1059_v49 = vadd.f32 %v4357_v17, %v993_v27  ;;  %v6937_v53 = vmax.f32 %v5162_v37, 0.0  ;;  %v7111_v14 = vld [vmem:[#allocation40_spill] sm:$0xff] }
 0x233   :  { %3769 = vrsqrt.f32 %v5170_v26  ;;  %v6936_v25 = vmax.f32 %v5172_v63, 0.0  ;;  %v1057_v51 = vadd.f32 %v4357_v17, %v991_v35  ;;  %v773_v44 = vmul.f32 %v5138_v58, %v772_v7 }
 0x234   :  { %v3768_v61 = vpop.eup %3767  ;;  %v5188_v38 = vsub.f32 %v7109_v30, %v278_v13  ;;  %v5191_v60 = vsub.f32 %v7111_v14, %v278_v13  ;;  %v1102_v32 = vpack.c.bf16 %v1058_v19, %v1056_v31  ;;  %v476_v27 = vpop.xlane.xlu1 %475  ;;  %v5207_v19 = vadd.f32 %v5001_v24, %v1332_v10 }
 0x235   :  { %v779_v39 = vmul.f32 %v3768_v61, %v5143_v18  ;;  %v1754_v50 = vadd.f32 %v6936_v25, %v6937_v53  ;;  %v1103_v56 = vpack.c.bf16 %v1059_v49, %v1057_v51  ;;  %v526_v30 = vmul.f32 %v476_v27, %v4127_v33  ;;  %v482_v14 = vpop.xlane.xlu2 %481  ;;  %v1519_v27 = vpop.f32.mrf.mxu2 }
 0x236   :  { %7110 = vst [vmem:[#allocation30_spill] sm:$0xff] %v5188_v38  ;;  %v404_v45 = vmul.f32 %v5188_v38, %v5188_v38  ;;  %1363 = vmatmul.bf16.gmra.mxu0 %v1102_v32  ;;  %v405_v7 = vmul.f32 %v5191_v60, %v5191_v60  ;;  %1541 = vmatmul.bf16.gmra.mxu2 %v1102_v32  ;;  %vm785_vm0 = vweird.f32 %v3768_v61  ;;  %vm784_vm1 = vweird.f32 %v5143_v18 }
 0x237   :  { %7112 = vst [vmem:[#allocation20_spill] sm:$0xff] %v5191_v60  ;;  %v780_v35 = vmul.f32 %v3768_v61, %v779_v39  ;;  %1755 = vadd.xlane.f32.xlu2 %v1754_v50  ;;  %1452 = vmatmul.bf16.gmra.mxu1 %v1103_v56  ;;  %v777_v31 = vsel %vm776_vm15, %v5138_v58, %v773_v44  ;;  %v5215_v32 = vadd.f32 1e-05, %v526_v30  ;;  %v7115_v58 = vld [vmem:[#allocation15_spill] sm:$0xff]  ;;  %v7116_v44 = vld [vmem:[#allocation16_spill] sm:$0xff]  ;;  %vm786_vm2 = vmor %vm784_vm1, %vm785_vm0  ;;  %vm804_vm3 = vweird.f32 %v5170_v26 }
 0x238   :  { %7113 = vst [vmem:[#allocation33_spill] sm:$0xff] %v5207_v19  ;;  %v5210_v49 = vadd.f32 %v5038_v16, %v1510_v29  ;;  %v528_v51 = vmul.f32 %v482_v14, %v4127_v33  ;;  %1630 = vmatmul.bf16.gmra.mxu3 %v1103_v56  ;;  %v498_v39 = vadd.f32 %v405_v7, %v404_v45  ;;  %v485_v29 = vpop.xlane.xlu0 %484  ;;  %v1341_v14 = vpop.f32.mrf.mxu0 }
 0x239   :  { %v781_v13 = vmul.f32 0.5, %v780_v35  ;;  %v5204_v41 = vpop.eup %3769  ;;  %v928_v24 = vmul.f32 %v777_v31, %v7115_v58  ;;  %3771 = vrsqrt.f32 %v5215_v32  ;;  %v929_v56 = vmul.f32 %v777_v31, %v7116_v44  ;;  %v7118_v31 = vld [vmem:[#allocation27_spill] sm:$0xff] }
 0x23a   :  { %7114 = vst [vmem:[#allocation31_spill] sm:$0xff] %v5210_v49  ;;  %v799_v35 = vmul.f32 %v5204_v41, %v5170_v26  ;;  %499 = vadd.xlane.f32.xlu0 %v498_v39  ;;  %v5220_v16 = vadd.f32 1e-05, %v528_v51  ;;  %v6938_v45 = vmax.f32 %v5210_v49, 0.0  ;;  %v529_v7 = vmul.f32 %v485_v29, %v4127_v33  ;;  %v7117_v51 = vld [vmem:[#allocation26_spill] sm:$0xff] }
 0x23b   :  { %v782_v50 = vsub.f32 1.5, %v781_v13  ;;  %v6939_v13 = vmax.f32 %v5207_v19, 0.0  ;;  %v994_v25 = vmul.f32 %v4332_v47, %v928_v24  ;;  %v995_v29 = vmul.f32 %v4349_v46, %v929_v56 }
 0x23c   :  { %v800_v18 = vmul.f32 %v5204_v41, %v799_v35  ;;  %v240_v39 = vpop.xlane.xlu1 %239  ;;  %3773 = vrsqrt.f32 %v5220_v16  ;;  %vm805_vm4 = vweird.f32 %v5204_v41  ;;  %vm794_vm7 = vweird.f32 %v5215_v32 }
 0x23d   :  { %v783_v10 = vmul.f32 %v3768_v61, %v782_v50  ;;  %v5227_v50 = vadd.f32 1e-05, %v529_v7  ;;  %v279_v53 = vmul.f32 %v4127_v33, %v240_v39  ;;  %vm5300_vm6 = vmor %vm804_vm3, %vm805_vm4  ;;  %vm814_vm9 = vweird.f32 %v5220_v16 }
 0x23e   :  { %v801_v7 = vmul.f32 0.5, %v800_v18 }
 0x23f   :  { %v787_v30 = vsel %vm786_vm2, %v3768_v61, %v783_v10  ;;  %3775 = vrsqrt.f32 %v5227_v50  ;;  %v1745_v61 = vadd.f32 %v6938_v45, %v6939_v13  ;;  %v5242_v24 = vpop.eup %3771  ;;  %v5248_v39 = vsub.f32 %v4889_v57, %v279_v53 }
 0x240   :  { %v930_v58 = vmul.f32 %v787_v30, %v7117_v51  ;;  %v931_v44 = vmul.f32 %v787_v30, %v7118_v31  ;;  %v5245_v30 = vsub.f32 %v4887_v22, %v279_v53  ;;  %v789_v56 = vmul.f32 %v5242_v24, %v5215_v32  ;;  %v1608_v51 = vpop.f32.mrf.mxu3  ;;  %v1430_v53 = vpop.f32.mrf.mxu1 }
 0x241   :  { %7120 = vst [vmem:[#allocation32_spill] sm:$0xff] %v5248_v39  ;;  %v1060_v31 = vadd.f32 %v4346_v3, %v994_v25  ;;  %v1732_v45 = vpop.xlane.xlu0 %1731  ;;  %v1061_v22 = vadd.f32 %v4357_v17, %v995_v29  ;;  %v1522_v49 = vpop.f32.mrf.mxu2  ;;  %vm795_vm5 = vweird.f32 %v5242_v24  ;;  %vm824_vm11 = vweird.f32 %v5227_v50 }
 0x242   :  { %v996_v35 = vmul.f32 %v4332_v47, %v930_v58  ;;  %v997_v10 = vmul.f32 %v4349_v46, %v931_v44  ;;  %7119 = vst [vmem:[#allocation34_spill] sm:$0xff] %v5245_v30  ;;  %1746 = vadd.xlane.f32.xlu0 %v1745_v61  ;;  %v406_v18 = vmul.f32 %v5245_v30, %v5245_v30  ;;  %v5262_v25 = vpop.eup %3773  ;;  %vm796_vm8 = vmor %vm794_vm7, %vm795_vm5 }
 0x243   :  { %v790_v57 = vmul.f32 %v5242_v24, %v789_v56  ;;  %v1826_v13 = vmul.f32 %v1732_v45, %v4127_v33  ;;  %v407_v61 = vmul.f32 %v5248_v39, %v5248_v39  ;;  %v7121_v56 = vmax.f32 %v4825_v59, 0.0 }
 0x244   :  { %v1062_v58 = vadd.f32 %v4346_v3, %v996_v35  ;;  %v1063_v44 = vadd.f32 %v4357_v17, %v997_v10  ;;  %v6947_v35 = vmax.f32 %v5087_v43, 0.0  ;;  %v802_v10 = vsub.f32 1.5, %v801_v7 }
 0x245   :  { %v5265_v6 = vpop.eup %3775  ;;  %v791_v30 = vmul.f32 0.5, %v790_v57  ;;  %v5269_v19 = vsub.f32 %v7121_v56, %v1826_v13  ;;  %v7123_v45 = vmax.f32 %v4895_v36, 0.0  ;;  %v1342_v7 = vadd.f32 %v1341_v14, %v4765_v9 }
 0x246   :  { %v1104_v60 = vpack.c.bf16 %v1062_v58, %v1060_v31  ;;  %v1105_v38 = vpack.c.bf16 %v1063_v44, %v1061_v22  ;;  %v501_v31 = vadd.f32 %v407_v61, %v406_v18  ;;  %v1520_v58 = vadd.f32 %v1519_v27, %v4787_v23  ;;  %v1344_v22 = vpop.f32.mrf.mxu0 }
 0x247   :  { %v488_v29 = vpop.xlane.xlu1 %487  ;;  %7122 = vst [vmem:[#allocation35_spill] sm:$0xff] %v5269_v19  ;;  %v5273_v28 = vsub.f32 %v7123_v45, %v1826_v13  ;;  %v792_v59 = vsub.f32 1.5, %v791_v30  ;;  %v809_v18 = vmul.f32 %v5262_v25, %v5220_v16  ;;  %v819_v14 = vmul.f32 %v5265_v6, %v5227_v50 }
 0x248   :  { %1368 = vmatmul.bf16.gmra.mxu0 %v1104_v60  ;;  %1457 = vmatmul.bf16.gmra.mxu1 %v1105_v38  ;;  %v530_v36 = vmul.f32 %v488_v29, %v4127_v33  ;;  %v803_v30 = vmul.f32 %v5204_v41, %v802_v10  ;;  %v5305_v56 = vadd.f32 %v1608_v51, %v1520_v58  ;;  %v6948_v10 = vmax.f32 %v5063_v4, 0.0  ;;  %v1433_v51 = vpop.f32.mrf.mxu1 }
 0x249   :  { %7124 = vst [vmem:[#allocation36_spill] sm:$0xff] %v5273_v28  ;;  %1546 = vmatmul.bf16.gmra.mxu2 %v1104_v60  ;;  %v491_v44 = vpop.xlane.xlu2 %490  ;;  %502 = vadd.xlane.f32.xlu1 %v501_v31  ;;  %v1922_v60 = vmul.f32 %v5269_v19, %v5269_v19  ;;  %v1923_v27 = vmul.f32 %v5273_v28, %v5273_v28  ;;  %vm815_vm10 = vweird.f32 %v5262_v25  ;;  %vm825_vm12 = vweird.f32 %v5265_v6 }
 0x24a   :  { %1635 = vmatmul.bf16.gmra.mxu3 %v1105_v38  ;;  %v531_v13 = vmul.f32 %v491_v44, %v4127_v33  ;;  %v793_v57 = vmul.f32 %v5242_v24, %v792_v59  ;;  %v5292_v61 = vadd.f32 1e-05, %v530_v36  ;;  %v5310_v31 = vadd.f32 %v1430_v53, %v1342_v7  ;;  %v1611_v44 = vpop.f32.mrf.mxu3  ;;  %vm5377_vm13 = vmor %vm814_vm9, %vm815_vm10 }
 0x24b   :  { %v1986_v45 = vadd.f32 %v1923_v27, %v1922_v60  ;;  %v810_v59 = vmul.f32 %v5262_v25, %v809_v18  ;;  %v820_v26 = vmul.f32 %v5265_v6, %v819_v14  ;;  %v1748_v53 = vadd.f32 %v6947_v35, %v6948_v10  ;;  %v7127_v27 = vld [vmem:[#allocation38_spill] sm:$0xff]  ;;  %vm5394_vm14 = vmor %vm824_vm11, %vm825_vm12 }
 0x24c   :  { %v5294_v38 = vadd.f32 1e-05, %v531_v13  ;;  %3777 = vrsqrt.f32 %v5292_v61  ;;  %v797_v32 = vsel %vm796_vm8, %v5242_v24, %v793_v57  ;;  %v807_v7 = vsel %vm5300_vm6, %v5204_v41, %v803_v30  ;;  %v1524_v24 = vpop.f32.mrf.mxu2 }
 0x24d   :  { %1987 = vadd.xlane.f32.xlu0 %v1986_v45  ;;  %v932_v60 = vmul.f32 %v797_v32, %v4811_v42  ;;  %v934_v57 = vmul.f32 %v807_v7, %v7127_v27  ;;  %v811_v45 = vmul.f32 0.5, %v810_v59  ;;  %v821_v35 = vmul.f32 0.5, %v820_v26  ;;  %v7134_v27 = vld [vmem:[#allocation39_spill] sm:$0xff] }
 0x24e   :  { %3779 = vrsqrt.f32 %v5294_v38  ;;  %v7128_v10 = vmax.f32 %v4980_v2, 0.0  ;;  %v7130_v41 = vmax.f32 %v4983_v34, 0.0  ;;  %v1523_v18 = vadd.f32 %v1522_v49, %v4787_v23 }
 0x24f   :  { %v1735_v58 = vpop.xlane.xlu1 %1734  ;;  %v998_v36 = vmul.f32 %v4332_v47, %v932_v60  ;;  %v7132_v59 = vmax.f32 %v5310_v31, 0.0  ;;  %v7133_v2 = vmax.f32 %v5305_v56, 0.0  ;;  %v933_v60 = vmul.f32 %v797_v32, %v4814_v15 }
 0x250   :  { %v1827_v13 = vmul.f32 %v1735_v58, %v4127_v33  ;;  %v1346_v58 = vpop.f32.mrf.mxu0  ;;  %v812_v49 = vsub.f32 1.5, %v811_v45  ;;  %v1345_v28 = vadd.f32 %v1344_v22, %v4765_v9  ;;  %v5367_v22 = vadd.f32 %v1611_v44, %v1523_v18 }
 0x251   :  { %1749 = vadd.xlane.f32.xlu1 %v1748_v53  ;;  %v5327_v14 = vpop.xlane.xlu2 %493  ;;  %v7137_v18 = vmax.f32 %v5048_v0, 0.0  ;;  %v1525_v19 = vadd.f32 %v1524_v24, %v4787_v23  ;;  %vm844_vm15 = vweird.f32 %v5294_v38  ;;  %vm834_vm1 = vweird.f32 %v5292_v61 }
 0x252   :  { %v5333_v29 = vsub.f32 %v7128_v10, %v1827_v13  ;;  %v5337_v30 = vsub.f32 %v7130_v41, %v1827_v13  ;;  %v5340_v53 = vpop.eup %3777  ;;  %v1757_v10 = vadd.f32 %v7133_v2, %v7132_v59  ;;  %v1000_v13 = vmul.f32 %v4332_v47, %v934_v57  ;;  %v1613_v59 = vpop.f32.mrf.mxu3 }
 0x253   :  { %v935_v41 = vmul.f32 %v807_v7, %v7134_v27  ;;  %v1064_v57 = vadd.f32 %v4346_v3, %v998_v36  ;;  %v829_v15 = vmul.f32 %v5340_v53, %v5292_v61  ;;  %v1435_v7 = vpop.f32.mrf.mxu1  ;;  %v6962_v50 = vmax.f32 %v5367_v22, 0.0 }
 0x254   :  { %7129 = vst [vmem:[#allocation17_spill] sm:$0xff] %v5333_v29  ;;  %v1924_v42 = vmul.f32 %v5333_v29, %v5333_v29  ;;  %v5349_v26 = vpop.eup %3779  ;;  %v1925_v34 = vmul.f32 %v5337_v30, %v5337_v30  ;;  %v822_v29 = vsub.f32 1.5, %v821_v35  ;;  %v1066_v45 = vadd.f32 %v4346_v3, %v1000_v13 }
 0x255   :  { %7131 = vst [vmem:[#allocation18_spill] sm:$0xff] %v5337_v30  ;;  %1758 = vadd.xlane.f32.xlu0 %v1757_v10  ;;  %v839_v32 = vmul.f32 %v5349_v26, %v5294_v38  ;;  %v1001_v36 = vmul.f32 %v4349_v46, %v935_v41  ;;  %v7138_v13 = vmax.f32 %v5023_v5, 0.0  ;;  %v1527_v41 = vpop.f32.mrf.mxu2  ;;  %v830_v5 = vmul.f32 %v5340_v53, %v829_v15 }
 0x256   :  { %v1989_v30 = vadd.f32 %v1925_v34, %v1924_v42  ;;  %v999_v42 = vmul.f32 %v4349_v46, %v933_v60  ;;  %v813_v34 = vmul.f32 %v5262_v25, %v812_v49  ;;  %v823_v44 = vmul.f32 %v5265_v6, %v822_v29 }
 0x257   :  { %v1738_v2 = vpop.xlane.xlu1 %1737  ;;  %v1106_v49 = vpack.c.bf16 %v1066_v45, %v1064_v57  ;;  %v1067_v0 = vadd.f32 %v4357_v17, %v1001_v36  ;;  %v7142_v27 = vmax.f32 %v5058_v52, 0.0  ;;  %vm845_vm0 = vweird.f32 %v5349_v26 }
 0x258   :  { %v1828_v35 = vmul.f32 %v1738_v2, %v4127_v33  ;;  %v1065_v29 = vadd.f32 %v4357_v17, %v999_v42  ;;  %v5400_v2 = vadd.f32 %v1433_v51, %v1345_v28  ;;  %v1349_v39 = vpop.f32.mrf.mxu0  ;;  %v817_v28 = vsel %vm5377_vm13, %v5262_v25, %v813_v34  ;;  %vm846_vm3 = vmor %vm844_vm15, %vm845_vm0 }
 0x259   :  { %1990 = vadd.xlane.f32.xlu1 %v1989_v30  ;;  %v1741_v10 = vpop.xlane.xlu2 %1740  ;;  %1373 = vmatmul.bf16.gmra.mxu0 %v1106_v49  ;;  %v827_v51 = vsel %vm5394_vm14, %v5265_v6, %v823_v44  ;;  %v7141_v42 = vmax.f32 %v5067_v62, 0.0  ;;  %v936_v25 = vmul.f32 %v817_v28, %v4817_v40  ;;  %v7144_v62 = vld [vmem:[#allocation21_spill] sm:$0xff]  ;;  %vm835_vm2 = vweird.f32 %v5340_v53 }
 0x25a   :  { %v5384_v30 = vsub.f32 %v7137_v18, %v1828_v35  ;;  %v5388_v60 = vsub.f32 %v7138_v13, %v1828_v35  ;;  %v840_v35 = vmul.f32 %v5349_v26, %v839_v32  ;;  %v1829_v18 = vmul.f32 %v1741_v10, %v4127_v33  ;;  %1551 = vmatmul.bf16.gmra.mxu2 %v1106_v49  ;;  %v1616_v34 = vpop.f32.mrf.mxu3  ;;  %v7143_v49 = vld [vmem:[#allocation28_spill] sm:$0xff]  ;;  %vm836_vm4 = vmor %vm834_vm1, %vm835_vm2 }
 0x25b   :  { %v1347_v13 = vadd.f32 %v1346_v58, %v4765_v9  ;;  %v1107_v57 = vpack.c.bf16 %v1067_v0, %v1065_v29  ;;  %v6965_v24 = vmax.f32 %v5400_v2, 0.0  ;;  %v831_v32 = vmul.f32 0.5, %v830_v5 }
 0x25c   :  { %v1926_v15 = vmul.f32 %v5384_v30, %v5384_v30  ;;  %v1927_v58 = vmul.f32 %v5388_v60, %v5388_v60  ;;  %v841_v45 = vmul.f32 0.5, %v840_v35  ;;  %v5421_v36 = vsub.f32 %v7141_v42, %v1829_v18 }
 0x25d   :  { %1462 = vmatmul.bf16.gmra.mxu1 %v1107_v57  ;;  %1640 = vmatmul.bf16.gmra.mxu3 %v1107_v57  ;;  %v938_v6 = vmul.f32 %v827_v51, %v4846_v55  ;;  %v5425_v10 = vadd.f32 %v1435_v7, %v1347_v13  ;;  %v5429_v44 = vsub.f32 %v7142_v27, %v1829_v18  ;;  %v1438_v7 = vpop.f32.mrf.mxu1  ;;  %v832_v13 = vsub.f32 1.5, %v831_v32  ;;  %v1529_v57 = vpop.f32.mrf.mxu2 }
 0x25e   :  { %v937_v29 = vmul.f32 %v817_v28, %v7143_v49  ;;  %v5432_v0 = vadd.f32 %v1613_v59, %v1525_v19  ;;  %v1992_v5 = vadd.f32 %v1927_v58, %v1926_v15  ;;  %v1760_v40 = vadd.f32 %v6962_v50, %v6965_v24 }
 0x25f   :  { %v939_v55 = vmul.f32 %v827_v51, %v7144_v62  ;;  %v1928_v52 = vmul.f32 %v5421_v36, %v5421_v36  ;;  %v1929_v18 = vmul.f32 %v5429_v44, %v5429_v44  ;;  %v842_v19 = vsub.f32 1.5, %v841_v45 }
 0x260   :  { %v1528_v59 = vadd.f32 %v1527_v41, %v4787_v23  ;;  %1761 = vadd.xlane.f32.xlu0 %v1760_v40  ;;  %v7145_v28 = vmax.f32 %v5099_v48, 0.0  ;;  %v1002_v58 = vmul.f32 %v4332_v47, %v936_v25  ;;  %v1004_v42 = vmul.f32 %v4332_v47, %v938_v6  ;;  %v1351_v48 = vpop.f32.mrf.mxu0 }
 0x261   :  { %v1744_v16 = vpop.xlane.xlu2 %1743  ;;  %1993 = vadd.xlane.f32.xlu1 %v1992_v5  ;;  %v1995_v51 = vadd.f32 %v1929_v18, %v1928_v52  ;;  %v6960_v27 = vmax.f32 %v5432_v0, 0.0  ;;  %v7146_v41 = vmax.f32 %v5090_v20, 0.0  ;;  %v6961_v45 = vmax.f32 %v5425_v10, 0.0 }
 0x262   :  { %v1830_v35 = vmul.f32 %v1744_v16, %v4127_v33  ;;  %v1070_v16 = vadd.f32 %v4346_v3, %v1004_v42  ;;  %v1003_v25 = vmul.f32 %v4349_v46, %v937_v29  ;;  %v1005_v6 = vmul.f32 %v4349_v46, %v939_v55 }
 0x263   :  { %1996 = vadd.xlane.f32.xlu2 %v1995_v51  ;;  %v1350_v38 = vadd.f32 %v1349_v39, %v4765_v9  ;;  %v843_v20 = vmul.f32 %v5349_v26, %v842_v19  ;;  %v833_v49 = vmul.f32 %v5340_v53, %v832_v13  ;;  %v5467_v5 = vadd.f32 %v1616_v34, %v1528_v59  ;;  %v1618_v34 = vpop.f32.mrf.mxu3 }
 0x264   :  { %v5447_v15 = vsub.f32 %v7145_v28, %v1830_v35  ;;  %v5456_v32 = vsub.f32 %v7146_v41, %v1830_v35  ;;  %v1068_v40 = vadd.f32 %v4346_v3, %v1002_v58  ;;  %v1530_v55 = vadd.f32 %v1529_v57, %v4787_v23 }
 0x265   :  { %v1763_v39 = vadd.f32 %v6960_v27, %v6961_v45  ;;  %v1071_v61 = vadd.f32 %v4357_v17, %v1005_v6  ;;  %v1069_v18 = vadd.f32 %v4357_v17, %v1003_v25  ;;  %v5481_v13 = vadd.f32 %v1438_v7, %v1350_v38  ;;  %v1440_v28 = vpop.f32.mrf.mxu1  ;;  %v1532_v25 = vpop.f32.mrf.mxu2 }
 0x266   :  { %7147 = vst [vmem:[#allocation37_spill] sm:$0xff] %v5456_v32  ;;  %v1930_v29 = vmul.f32 %v5447_v15, %v5447_v15  ;;  %v1931_v35 = vmul.f32 %v5456_v32, %v5456_v32  ;;  %v1108_v52 = vpack.c.bf16 %v1070_v16, %v1068_v40  ;;  %v847_v19 = vsel %vm846_vm3, %v5349_v26, %v843_v20  ;;  %v3555_v32 = vld [vmem:[#allocation7 + $0x40] sm:$0xf] }
 0x267   :  { %v1352_v59 = vadd.f32 %v1351_v48, %v4765_v9  ;;  %v1109_v51 = vpack.c.bf16 %v1071_v61, %v1069_v18  ;;  %v837_v42 = vsel %vm836_vm4, %v5340_v53, %v833_v49  ;;  %v6958_v41 = vmax.f32 %v5467_v5, 0.0 }
 0x268   :  { %v1998_v58 = vadd.f32 %v1931_v35, %v1930_v29  ;;  %v5488_v16 = vadd.f32 %v1618_v34, %v1530_v55  ;;  %v942_v7 = vmul.f32 %v847_v19, %v4947_v54  ;;  %v6959_v26 = vmax.f32 %v5481_v13, 0.0  ;;  %v1354_v40 = vpop.f32.mrf.mxu0  ;;  %v7152_v55 = vld [vmem:[#allocation22_spill] sm:$0xff] }
 0x269   :  { %v1753_v62 = vpop.xlane.xlu2 %1752  ;;  %1764 = vadd.xlane.f32.xlu1 %v1763_v39  ;;  %1378 = vmatmul.bf16.gmra.mxu0 %v1108_v52  ;;  %v5492_v48 = vadd.f32 %v1440_v28, %v1352_v59  ;;  %v7148_v6 = vmax.f32 %v5119_v8, 0.0  ;;  %v7150_v20 = vmax.f32 %v5111_v21, 0.0  ;;  %v940_v49 = vmul.f32 %v837_v42, %v4921_v11 }
 0x26a   :  { %v1833_v57 = vmul.f32 %v1753_v62, %v4127_v33  ;;  %1556 = vmatmul.bf16.gmra.mxu2 %v1108_v52  ;;  %v943_v54 = vmul.f32 %v847_v19, %v4950_v12  ;;  %v6956_v62 = vmax.f32 %v5488_v16, 0.0  ;;  %v1533_v29 = vadd.f32 %v1532_v25, %v4787_v23 }
 0x26b   :  { %1999 = vadd.xlane.f32.xlu2 %v1998_v58  ;;  %v1766_v8 = vadd.f32 %v6958_v41, %v6959_v26  ;;  %v941_v39 = vmul.f32 %v837_v42, %v7152_v55  ;;  %v1008_v21 = vmul.f32 %v4332_v47, %v942_v7  ;;  %v6957_v61 = vmax.f32 %v5492_v48, 0.0  ;;  %v1621_v34 = vpop.f32.mrf.mxu3 }
 0x26c   :  { %v5496_v38 = vsub.f32 %v7148_v6, %v1833_v57  ;;  %v5500_v53 = vsub.f32 %v7150_v20, %v1833_v57  ;;  %v1355_v11 = vadd.f32 %v1354_v40, %v4765_v9  ;;  %v1006_v52 = vmul.f32 %v4332_v47, %v940_v49 }
 0x26d   :  { %1467 = vmatmul.bf16.gmra.mxu1 %v1109_v51  ;;  %1645 = vmatmul.bf16.gmra.mxu3 %v1109_v51  ;;  %v1009_v18 = vmul.f32 %v4349_v46, %v943_v54  ;;  %v5520_v19 = vadd.f32 %v1621_v34, %v1533_v29  ;;  %v1769_v59 = vadd.f32 %v6956_v62, %v6957_v61  ;;  %v1443_v57 = vpop.f32.mrf.mxu1  ;;  %v3711_v34 = vld [vmem:[#allocation7 + $0xf4] sm:$0xf] }
 0x26e   :  { %7149 = vst [vmem:[#allocation23_spill] sm:$0xff] %v5496_v38  ;;  %v1936_v12 = vmul.f32 %v5496_v38, %v5496_v38  ;;  %v1937_v35 = vmul.f32 %v5500_v53, %v5500_v53  ;;  %v1074_v28 = vadd.f32 %v4346_v3, %v1008_v21  ;;  %v1007_v51 = vmul.f32 %v4349_v46, %v941_v39  ;;  %v5541_v39 = vpop.f32.mrf.mxu2 }
 0x26f   :  { %7151 = vst [vmem:[#allocation19_spill] sm:$0xff] %v5500_v53  ;;  %v5528_v58 = vadd.f32 %v1443_v57, %v1355_v11  ;;  %v1072_v7 = vadd.f32 %v4346_v3, %v1006_v52  ;;  %v1075_v25 = vadd.f32 %v4357_v17, %v1009_v18  ;;  %v6954_v6 = vmax.f32 %v5520_v19, 0.0 }
 0x270   :  { %v2007_v42 = vadd.f32 %v1937_v35, %v1936_v12  ;;  %v1073_v49 = vadd.f32 %v4357_v17, %v1007_v51  ;;  %v5543_v21 = vpop.f32.mrf.mxu0  ;;  %v3695_v12 = vld [vmem:[#allocation7 + $0x74] sm:$0xf]  ;;  %v3581_v35 = vld [vmem:[#allocation7 + $0x78] sm:$0xf0] }
 0x271   :  { %1767 = vadd.xlane.f32.xlu1 %v1766_v8  ;;  %v1110_v20 = vpack.c.bf16 %v1074_v28, %v1072_v7  ;;  %v6955_v54 = vmax.f32 %v5528_v58, 0.0  ;;  %v532_v8 = vmul.f32 %v5327_v14, %v4127_v33  ;;  %v3584_v18 = vor.u32 %v3695_v12, %v3581_v35  ;;  %v3712_v35 = vld [vmem:[#allocation7 + $0xf4] sm:$0xf0] }
 0x272   :  { %v1111_v40 = vpack.c.bf16 %v1075_v25, %v1073_v49  ;;  %v3579_v49 = vld [vmem:[#allocation7 + $0x70] sm:$0xf] }
 0x273   :  { %1770 = vadd.xlane.f32.xlu2 %v1769_v59  ;;  %v1772_v29 = vadd.f32 %v6954_v6, %v6955_v54  ;;  %v564_v55 = vadd.f32 1e-05, %v532_v8  ;;  %v5545_v11 = vpop.f32.mrf.mxu3  ;;  %v3645_v59 = vld [vmem:[#allocation7 + $0xf8] sm:$0xf0]  ;;  %3066 = vmatpush.bf16.msrb.mxu2 %v3584_v18 }
 0x274   :  { %v3648_v28 = vor.u32 %v3711_v34, %v3645_v59 }
 0x275   :  { %3781 = vrsqrt.f32 %v564_v55  ;;  %v5547_v52 = vpop.f32.mrf.mxu1  ;;  %vm854_vm5 = vweird.f32 %v564_v55 }
 0x276   :  { %v5549_v51 = vpop.f32.mrf.mxu2  ;;  %3155 = vmatpush.bf16.msrb.mxu3 %v3648_v28 }
 0x279   :  { %2008 = vadd.xlane.f32.xlu1 %v2007_v42  ;;  %1383 = vmatmul.bf16.gmra.mxu0 %v1110_v20  ;;  %v5551_v42 = vpop.f32.mrf.mxu0 }
 0x27a   :  { %1561 = vmatmul.bf16.gmra.mxu2 %v1110_v20 }
 0x27b   :  { %1773 = vadd.xlane.f32.xlu2 %v1772_v29  ;;  %v3782_v57 = vpop.eup %3781  ;;  %v5553_v25 = vpop.f32.mrf.mxu3  ;;  %v3643_v29 = vld [vmem:[#allocation7 + $0xf0] sm:$0xf] }
 0x27c   :  { %v849_v14 = vmul.f32 %v3782_v57, %v564_v55  ;;  %v3644_v34 = vor.u32 %v3712_v35, %v3643_v29  ;;  %vm855_vm6 = vweird.f32 %v3782_v57 }
 0x27d   :  { %1472 = vmatmul.bf16.gmra.mxu1 %v1111_v40  ;;  %1650 = vmatmul.bf16.gmra.mxu3 %v1111_v40  ;;  %v3696_v40 = vld [vmem:[#allocation7 + $0x74] sm:$0xf0]  ;;  %v5556_v6 = vpop.f32.mrf.mxu1  ;;  %vm856_vm7 = vmor %vm854_vm5, %vm855_vm6 }
 0x27e   :  { %v850_v7 = vmul.f32 %v3782_v57, %v849_v14  ;;  %v3580_v12 = vor.u32 %v3696_v40, %v3579_v49  ;;  %v1539_v28 = vpop.f32.mrf.mxu2  ;;  %2977 = vmatpush.bf16.msrb.mxu1 %v3644_v34  ;;  %v7155_v40 = vmax.f32 %v5172_v63, 0.0 }
 0x27f   :  { %v1540_v61 = vadd.f32 %v1539_v28, %v4787_v23 }
 0x280   :  { %2888 = vmatpush.bf16.msrb.mxu0 %v3580_v12  ;;  %v851_v18 = vmul.f32 0.5, %v850_v7 }
 0x281   :  { %v1361_v54 = vpop.f32.mrf.mxu0 }
 0x282   :  { %v852_v41 = vsub.f32 1.5, %v851_v18  ;;  %v1362_v7 = vadd.f32 %v1361_v54, %v4765_v9 }
 0x283   :  { %v1628_v12 = vpop.f32.mrf.mxu3 }
 0x284   :  { %v5574_v28 = vadd.f32 %v1628_v12, %v1540_v61  ;;  %v853_v63 = vmul.f32 %v3782_v57, %v852_v41 }
 0x286   :  { %v6963_v26 = vmax.f32 %v5574_v28, 0.0  ;;  %v857_v45 = vsel %vm856_vm7, %v3782_v57, %v853_v63 }
 0x2a5   :  { %v497_v20 = vpop.xlane.xlu0 %496 }
 0x2a6   :  { %v533_v8 = vmul.f32 %v497_v20, %v4127_v33  ;;  %v7153_v20 = vmax.f32 %v5162_v37, 0.0 }
 0x2a8   :  { %v565_v59 = vadd.f32 1e-05, %v533_v8 }
 0x2aa   :  { %3783 = vrsqrt.f32 %v565_v59  ;;  %v1756_v14 = vpop.xlane.xlu2 %1755  ;;  %vm864_vm9 = vweird.f32 %v565_v59 }
 0x2ab   :  { %v1834_v62 = vmul.f32 %v1756_v14, %v4127_v33 }
 0x2ad   :  { %v5562_v49 = vsub.f32 %v7153_v20, %v1834_v62  ;;  %v5566_v29 = vsub.f32 %v7155_v40, %v1834_v62  ;;  %v500_v8 = vpop.xlane.xlu0 %499  ;;  %v1450_v62 = vpop.f32.mrf.mxu1 }
 0x2ae   :  { %v534_v35 = vmul.f32 %v500_v8, %v4127_v33  ;;  %v5579_v40 = vadd.f32 %v1450_v62, %v1362_v7  ;;  %v944_v7 = vmul.f32 %v857_v45, %v5012_v1  ;;  %v1357_v1 = vadd.f32 %v5543_v21, %v4765_v9 }
 0x2af   :  { %7154 = vst [vmem:[#allocation40_spill] sm:$0xff] %v5562_v49  ;;  %v1938_v34 = vmul.f32 %v5562_v49, %v5562_v49  ;;  %v1939_v37 = vmul.f32 %v5566_v29, %v5566_v29 }
 0x2b0   :  { %7156 = vst [vmem:[#allocation15_spill] sm:$0xff] %v5566_v29  ;;  %v3784_v18 = vpop.eup %3783  ;;  %v5576_v20 = vadd.f32 1e-05, %v534_v35  ;;  %v6964_v41 = vmax.f32 %v5579_v40, 0.0 }
 0x2b1   :  { %v859_v14 = vmul.f32 %v3784_v18, %v565_v59  ;;  %v2010_v54 = vadd.f32 %v1939_v37, %v1938_v34  ;;  %vm865_vm8 = vweird.f32 %v3784_v18  ;;  %v7157_v34 = vld [vmem:[#allocation29_spill] sm:$0xff] }
 0x2b2   :  { %3785 = vrsqrt.f32 %v5576_v20  ;;  %v945_v37 = vmul.f32 %v857_v45, %v7157_v34  ;;  %v1781_v62 = vadd.f32 %v6963_v26, %v6964_v41  ;;  %vm866_vm10 = vmor %vm864_vm9, %vm865_vm8  ;;  %vm874_vm12 = vweird.f32 %v5576_v20 }
 0x2b3   :  { %v860_v8 = vmul.f32 %v3784_v18, %v859_v14  ;;  %2011 = vadd.xlane.f32.xlu1 %v2010_v54  ;;  %v1364_v27 = vpop.f32.mrf.mxu0  ;;  %v7158_v14 = vld [vmem:[#allocation33_spill] sm:$0xff] }
 0x2b4   :  { %v1365_v35 = vadd.f32 %v1364_v27, %v4765_v9  ;;  %v7159_v54 = vmax.f32 %v7158_v14, 0.0  ;;  %v7161_v27 = vld [vmem:[#allocation31_spill] sm:$0xff]  ;;  %v7164_v14 = vld [vmem:[#allocation24_spill] sm:$0xff] }
 0x2b5   :  { %v861_v61 = vmul.f32 0.5, %v860_v8  ;;  %v1747_v12 = vpop.xlane.xlu0 %1746  ;;  %v1453_v34 = vpop.f32.mrf.mxu1 }
 0x2b6   :  { %v1831_v55 = vmul.f32 %v1747_v12, %v4127_v33  ;;  %v5606_v41 = vadd.f32 %v1453_v34, %v1365_v35  ;;  %v1011_v34 = vmul.f32 %v4349_v46, %v945_v37 }
 0x2b7   :  { %v862_v50 = vsub.f32 1.5, %v861_v61  ;;  %v7162_v61 = vmax.f32 %v7161_v27, 0.0  ;;  %v7165_v27 = vld [vmem:[#allocation25_spill] sm:$0xff] }
 0x2b8   :  { %v5592_v57 = vpop.eup %3785  ;;  %v5596_v8 = vsub.f32 %v7159_v54, %v1831_v55 }
 0x2b9   :  { %v863_v63 = vmul.f32 %v3784_v18, %v862_v50  ;;  %v5600_v12 = vsub.f32 %v7162_v61, %v1831_v55  ;;  %v869_v45 = vmul.f32 %v5592_v57, %v5576_v20  ;;  %v1542_v50 = vpop.f32.mrf.mxu2  ;;  %vm875_vm11 = vweird.f32 %v5592_v57 }
 0x2ba   :  { %7160 = vst [vmem:[#allocation16_spill] sm:$0xff] %v5596_v8  ;;  %v1932_v59 = vmul.f32 %v5596_v8, %v5596_v8  ;;  %v1543_v29 = vadd.f32 %v1542_v50, %v4787_v23  ;;  %vm876_vm13 = vmor %vm874_vm12, %vm875_vm11 }
 0x2bb   :  { %7163 = vst [vmem:[#allocation26_spill] sm:$0xff] %v5600_v12  ;;  %v867_v26 = vsel %vm866_vm10, %v3784_v18, %v863_v63  ;;  %1782 = vadd.xlane.f32.xlu1 %v1781_v62  ;;  %v1933_v55 = vmul.f32 %v5600_v12, %v5600_v12  ;;  %v870_v61 = vmul.f32 %v5592_v57, %v869_v45  ;;  %v1631_v35 = vpop.f32.mrf.mxu3 }
 0x2bc   :  { %v946_v54 = vmul.f32 %v867_v26, %v7164_v14  ;;  %v947_v21 = vmul.f32 %v867_v26, %v7165_v27  ;;  %v503_v24 = vpop.xlane.xlu1 %502  ;;  %v1010_v62 = vmul.f32 %v4332_v47, %v944_v7  ;;  %v5619_v53 = vadd.f32 %v1631_v35, %v1543_v29  ;;  %v3693_v35 = vld [vmem:[#allocation7 + $0x64] sm:$0xf] }
 0x2bd   :  { %v535_v18 = vmul.f32 %v503_v24, %v4127_v33  ;;  %v2001_v63 = vadd.f32 %v1933_v55, %v1932_v59  ;;  %v871_v49 = vmul.f32 0.5, %v870_v61  ;;  %v5623_v26 = vadd.f32 %v5547_v52, %v1357_v1 }
 0x2be   :  { %v1012_v14 = vmul.f32 %v4332_v47, %v946_v54  ;;  %v1013_v50 = vmul.f32 %v4349_v46, %v947_v21  ;;  %v1535_v24 = vadd.f32 %v5541_v39, %v4787_v23  ;;  %v6972_v7 = vmax.f32 %v5606_v41, 0.0 }
 0x2bf   :  { %v5625_v45 = vadd.f32 1e-05, %v535_v18  ;;  %2002 = vadd.xlane.f32.xlu0 %v2001_v63  ;;  %v6971_v37 = vmax.f32 %v5619_v53, 0.0  ;;  %v1076_v52 = vadd.f32 %v4346_v3, %v1010_v62  ;;  %v1077_v1 = vadd.f32 %v4357_v17, %v1011_v34  ;;  %v3573_v63 = vld [vmem:[#allocation7 + $0x68] sm:$0xf0] }
 0x2c0   :  { %v1078_v29 = vadd.f32 %v4346_v3, %v1012_v14  ;;  %v1988_v59 = vpop.xlane.xlu0 %1987  ;;  %v1079_v55 = vadd.f32 %v4357_v17, %v1013_v50  ;;  %v1360_v54 = vadd.f32 %v5551_v42, %v4765_v9  ;;  %v872_v27 = vsub.f32 1.5, %v871_v49  ;;  %v3571_v62 = vld [vmem:[#allocation7 + $0x60] sm:$0xf]  ;;  %v3694_v49 = vld [vmem:[#allocation7 + $0x64] sm:$0xf0] }
 0x2c1   :  { %3787 = vrsqrt.f32 %v5625_v45  ;;  %v2082_v39 = vmul.f32 %v1988_v59, %v4127_v33  ;;  %v1784_v21 = vadd.f32 %v6971_v37, %v6972_v7  ;;  %v1538_v34 = vadd.f32 %v5549_v51, %v4787_v23  ;;  %v3635_v59 = vld [vmem:[#allocation7 + $0xe0] sm:$0xf]  ;;  %v3627_v37 = vld [vmem:[#allocation7 + $0xd0] sm:$0xf]  ;;  %v3708_v7 = vld [vmem:[#allocation7 + $0xd4] sm:$0xf0] }
 0x2c2   :  { %v1112_v61 = vpack.c.bf16 %v1078_v29, %v1076_v52  ;;  %v1113_v18 = vpack.c.bf16 %v1079_v55, %v1077_v1  ;;  %v3576_v42 = vor.u32 %v3693_v35, %v3573_v63  ;;  %v5650_v12 = vadd.f32 %v5545_v11, %v1535_v24  ;;  %v3710_v52 = vld [vmem:[#allocation7 + $0xe4] sm:$0xf0]  ;;  %v3709_v1 = vld [vmem:[#allocation7 + $0xe4] sm:$0xf]  ;;  %v3637_v55 = vld [vmem:[#allocation7 + $0xe8] sm:$0xf0] }
 0x2c3   :  { %v5646_v50 = vadd.f32 1e-05, %v2082_v39  ;;  %1785 = vadd.xlane.f32.xlu1 %v1784_v21  ;;  %v5654_v51 = vadd.f32 %v5556_v6, %v1360_v54  ;;  %v3563_v39 = vld [vmem:[#allocation7 + $0x50] sm:$0xf]  ;;  %v3692_v21 = vld [vmem:[#allocation7 + $0x54] sm:$0xf0]  ;;  %v3572_v6 = vor.u32 %v3694_v49, %v3571_v62  ;;  %v3636_v54 = vor.u32 %v3710_v52, %v3635_v59 }
 0x2c4   :  { %v1750_v14 = vpop.xlane.xlu1 %1749  ;;  %1388 = vmatmul.bf16.gmra.mxu0 %v1112_v61  ;;  %1477 = vmatmul.bf16.gmra.mxu1 %v1113_v18  ;;  %v7166_v11 = vmax.f32 %v5063_v4, 0.0  ;;  %v7168_v63 = vmax.f32 %v5087_v43, 0.0  ;;  %v873_v38 = vmul.f32 %v5592_v57, %v872_v27  ;;  %v3707_v43 = vld [vmem:[#allocation7 + $0xd4] sm:$0xf]  ;;  %v3640_v27 = vor.u32 %v3709_v1, %v3637_v55 }
 0x2c5   :  { %v1832_v29 = vmul.f32 %v1750_v14, %v4127_v33  ;;  %3789 = vrsqrt.f32 %v5646_v50  ;;  %1566 = vmatmul.bf16.gmra.mxu2 %v1112_v61  ;;  %1655 = vmatmul.bf16.gmra.mxu3 %v1113_v18  ;;  %v3691_v61 = vld [vmem:[#allocation7 + $0x54] sm:$0xf]  ;;  %v5668_v18 = vadd.f32 %v5553_v25, %v1538_v34  ;;  %v3564_v52 = vor.u32 %v3692_v21, %v3563_v39 }
 0x2c6   :  { %3067 = vmatpush.bf16.msrb.mxu2 %v3576_v42  ;;  %2889 = vmatpush.bf16.msrb.mxu0 %v3572_v6  ;;  %v3628_v42 = vor.u32 %v3708_v7, %v3627_v37  ;;  %v877_v1 = vsel %vm876_vm13, %v5592_v57, %v873_v38  ;;  %v7173_v39 = vmax.f32 %v5305_v56, 0.0  ;;  %v3706_v7 = vld [vmem:[#allocation7 + $0xc4] sm:$0xf0]  ;;  %v3689_v57 = vld [vmem:[#allocation7 + $0x44] sm:$0xf]  ;;  %vm884_vm15 = vweird.f32 %v5625_v45 }
 0x2c7   :  { %v5657_v35 = vpop.eup %3787  ;;  %v5661_v24 = vsub.f32 %v7166_v11, %v1832_v29  ;;  %v5665_v14 = vsub.f32 %v7168_v63, %v1832_v29  ;;  %7170 = vst [vmem:[#allocation39_spill] sm:$0xff] %v5668_v18  ;;  %v3565_v11 = vld [vmem:[#allocation7 + $0x58] sm:$0xf0]  ;;  %2978 = vmatpush.bf16.msrb.mxu1 %v3636_v54  ;;  %3156 = vmatpush.bf16.msrb.mxu3 %v3640_v27  ;;  %v7171_v54 = vmax.f32 %v5310_v31, 0.0  ;;  %v3557_v31 = vld [vmem:[#allocation7 + $0x48] sm:$0xf0]  ;;  %vm2152_vm1 = vweird.f32 %v5646_v50 }
 0x2c8   :  { %v879_v4 = vmul.f32 %v5657_v35, %v5625_v45  ;;  %v3629_v29 = vld [vmem:[#allocation7 + $0xd8] sm:$0xf0]  ;;  %v1759_v62 = vpop.xlane.xlu0 %1758  ;;  %vm885_vm14 = vweird.f32 %v5657_v35 }
 0x2c9   :  { %7167 = vst [vmem:[#allocation27_spill] sm:$0xff] %v5661_v24  ;;  %v1934_v49 = vmul.f32 %v5661_v24, %v5661_v24  ;;  %v1935_v25 = vmul.f32 %v5665_v14, %v5665_v14  ;;  %v1835_v59 = vmul.f32 %v1759_v62, %v4127_v33  ;;  %v3568_v24 = vor.u32 %v3691_v61, %v3565_v11  ;;  %v3619_v62 = vld [vmem:[#allocation7 + $0xc0] sm:$0xf]  ;;  %vm886_vm0 = vmor %vm884_vm15, %vm885_vm14  ;;  %v3549_v11 = vld [vmem:[#allocation7 + $0x38] sm:$0xf0] }
 0x2ca   :  { %7169 = vst [vmem:[#allocation38_spill] sm:$0xff] %v5665_v14  ;;  %v880_v34 = vmul.f32 %v5657_v35, %v879_v4  ;;  %v3632_v8 = vor.u32 %v3707_v43, %v3629_v29  ;;  %v3690_v14 = vld [vmem:[#allocation7 + $0x44] sm:$0xf0]  ;;  %2890 = vmatpush.bf16.msrb.mxu0 %v3564_v52  ;;  %v7176_v52 = vld [vmem:[#allocation20_spill] sm:$0xff] }
 0x2cb   :  { %v2004_v63 = vadd.f32 %v1935_v25, %v1934_v49  ;;  %v5684_v6 = vpop.eup %3789  ;;  %v5689_v4 = vsub.f32 %v7171_v54, %v1835_v59  ;;  %v5693_v21 = vsub.f32 %v7173_v39, %v1835_v59  ;;  %v3556_v38 = vor.u32 %v3690_v14, %v3555_v32  ;;  %2979 = vmatpush.bf16.msrb.mxu1 %v3628_v42  ;;  %v7175_v29 = vld [vmem:[#allocation30_spill] sm:$0xff]  ;;  %v1544_v25 = vpop.f32.mrf.mxu2  ;;  %v3688_v54 = vld [vmem:[#allocation7 + $0x34] sm:$0xf0]  ;;  %v3611_v39 = vld [vmem:[#allocation7 + $0xb0] sm:$0xf] }
 0x2cc   :  { %v881_v20 = vmul.f32 0.5, %v880_v34  ;;  %v1991_v55 = vpop.xlane.xlu1 %1990  ;;  %v2147_v37 = vmul.f32 %v5684_v6, %v5646_v50  ;;  %3068 = vmatpush.bf16.msrb.mxu2 %v3568_v24  ;;  %v948_v49 = vmul.f32 %v877_v1, %v7175_v29  ;;  %3157 = vmatpush.bf16.msrb.mxu3 %v3632_v8  ;;  %v3620_v14 = vor.u32 %v3706_v7, %v3619_v62  ;;  %v3705_v34 = vld [vmem:[#allocation7 + $0xc4] sm:$0xf]  ;;  %v3621_v59 = vld [vmem:[#allocation7 + $0xc8] sm:$0xf0] }
 0x2cd   :  { %7172 = vst [vmem:[#allocation28_spill] sm:$0xff] %v5689_v4  ;;  %v2083_v61 = vmul.f32 %v1991_v55, %v4127_v33  ;;  %2005 = vadd.xlane.f32.xlu0 %v2004_v63  ;;  %v1940_v56 = vmul.f32 %v5689_v4, %v5689_v4  ;;  %v1941_v32 = vmul.f32 %v5693_v21, %v5693_v21  ;;  %v1366_v55 = vpop.f32.mrf.mxu0  ;;  %v3704_v62 = vld [vmem:[#allocation7 + $0xb4] sm:$0xf0]  ;;  %v7177_v29 = vld [vmem:[#allocation34_spill] sm:$0xff]  ;;  %v3703_v7 = vld [vmem:[#allocation7 + $0xb4] sm:$0xf]  ;;  %vm2153_vm2 = vweird.f32 %v5684_v6 }
 0x2ce   :  { %7174 = vst [vmem:[#allocation21_spill] sm:$0xff] %v5693_v21  ;;  %v882_v43 = vsub.f32 1.5, %v881_v20  ;;  %v949_v63 = vmul.f32 %v877_v1, %v7176_v52  ;;  %v2148_v24 = vmul.f32 %v5684_v6, %v2147_v37  ;;  %v3560_v42 = vor.u32 %v3689_v57, %v3557_v31  ;;  %v3547_v20 = vld [vmem:[#allocation7 + $0x30] sm:$0xf]  ;;  %2891 = vmatpush.bf16.msrb.mxu0 %v3556_v38  ;;  %v7178_v57 = vld [vmem:[#allocation32_spill] sm:$0xff]  ;;  %vm2154_vm4 = vmor %vm2152_vm1, %vm2153_vm2 }
 0x2cf   :  { %v5704_v27 = vadd.f32 1e-05, %v2083_v61  ;;  %v2013_v8 = vadd.f32 %v1941_v32, %v1940_v56  ;;  %2980 = vmatpush.bf16.msrb.mxu1 %v3620_v14  ;;  %v3624_v61 = vor.u32 %v3705_v34, %v3621_v59  ;;  %v7179_v52 = vmax.f32 %v5623_v26, 0.0  ;;  %v3613_v21 = vld [vmem:[#allocation7 + $0xb8] sm:$0xf0] }
 0x2d0   :  { %v883_v45 = vmul.f32 %v5657_v35, %v882_v43  ;;  %3069 = vmatpush.bf16.msrb.mxu2 %v3560_v42  ;;  %v3687_v43 = vld [vmem:[#allocation7 + $0x34] sm:$0xf]  ;;  %v7180_v56 = vmax.f32 %v5650_v12, 0.0  ;;  %v1014_v32 = vmul.f32 %v4332_v47, %v948_v49  ;;  %v1015_v14 = vmul.f32 %v4349_v46, %v949_v63  ;;  %v3686_v42 = vld [vmem:[#allocation7 + $0x24] sm:$0xf0] }
 0x2d1   :  { %3791 = vrsqrt.f32 %v5704_v27  ;;  %2014 = vadd.xlane.f32.xlu2 %v2013_v8  ;;  %3158 = vmatpush.bf16.msrb.mxu3 %v3624_v61  ;;  %v3548_v34 = vor.u32 %v3688_v54, %v3547_v20  ;;  %v3612_v59 = vor.u32 %v3704_v62, %v3611_v39  ;;  %v1545_v63 = vadd.f32 %v1544_v25, %v4787_v23  ;;  %v3603_v54 = vld [vmem:[#allocation7 + $0xa0] sm:$0xf] }
 0x2d2   :  { %v887_v1 = vsel %vm886_vm0, %v5657_v35, %v883_v45  ;;  %v1775_v38 = vadd.f32 %v7180_v56, %v7179_v52  ;;  %v5723_v35 = vmul.f32 0.5, %v2148_v24  ;;  %v3539_v45 = vld [vmem:[#allocation7 + $0x20] sm:$0xf]  ;;  %v7182_v24 = vmax.f32 %v5668_v18, 0.0  ;;  %v5735_v52 = vpop.f32.mrf.mxu1 }
 0x2d3   :  { %v950_v37 = vmul.f32 %v887_v1, %v7177_v29  ;;  %v951_v31 = vmul.f32 %v887_v1, %v7178_v57  ;;  %v5727_v1 = vadd.f32 %v1366_v55, %v4765_v9  ;;  %v1633_v29 = vpop.f32.mrf.mxu3  ;;  %v7181_v57 = vmax.f32 %v5654_v51, 0.0  ;;  %2892 = vmatpush.bf16.msrb.mxu0 %v3548_v34  ;;  %2981 = vmatpush.bf16.msrb.mxu1 %v3612_v59  ;;  %v3531_v59 = vld [vmem:[#allocation7 + $0x10] sm:$0xf] }
 0x2d4   :  { %v3552_v20 = vor.u32 %v3687_v43, %v3549_v11  ;;  %v3616_v55 = vor.u32 %v3703_v7, %v3613_v21  ;;  %v1994_v62 = vpop.xlane.xlu1 %1993  ;;  %v3540_v56 = vor.u32 %v3686_v42, %v3539_v45  ;;  %v2150_v25 = vsub.f32 1.5, %v5723_v35  ;;  %v3701_v7 = vld [vmem:[#allocation7 + $0xa4] sm:$0xf]  ;;  %v3605_v35 = vld [vmem:[#allocation7 + $0xa8] sm:$0xf0] }
 0x2d5   :  { %1776 = vadd.xlane.f32.xlu0 %v1775_v38  ;;  %v1016_v8 = vmul.f32 %v4332_v47, %v950_v37  ;;  %v1017_v49 = vmul.f32 %v4349_v46, %v951_v31  ;;  %v1778_v61 = vadd.f32 %v7182_v24, %v7181_v57  ;;  %v1762_v47 = vpop.xlane.xlu0 %1761  ;;  %v1080_v46 = vadd.f32 %v4346_v3, %v1014_v32  ;;  %v3702_v38 = vld [vmem:[#allocation7 + $0xa4] sm:$0xf0]  ;;  %v3685_v57 = vld [vmem:[#allocation7 + $0x24] sm:$0xf]  ;;  %v3541_v24 = vld [vmem:[#allocation7 + $0x28] sm:$0xf0]  ;;  %v5754_v4 = vpop.f32.mrf.mxu0 }
 0x2d6   :  { %v1081_v11 = vadd.f32 %v4357_v17, %v1015_v14  ;;  %3070 = vmatpush.bf16.msrb.mxu2 %v3552_v20  ;;  %3159 = vmatpush.bf16.msrb.mxu3 %v3616_v55  ;;  %v2084_v43 = vmul.f32 %v1994_v62, %v4127_v33  ;;  %v1836_v32 = vmul.f32 %v1762_v47, %v4127_v33  ;;  %v3684_v45 = vld [vmem:[#allocation7 + $0x14] sm:$0xf0]  ;;  %v3595_v20 = vld [vmem:[#allocation7 + $0x90] sm:$0xf]  ;;  %v7183_v62 = vmax.f32 %v5400_v2, 0.0 }
 0x2d7   :  { %v5738_v39 = vpop.eup %3791  ;;  %v1082_v37 = vadd.f32 %v4346_v3, %v1016_v8  ;;  %v1083_v31 = vadd.f32 %v4357_v17, %v1017_v49  ;;  %v5749_v3 = vpop.f32.mrf.mxu2  ;;  %2893 = vmatpush.bf16.msrb.mxu0 %v3540_v56  ;;  %v3604_v17 = vor.u32 %v3702_v38, %v3603_v54  ;;  %v3544_v14 = vor.u32 %v3685_v57, %v3541_v24  ;;  %v3700_v55 = vld [vmem:[#allocation7 + $0x94] sm:$0xf0]  ;;  %v3683_v54 = vld [vmem:[#allocation7 + $0x14] sm:$0xf]  ;;  %v3533_v56 = vld [vmem:[#allocation7 + $0x18] sm:$0xf0] }
 0x2d8   :  { %v2157_v21 = vmul.f32 %v5738_v39, %v5704_v27  ;;  %v1997_v49 = vpop.xlane.xlu2 %1996  ;;  %v5756_v18 = vadd.f32 1e-05, %v2084_v43  ;;  %v5760_v47 = vsub.f32 %v7183_v62, %v1836_v32  ;;  %v2151_v38 = vmul.f32 %v5684_v6, %v2150_v25  ;;  %v3699_v2 = vld [vmem:[#allocation7 + $0x94] sm:$0xf]  ;;  %v3682_v25 = vld [vmem:[#allocation7 + $0x4] sm:$0xf0] }
 0x2d9   :  { %v1114_v34 = vpack.c.bf16 %v1082_v37, %v1080_v46  ;;  %v1115_v8 = vpack.c.bf16 %v1083_v31, %v1081_v11  ;;  %v7184_v46 = vmax.f32 %v5367_v22, 0.0  ;;  %v2085_v31 = vmul.f32 %v1997_v49, %v4127_v33  ;;  %v3597_v11 = vld [vmem:[#allocation7 + $0x98] sm:$0xf0]  ;;  %2982 = vmatpush.bf16.msrb.mxu1 %v3604_v17 }
 0x2da   :  { %v2158_v42 = vmul.f32 %v5738_v39, %v2157_v21  ;;  %v3608_v24 = vor.u32 %v3701_v7, %v3605_v35  ;;  %v3532_v21 = vor.u32 %v3684_v45, %v3531_v59  ;;  %v5768_v43 = vadd.f32 %v1633_v29, %v1545_v63  ;;  %3071 = vmatpush.bf16.msrb.mxu2 %v3544_v14  ;;  %v3587_v63 = vld [vmem:[#allocation7 + $0x80] sm:$0xf]  ;;  %v3698_v35 = vld [vmem:[#allocation7 + $0x84] sm:$0xf0] }
 0x2db   :  { %v5764_v37 = vsub.f32 %v7184_v46, %v1836_v32  ;;  %1393 = vmatmul.bf16.gmra.mxu0 %v1114_v34  ;;  %1571 = vmatmul.bf16.gmra.mxu2 %v1114_v34  ;;  %3793 = vrsqrt.f32 %v5756_v18  ;;  %v5771_v22 = vadd.f32 1e-05, %v2085_v31  ;;  %v1942_v32 = vmul.f32 %v5760_v47, %v5760_v47  ;;  %v3523_v34 = vld [vmem:[#allocation7] sm:$0xf] }
 0x2dc   :  { %v2159_v57 = vmul.f32 0.5, %v2158_v42  ;;  %1482 = vmatmul.bf16.gmra.mxu1 %v1115_v8  ;;  %1660 = vmatmul.bf16.gmra.mxu3 %v1115_v8  ;;  %vm2163_vm3 = vweird.f32 %v5738_v39  ;;  %v3596_v29 = vor.u32 %v3700_v55, %v3595_v20  ;;  %vm2162_vm5 = vweird.f32 %v5704_v27  ;;  %v1765_v59 = vpop.xlane.xlu1 %1764  ;;  %v1458_v27 = vpop.f32.mrf.mxu1 }
 0x2dd   :  { %7185 = vst [vmem:[#allocation22_spill] sm:$0xff] %v5764_v37  ;;  %1779 = vadd.xlane.f32.xlu0 %v1778_v61  ;;  %v1943_v7 = vmul.f32 %v5764_v37, %v5764_v37  ;;  %3160 = vmatpush.bf16.msrb.mxu3 %v3608_v24  ;;  %v5783_v61 = vpop.f32.mrf.mxu3  ;;  %3795 = vrsqrt.f32 %v5771_v22  ;;  %v3536_v45 = vor.u32 %v3683_v54, %v3533_v56  ;;  %vm2164_vm6 = vmor %vm2162_vm5, %vm2163_vm3  ;;  %v7187_v54 = vmax.f32 %v5432_v0, 0.0 }
 0x2de   :  { %v2160_v42 = vsub.f32 1.5, %v2159_v57  ;;  %2894 = vmatpush.bf16.msrb.mxu0 %v3532_v21  ;;  %v3600_v8 = vor.u32 %v3699_v2, %v3597_v11  ;;  %v2155_v49 = vsel %vm2154_vm4, %v5684_v6, %v2151_v38  ;;  %v1837_v14 = vmul.f32 %v1765_v59, %v4127_v33  ;;  %2983 = vmatpush.bf16.msrb.mxu1 %v3596_v29  ;;  %v7189_v57 = vld [vmem:[#allocation35_spill] sm:$0xff]  ;;  %v7190_v29 = vld [vmem:[#allocation17_spill] sm:$0xff] }
 0x2df   :  { %v2016_v20 = vadd.f32 %v1943_v7, %v1942_v32  ;;  %v5791_v50 = vadd.f32 %v5735_v52, %v5727_v1  ;;  %v3524_v55 = vor.u32 %v3682_v25, %v3523_v34  ;;  %v3588_v62 = vor.u32 %v3698_v35, %v3587_v63  ;;  %3072 = vmatpush.bf16.msrb.mxu2 %v3536_v45  ;;  %v3681_v1 = vld [vmem:[#allocation7 + $0x4] sm:$0xf]  ;;  %v3525_v52 = vld [vmem:[#allocation7 + $0x8] sm:$0xf0]  ;;  %v5807_v21 = vpop.f32.mrf.mxu2  ;;  %v1371_v35 = vpop.f32.mrf.mxu0 }
 0x2e0   :  { %v2161_v17 = vmul.f32 %v5738_v39, %v2160_v42  ;;  %v7186_v6 = vmax.f32 %v5425_v10, 0.0  ;;  %v5802_v56 = vsub.f32 %v7187_v54, %v1837_v14  ;;  %v2466_v24 = vmul.f32 %v2155_v49, %v7189_v57  ;;  %v5811_v10 = vld [vmem:[#allocation8] sm:$0xff]  ;;  %v3589_v42 = vld [vmem:[#allocation7 + $0x88] sm:$0xf0] }
 0x2e1   :  { %2017 = vadd.xlane.f32.xlu2 %v2016_v20  ;;  %v5804_v38 = vpop.eup %3793  ;;  %3161 = vmatpush.bf16.msrb.mxu3 %v3600_v8  ;;  %v5814_v2 = vperm.slane %v5811_v10, 3  ;;  %v6992_v0 = vmax.f32 %v5768_v43, 0.0  ;;  %v1370_v11 = vadd.f32 %v5754_v4, %v4765_v9  ;;  %v3697_v25 = vld [vmem:[#allocation7 + $0x84] sm:$0xf]  ;;  %v3528_v45 = vor.u32 %v3681_v1, %v3525_v52  ;;  %v7191_v52 = vld [vmem:[#allocation36_spill] sm:$0xff] }
 0x2e2   :  { %v2165_v46 = vsel %vm2164_vm6, %v5738_v39, %v2161_v17  ;;  %v5798_v31 = vsub.f32 %v7186_v6, %v1837_v14  ;;  %7188 = vst [vmem:[#allocation29_spill] sm:$0xff] %v5802_v56  ;;  %v5809_v39 = vpop.xlane.xlu2 %1999  ;;  %v2167_v32 = vmul.f32 %v5804_v38, %v5756_v18  ;;  %2895 = vmatpush.bf16.msrb.mxu0 %v3524_v55  ;;  %v6993_v4 = vmax.f32 %v5791_v50, 0.0 }
 0x2e3   :  { %v5823_v7 = vpop.eup %3795  ;;  %v2468_v63 = vmul.f32 %v2165_v46, %v7190_v29  ;;  %v1945_v59 = vmul.f32 %v5802_v56, %v5802_v56  ;;  %2984 = vmatpush.bf16.msrb.mxu1 %v3588_v62  ;;  %v1548_v8 = vadd.f32 %v5749_v3, %v4787_v23  ;;  %3073 = vmatpush.bf16.msrb.mxu2 %v3528_v45  ;;  %v7192_v29 = vld [vmem:[#allocation18_spill] sm:$0xff]  ;;  %vm2173_vm7 = vweird.f32 %v5804_v38 }
 0x2e4   :  { %v1944_v34 = vmul.f32 %v5798_v31, %v5798_v31  ;;  %v2168_v17 = vmul.f32 %v5804_v38, %v2167_v32  ;;  %v2177_v14 = vmul.f32 %v5823_v7, %v5771_v22  ;;  %v1768_v20 = vpop.xlane.xlu1 %1767  ;;  %v3592_v6 = vor.u32 %v3697_v25, %v3589_v42  ;;  %v5855_v45 = vld [vmem:[#allocation8 + $0x8] sm:$0xff] }
 0x2e5   :  { %v2532_v54 = vmul.f32 %v5814_v2, %v2466_v24  ;;  %v5835_v57 = vadd.f32 %v1458_v27, %v1370_v11  ;;  %v1787_v3 = vadd.f32 %v6992_v0, %v6993_v4  ;;  %v2467_v32 = vmul.f32 %v2155_v49, %v7191_v52  ;;  %v1638_v56 = vpop.f32.mrf.mxu3  ;;  %v1460_v49 = vpop.f32.mrf.mxu1 }
 0x2e6   :  { %v2019_v55 = vadd.f32 %v1945_v59, %v1944_v34  ;;  %v2169_v62 = vmul.f32 0.5, %v2168_v17  ;;  %v2178_v1 = vmul.f32 %v5823_v7, %v2177_v14  ;;  %v2469_v37 = vmul.f32 %v2165_v46, %v7192_v29  ;;  %3162 = vmatpush.bf16.msrb.mxu3 %v3592_v6 }
 0x2e7   :  { %v2534_v34 = vmul.f32 %v5814_v2, %v2468_v63  ;;  %v5846_v27 = vperm.slane %v5811_v10, 4  ;;  %v5849_v24 = vadd.f32 %v5783_v61, %v1548_v8  ;;  %v1838_v42 = vmul.f32 %v1768_v20, %v4127_v33  ;;  %v1552_v20 = vpop.f32.mrf.mxu2 }
 0x2e8   :  { %2020 = vadd.xlane.f32.xlu0 %v2019_v55  ;;  %v2170_v11 = vsub.f32 1.5, %v2169_v62  ;;  %v2179_v25 = vmul.f32 0.5, %v2178_v1  ;;  %v5858_v63 = vperm.slane %v5855_v45, 3  ;;  %vm2183_vm8 = vweird.f32 %v5823_v7 }
 0x2e9   :  { %1788 = vadd.xlane.f32.xlu2 %v1787_v3  ;;  %v2598_v46 = vadd.f32 %v5846_v27, %v2532_v54  ;;  %v2600_v59 = vadd.f32 %v5846_v27, %v2534_v34  ;;  %v5863_v14 = vperm.slane %v5855_v45, 4  ;;  %vm2172_vm9 = vweird.f32 %v5756_v18  ;;  %v1374_v18 = vpop.f32.mrf.mxu0 }
 0x2ea   :  { %v1771_v17 = vpop.xlane.xlu2 %1770  ;;  %v2171_v61 = vmul.f32 %v5804_v38, %v2170_v11  ;;  %v2180_v8 = vsub.f32 1.5, %v2179_v25  ;;  %v2533_v6 = vmul.f32 %v5858_v63, %v2467_v32  ;;  %v2535_v54 = vmul.f32 %v5858_v63, %v2469_v37  ;;  %vm2174_vm10 = vmor %vm2172_vm9, %vm2173_vm7 }
 0x2eb   :  { %v2662_v55 = vpack.c.bf16 %v2600_v59, %v2598_v46  ;;  %v1839_v62 = vmul.f32 %v1771_v17, %v4127_v33  ;;  %v7193_v3 = vmax.f32 %v5481_v13, 0.0  ;;  %v7195_v29 = vmax.f32 %v5467_v5, 0.0 }
 0x2ec   :  { %v2181_v1 = vmul.f32 %v5823_v7, %v2180_v8  ;;  %v6990_v11 = vmax.f32 %v5849_v24, 0.0  ;;  %v1550_v37 = vadd.f32 %v5807_v21, %v4787_v23  ;;  %vm2182_vm11 = vweird.f32 %v5771_v22 }
 0x2ed   :  { %v5872_v52 = vsub.f32 %v7193_v3, %v1838_v42  ;;  %v5876_v34 = vsub.f32 %v7195_v29, %v1838_v42  ;;  %2896 = vmatmul.bf16.vlgmr.msrb.gmra.mxu0 %v2662_v55  ;;  %3074 = vmatmul.bf16.vlgmr.msrb.gmra.mxu2 %v2662_v55  ;;  %v2175_v13 = vsel %vm2174_vm10, %v5804_v38, %v2171_v61  ;;  %vm2184_vm12 = vmor %vm2182_vm11, %vm2183_vm8  ;;  %v6991_v25 = vmax.f32 %v5835_v57, 0.0 }
 0x2ee   :  { %v2599_v5 = vadd.f32 %v5863_v14, %v2533_v6  ;;  %v2601_v32 = vadd.f32 %v5863_v14, %v2535_v54  ;;  %v1372_v42 = vadd.f32 %v1371_v35, %v4765_v9  ;;  %v2185_v21 = vsel %vm2184_vm12, %v5823_v7, %v2181_v1  ;;  %v1641_v7 = vpop.f32.mrf.mxu3 }
 0x2ef   :  { %7194 = vst [vmem:[#allocation33_spill] sm:$0xff] %v5872_v52  ;;  %v7197_v22 = vmax.f32 %v5492_v48, 0.0  ;;  %v7198_v38 = vmax.f32 %v5488_v16, 0.0  ;;  %v1946_v61 = vmul.f32 %v5872_v52, %v5872_v52  ;;  %v1947_v8 = vmul.f32 %v5876_v34, %v5876_v34 }
 0x2f0   :  { %7196 = vst [vmem:[#allocation31_spill] sm:$0xff] %v5876_v34  ;;  %v2663_v59 = vpack.c.bf16 %v2601_v32, %v2599_v5  ;;  %v2470_v55 = vmul.f32 %v2175_v13, %v5384_v30  ;;  %v5905_v35 = vadd.f32 %v1638_v56, %v1550_v37  ;;  %v1790_v48 = vadd.f32 %v6990_v11, %v6991_v25  ;;  %v1463_v56 = vpop.f32.mrf.mxu1  ;;  %v1554_v32 = vpop.f32.mrf.mxu2 }
 0x2f1   :  { %v5894_v46 = vsub.f32 %v7197_v22, %v1839_v62  ;;  %v5898_v17 = vsub.f32 %v7198_v38, %v1839_v62  ;;  %v2472_v16 = vmul.f32 %v2185_v21, %v5421_v36  ;;  %v2022_v54 = vadd.f32 %v1947_v8, %v1946_v61  ;;  %v1376_v22 = vpop.f32.mrf.mxu0 }
 0x2f2   :  { %v1774_v6 = vpop.xlane.xlu2 %1773  ;;  %2985 = vmatmul.bf16.vlgmr.msrb.gmra.mxu1 %v2663_v59  ;;  %3163 = vmatmul.bf16.vlgmr.msrb.gmra.mxu3 %v2663_v59  ;;  %v5913_v1 = vadd.f32 %v1460_v49, %v1372_v42  ;;  %v2473_v30 = vmul.f32 %v2185_v21, %v5429_v44  ;;  %v2471_v3 = vmul.f32 %v2175_v13, %v5388_v60  ;;  %v6988_v37 = vmax.f32 %v5905_v35, 0.0 }
 0x2f3   :  { %v1840_v62 = vmul.f32 %v1774_v6, %v4127_v33  ;;  %1791 = vadd.xlane.f32.xlu2 %v1790_v48  ;;  %2023 = vadd.xlane.f32.xlu0 %v2022_v54  ;;  %v1948_v29 = vmul.f32 %v5894_v46, %v5894_v46  ;;  %v1949_v36 = vmul.f32 %v5898_v17, %v5898_v17  ;;  %v7199_v49 = vmax.f32 %v5528_v58, 0.0 }
 0x2f4   :  { %v1553_v5 = vadd.f32 %v1552_v20, %v4787_v23  ;;  %v2536_v21 = vmul.f32 %v5814_v2, %v2470_v55  ;;  %v2538_v60 = vmul.f32 %v5814_v2, %v2472_v16  ;;  %v6989_v13 = vmax.f32 %v5913_v1, 0.0 }
 0x2f5   :  { %v5925_v42 = vsub.f32 %v7199_v49, %v1840_v62  ;;  %v2025_v44 = vadd.f32 %v1949_v36, %v1948_v29  ;;  %v7201_v59 = vmax.f32 %v5520_v19, 0.0  ;;  %v2539_v61 = vmul.f32 %v5858_v63, %v2473_v30 }
 0x2f6   :  { %v1375_v20 = vadd.f32 %v1374_v18, %v4765_v9  ;;  %v2602_v58 = vadd.f32 %v5846_v27, %v2536_v21  ;;  %v2604_v8 = vadd.f32 %v5846_v27, %v2538_v60  ;;  %v2537_v55 = vmul.f32 %v5858_v63, %v2471_v3 }
 0x2f7   :  { %7200 = vst [vmem:[#allocation24_spill] sm:$0xff] %v5925_v42  ;;  %v5932_v38 = vsub.f32 %v7201_v59, %v1840_v62  ;;  %2026 = vadd.xlane.f32.xlu1 %v2025_v44  ;;  %v5939_v48 = vadd.f32 %v1641_v7, %v1553_v5  ;;  %v1555_v6 = vadd.f32 %v1554_v32, %v4787_v23  ;;  %v1643_v62 = vpop.f32.mrf.mxu3 }
 0x2f8   :  { %v1793_v19 = vadd.f32 %v6988_v37, %v6989_v13  ;;  %v2664_v16 = vpack.c.bf16 %v2604_v8, %v2602_v58  ;;  %v2605_v54 = vadd.f32 %v5863_v14, %v2539_v61  ;;  %v1950_v18 = vmul.f32 %v5925_v42, %v5925_v42  ;;  %v1465_v36 = vpop.f32.mrf.mxu1  ;;  %v1557_v21 = vpop.f32.mrf.mxu2 }
 0x2f9   :  { %7202 = vst [vmem:[#allocation25_spill] sm:$0xff] %v5932_v38  ;;  %v1951_v30 = vmul.f32 %v5932_v38, %v5932_v38  ;;  %v5951_v3 = vadd.f32 %v1463_v56, %v1375_v20  ;;  %v1377_v7 = vadd.f32 %v1376_v22, %v4765_v9  ;;  %v2603_v29 = vadd.f32 %v5863_v14, %v2537_v55  ;;  %v1379_v56 = vpop.f32.mrf.mxu0 }
 0x2fa   :  { %v6986_v32 = vmax.f32 %v5939_v48, 0.0  ;;  %v5956_v49 = vadd.f32 %v1643_v62, %v1555_v6  ;;  %v1558_v61 = vadd.f32 %v1557_v21, %v4787_v23  ;;  %v1380_v8 = vadd.f32 %v1379_v56, %v4765_v9 }
 0x2fb   :  { %1794 = vadd.xlane.f32.xlu0 %v1793_v19  ;;  %v2028_v5 = vadd.f32 %v1951_v30, %v1950_v18  ;;  %v2665_v44 = vpack.c.bf16 %v2605_v54, %v2603_v29  ;;  %v6987_v60 = vmax.f32 %v5951_v3, 0.0  ;;  %v5959_v59 = vadd.f32 %v1465_v36, %v1377_v7  ;;  %v2009_v29 = vpop.xlane.xlu1 %2008 }
 0x2fc   :  { %v6984_v22 = vmax.f32 %v5956_v49, 0.0  ;;  %v2086_v7 = vmul.f32 %v5809_v39, %v4127_v33 }
 0x2fd   :  { %2901 = vmatmul.bf16.gmra.mxu0 %v2664_v16  ;;  %3079 = vmatmul.bf16.gmra.mxu2 %v2664_v16  ;;  %v1796_v20 = vadd.f32 %v6986_v32, %v6987_v60  ;;  %v6985_v58 = vmax.f32 %v5959_v59, 0.0 }
 0x2fe   :  { %v2118_v36 = vadd.f32 1e-05, %v2086_v7 }
 0x2ff   :  { %2029 = vadd.xlane.f32.xlu1 %v2028_v5  ;;  %v1646_v55 = vpop.f32.mrf.mxu3  ;;  %v1799_v19 = vadd.f32 %v6984_v22, %v6985_v58  ;;  %v7207_v22 = vmax.f32 %v5574_v28, 0.0 }
 0x300   :  { %v5969_v6 = vadd.f32 %v1646_v55, %v1558_v61  ;;  %v1468_v16 = vpop.f32.mrf.mxu1  ;;  %v5985_v5 = vpop.f32.mrf.mxu2  ;;  %3797 = vrsqrt.f32 %v2118_v36  ;;  %vm2192_vm14 = vweird.f32 %v2118_v36 }
 0x301   :  { %v5975_v54 = vadd.f32 %v1468_v16, %v1380_v8 }
 0x302   :  { %2990 = vmatmul.bf16.gmra.mxu1 %v2665_v44  ;;  %3168 = vmatmul.bf16.gmra.mxu3 %v2665_v44  ;;  %7203 = vst [vmem:[#allocation30_spill] sm:$0xff] %v5969_v6  ;;  %v6982_v18 = vmax.f32 %v5969_v6, 0.0  ;;  %v5987_v44 = vpop.f32.mrf.mxu0 }
 0x303   :  { %1797 = vadd.xlane.f32.xlu0 %v1796_v20  ;;  %7204 = vst [vmem:[#allocation20_spill] sm:$0xff] %v5975_v54  ;;  %v6983_v62 = vmax.f32 %v5975_v54, 0.0 }
 0x305   :  { %v1802_v30 = vadd.f32 %v6982_v18, %v6983_v62  ;;  %v7205_v18 = vmax.f32 %v5579_v40, 0.0 }
 0x306   :  { %v3798_v61 = vpop.eup %3797 }
 0x307   :  { %1800 = vadd.xlane.f32.xlu1 %v1799_v19  ;;  %v5989_v56 = vpop.f32.mrf.mxu3  ;;  %v2187_v8 = vmul.f32 %v3798_v61, %v2118_v36  ;;  %v2089_v19 = vmul.f32 %v2009_v29, %v4127_v33  ;;  %vm2193_vm13 = vweird.f32 %v3798_v61 }
 0x308   :  { %v5991_v20 = vpop.f32.mrf.mxu1  ;;  %v5993_v55 = vpop.f32.mrf.mxu2  ;;  %vm2194_vm15 = vmor %vm2192_vm14, %vm2193_vm13 }
 0x309   :  { %v2188_v7 = vmul.f32 %v3798_v61, %v2187_v8  ;;  %v6007_v32 = vadd.f32 1e-05, %v2089_v19 }
 0x30a   :  { %v5996_v39 = vpop.f32.mrf.mxu0 }
 0x30b   :  { %v2189_v40 = vmul.f32 0.5, %v2188_v7  ;;  %3799 = vrsqrt.f32 %v6007_v32  ;;  %v7209_v7 = vmax.f32 %v5606_v41, 0.0  ;;  %vm2222_vm3 = vweird.f32 %v6007_v32 }
 0x30d   :  { %v2190_v11 = vsub.f32 1.5, %v2189_v40 }
 0x30f   :  { %1803 = vadd.xlane.f32.xlu1 %v1802_v30  ;;  %v6009_v37 = vpop.f32.mrf.mxu3  ;;  %v2191_v41 = vmul.f32 %v3798_v61, %v2190_v11 }
 0x311   :  { %v2195_v11 = vsel %vm2194_vm15, %v3798_v61, %v2191_v41 }
 0x312   :  { %v1386_v25 = vpop.f32.mrf.mxu0  ;;  %v2474_v38 = vmul.f32 %v2195_v11, %v5447_v15 }
 0x326   :  { %v2012_v21 = vpop.xlane.xlu1 %2011 }
 0x327   :  { %v2090_v19 = vmul.f32 %v2012_v21, %v4127_v33  ;;  %v6032_v21 = vpop.eup %3799 }
 0x328   :  { %vm2223_vm4 = vweird.f32 %v6032_v21 }
 0x329   :  { %vm2224_vm5 = vmor %vm2222_vm3, %vm2223_vm4 }
 0x32e   :  { %v1783_v16 = vpop.xlane.xlu1 %1782 }
 0x32f   :  { %v1843_v30 = vmul.f32 %v1783_v16, %v4127_v33 }
 0x331   :  { %v6001_v62 = vsub.f32 %v7205_v18, %v1843_v30  ;;  %v6005_v58 = vsub.f32 %v7207_v22, %v1843_v30  ;;  %v6016_v18 = vpop.f32.mrf.mxu1  ;;  %v1564_v22 = vpop.f32.mrf.mxu2 }
 0x332   :  { %v2003_v60 = vpop.xlane.xlu0 %2002  ;;  %v1565_v0 = vadd.f32 %v1564_v22, %v4787_v23 }
 0x333   :  { %7206 = vst [vmem:[#allocation34_spill] sm:$0xff] %v6001_v62  ;;  %v2087_v29 = vmul.f32 %v2003_v60, %v4127_v33  ;;  %v1956_v13 = vmul.f32 %v6001_v62, %v6001_v62  ;;  %v1957_v8 = vmul.f32 %v6005_v58, %v6005_v58 }
 0x334   :  { %7208 = vst [vmem:[#allocation32_spill] sm:$0xff] %v6005_v58 }
 0x335   :  { %v2119_v16 = vadd.f32 1e-05, %v2087_v29  ;;  %v2037_v28 = vadd.f32 %v1957_v8, %v1956_v13  ;;  %v7211_v13 = vmax.f32 %v5619_v53, 0.0  ;;  %v6030_v8 = vadd.f32 1e-05, %v2090_v19 }
 0x336   :  { %v1786_v30 = vpop.xlane.xlu1 %1785  ;;  %v2217_v19 = vmul.f32 %v6032_v21, %v6007_v32 }
 0x337   :  { %3801 = vrsqrt.f32 %v2119_v16  ;;  %2038 = vadd.xlane.f32.xlu0 %v2037_v28  ;;  %v1844_v60 = vmul.f32 %v1786_v30, %v4127_v33  ;;  %v1387_v28 = vadd.f32 %v1386_v25, %v4765_v9  ;;  %vm2202_vm1 = vweird.f32 %v2119_v16 }
 0x338   :  { %3803 = vrsqrt.f32 %v6030_v8  ;;  %v2218_v36 = vmul.f32 %v6032_v21, %v2217_v19  ;;  %vm2232_vm10 = vweird.f32 %v6030_v8 }
 0x339   :  { %v6024_v4 = vsub.f32 %v7209_v7, %v1844_v60  ;;  %v6028_v29 = vsub.f32 %v7211_v13, %v1844_v60  ;;  %v1653_v7 = vpop.f32.mrf.mxu3  ;;  %v1475_v13 = vpop.f32.mrf.mxu1 }
 0x33a   :  { %v6039_v58 = vadd.f32 %v1653_v7, %v1565_v0  ;;  %v6044_v25 = vadd.f32 %v1475_v13, %v1387_v28 }
 0x33b   :  { %7210 = vst [vmem:[#allocation35_spill] sm:$0xff] %v6024_v4  ;;  %v1958_v40 = vmul.f32 %v6024_v4, %v6024_v4  ;;  %v1959_v22 = vmul.f32 %v6028_v29, %v6028_v29 }
 0x33c   :  { %7212 = vst [vmem:[#allocation17_spill] sm:$0xff] %v6028_v29  ;;  %v7002_v0 = vmax.f32 %v6039_v58, 0.0  ;;  %v7003_v42 = vmax.f32 %v6044_v25, 0.0 }
 0x33d   :  { %v3802_v30 = vpop.eup %3801  ;;  %7213 = vst [vmem:[#allocation36_spill] sm:$0xff] %v6039_v58  ;;  %v2040_v60 = vadd.f32 %v1959_v22, %v1958_v40 }
 0x33e   :  { %v2197_v53 = vmul.f32 %v3802_v30, %v2119_v16  ;;  %7214 = vst [vmem:[#allocation18_spill] sm:$0xff] %v6044_v25  ;;  %vm2203_vm0 = vweird.f32 %v3802_v30  ;;  %v1811_v15 = vadd.f32 %v7002_v0, %v7003_v42  ;;  %v2540_v16 = vmul.f32 %v5814_v2, %v2474_v38 }
 0x33f   :  { %2041 = vadd.xlane.f32.xlu0 %v2040_v60  ;;  %v7215_v60 = vld [vmem:[#allocation37_spill] sm:$0xff]  ;;  %vm2204_vm2 = vmor %vm2202_vm1, %vm2203_vm0 }
 0x340   :  { %v2198_v4 = vmul.f32 %v3802_v30, %v2197_v53  ;;  %v2006_v29 = vpop.xlane.xlu0 %2005  ;;  %v6053_v53 = vpop.eup %3803  ;;  %v2475_v61 = vmul.f32 %v2195_v11, %v7215_v60  ;;  %v7217_v60 = vld [vmem:[#allocation26_spill] sm:$0xff] }
 0x341   :  { %v2088_v62 = vmul.f32 %v2006_v29, %v4127_v33  ;;  %v1389_v22 = vpop.f32.mrf.mxu0  ;;  %v2227_v13 = vmul.f32 %v6053_v53, %v6030_v8  ;;  %v1478_v58 = vpop.f32.mrf.mxu1  ;;  %vm2233_vm9 = vweird.f32 %v6053_v53 }
 0x342   :  { %v2199_v7 = vmul.f32 0.5, %v2198_v4  ;;  %v1390_v4 = vadd.f32 %v1389_v22, %v4765_v9  ;;  %v7216_v22 = vld [vmem:[#allocation16_spill] sm:$0xff]  ;;  %v2541_v38 = vmul.f32 %v5858_v63, %v2475_v61  ;;  %v2606_v61 = vadd.f32 %v5846_v27, %v2540_v16  ;;  %vm2234_vm11 = vmor %vm2232_vm10, %vm2233_vm9 }
 0x343   :  { %v6049_v40 = vadd.f32 1e-05, %v2088_v62  ;;  %v2219_v62 = vmul.f32 0.5, %v2218_v36 }
 0x344   :  { %v2200_v28 = vsub.f32 1.5, %v2199_v7  ;;  %v2015_v41 = vpop.xlane.xlu2 %2014  ;;  %v6073_v42 = vadd.f32 %v1478_v58, %v1390_v4  ;;  %v2228_v58 = vmul.f32 %v6053_v53, %v2227_v13 }
 0x345   :  { %3805 = vrsqrt.f32 %v6049_v40  ;;  %v2091_v19 = vmul.f32 %v2015_v41, %v4127_v33  ;;  %vm2212_vm7 = vweird.f32 %v6049_v40 }
 0x346   :  { %v2201_v29 = vmul.f32 %v3802_v30, %v2200_v28 }
 0x347   :  { %1812 = vadd.xlane.f32.xlu0 %v1811_v15  ;;  %v6069_v0 = vadd.f32 1e-05, %v2091_v19  ;;  %v2220_v15 = vsub.f32 1.5, %v2219_v62  ;;  %v7220_v19 = vmax.f32 %v5650_v12, 0.0 }
 0x348   :  { %v2205_v11 = vsel %vm2204_vm2, %v3802_v30, %v2201_v29  ;;  %v1777_v7 = vpop.xlane.xlu0 %1776  ;;  %v1567_v41 = vpop.f32.mrf.mxu2 }
 0x349   :  { %v2476_v28 = vmul.f32 %v2205_v11, %v7216_v22  ;;  %v2477_v25 = vmul.f32 %v2205_v11, %v7217_v60  ;;  %v1841_v36 = vmul.f32 %v1777_v7, %v4127_v33  ;;  %v1568_v30 = vadd.f32 %v1567_v41, %v4787_v23  ;;  %v1656_v60 = vpop.f32.mrf.mxu3  ;;  %v6099_v6 = vpop.f32.mrf.mxu0 }
 0x34a   :  { %3807 = vrsqrt.f32 %v6069_v0  ;;  %v7218_v11 = vmax.f32 %v5623_v26, 0.0  ;;  %v2221_v16 = vmul.f32 %v6032_v21, %v2220_v15  ;;  %vm2242_vm13 = vweird.f32 %v6069_v0 }
 0x34b   :  { %v3806_v29 = vpop.eup %3805  ;;  %v6084_v7 = vsub.f32 %v7220_v19, %v1841_v36  ;;  %v6088_v41 = vadd.f32 %v1656_v60, %v1568_v30  ;;  %v2543_v12 = vmul.f32 %v5858_v63, %v2477_v25  ;;  %v7011_v19 = vmax.f32 %v6073_v42, 0.0 }
 0x34c   :  { %v6080_v22 = vsub.f32 %v7218_v11, %v1841_v36  ;;  %v2207_v4 = vmul.f32 %v3806_v29, %v6049_v40  ;;  %v2542_v11 = vmul.f32 %v5814_v2, %v2476_v28  ;;  %v2607_v30 = vadd.f32 %v5863_v14, %v2541_v38 }
 0x34d   :  { %7221 = vst [vmem:[#allocation16_spill] sm:$0xff] %v6084_v7  ;;  %v1953_v26 = vmul.f32 %v6084_v7, %v6084_v7  ;;  %v7010_v13 = vmax.f32 %v6088_v41, 0.0  ;;  %v2609_v7 = vadd.f32 %v5863_v14, %v2543_v12  ;;  %v1382_v28 = vadd.f32 %v5987_v44, %v4765_v9  ;;  %v6123_v12 = vpop.f32.mrf.mxu1 }
 0x34e   :  { %7219 = vst [vmem:[#allocation37_spill] sm:$0xff] %v6080_v22  ;;  %v1952_v62 = vmul.f32 %v6080_v22, %v6080_v22  ;;  %v2208_v36 = vmul.f32 %v3806_v29, %v2207_v4  ;;  %v2608_v22 = vadd.f32 %v5846_v27, %v2542_v11  ;;  %v2229_v25 = vmul.f32 0.5, %v2228_v58 }
 0x34f   :  { %v1814_v34 = vadd.f32 %v7010_v13, %v7011_v19  ;;  %v1560_v38 = vadd.f32 %v5985_v5, %v4787_v23  ;;  %vm2213_vm6 = vweird.f32 %v3806_v29  ;;  %v2225_v11 = vsel %vm2224_vm5, %v6032_v21, %v2221_v16 }
 0x350   :  { %v2031_v60 = vadd.f32 %v1953_v26, %v1952_v62  ;;  %v2209_v4 = vmul.f32 0.5, %v2208_v36  ;;  %v1780_v54 = vpop.xlane.xlu0 %1779  ;;  %v6111_v52 = vpop.eup %3807  ;;  %v2666_v62 = vpack.c.bf16 %v2608_v22, %v2606_v61  ;;  %v2667_v26 = vpack.c.bf16 %v2609_v7, %v2607_v30  ;;  %v7223_v22 = vld [vmem:[#allocation39_spill] sm:$0xff]  ;;  %vm2214_vm8 = vmor %vm2212_vm7, %vm2213_vm6 }
 0x351   :  { %v1842_v15 = vmul.f32 %v1780_v54, %v4127_v33  ;;  %v2237_v58 = vmul.f32 %v6111_v52, %v6069_v0  ;;  %1815 = vadd.xlane.f32.xlu0 %v1814_v34  ;;  %v7222_v54 = vmax.f32 %v5654_v51, 0.0  ;;  %v7224_v7 = vmax.f32 %v7223_v22, 0.0  ;;  %v6135_v30 = vpop.f32.mrf.mxu2 }
 0x352   :  { %2032 = vadd.xlane.f32.xlu2 %v2031_v60  ;;  %v2210_v44 = vsub.f32 1.5, %v2209_v4  ;;  %2906 = vmatmul.bf16.gmra.mxu0 %v2666_v62  ;;  %v2230_v32 = vsub.f32 1.5, %v2229_v25  ;;  %v6138_v51 = vadd.f32 %v5991_v20, %v1382_v28  ;;  %v6141_v21 = vadd.f32 %v5989_v56, %v1560_v38  ;;  %v7225_v25 = vld [vmem:[#allocation23_spill] sm:$0xff]  ;;  %v7228_v38 = vld [vmem:[#allocation38_spill] sm:$0xff] }
 0x353   :  { %v6127_v5 = vsub.f32 %v7222_v54, %v1842_v15  ;;  %v6131_v61 = vsub.f32 %v7224_v7, %v1842_v15  ;;  %2995 = vmatmul.bf16.gmra.mxu1 %v2667_v26  ;;  %v2238_v34 = vmul.f32 %v6111_v52, %v2237_v58  ;;  %3084 = vmatmul.bf16.gmra.mxu2 %v2666_v62  ;;  %v7226_v20 = vld [vmem:[#allocation19_spill] sm:$0xff]  ;;  %vm2243_vm12 = vweird.f32 %v6111_v52 }
 0x354   :  { %v2211_v36 = vmul.f32 %v3806_v29, %v2210_v44  ;;  %3173 = vmatmul.bf16.gmra.mxu3 %v2667_v26  ;;  %v2018_v16 = vpop.xlane.xlu2 %2017  ;;  %v2480_v4 = vmul.f32 %v2225_v11, %v7225_v25  ;;  %v2481_v28 = vmul.f32 %v2225_v11, %v7226_v20  ;;  %v7227_v44 = vld [vmem:[#allocation27_spill] sm:$0xff]  ;;  %v2231_v22 = vmul.f32 %v6053_v53, %v2230_v32  ;;  %vm2244_vm14 = vmor %vm2242_vm13, %vm2243_vm12 }
 0x355   :  { %v1954_v60 = vmul.f32 %v6127_v5, %v6127_v5  ;;  %v1955_v40 = vmul.f32 %v6131_v61, %v6131_v61  ;;  %v2239_v62 = vmul.f32 0.5, %v2238_v34  ;;  %v2092_v26 = vmul.f32 %v2018_v16, %v4127_v33 }
 0x356   :  { %v2215_v15 = vsel %vm2214_vm8, %v3806_v29, %v2211_v36  ;;  %v7012_v29 = vmax.f32 %v6141_v21, 0.0  ;;  %v6160_v36 = vpop.f32.mrf.mxu3  ;;  %v1563_v16 = vadd.f32 %v5993_v55, %v4787_v23  ;;  %v2546_v32 = vmul.f32 %v5814_v2, %v2480_v4 }
 0x357   :  { %v2478_v56 = vmul.f32 %v2215_v15, %v7227_v44  ;;  %v2479_v58 = vmul.f32 %v2215_v15, %v7228_v38  ;;  %v2034_v54 = vadd.f32 %v1955_v40, %v1954_v60  ;;  %v2240_v7 = vsub.f32 1.5, %v2239_v62 }
 0x358   :  { %v6155_v13 = vadd.f32 1e-05, %v2092_v26  ;;  %v6157_v19 = vpop.f32.mrf.mxu0  ;;  %v7013_v60 = vmax.f32 %v6138_v51, 0.0  ;;  %v2547_v40 = vmul.f32 %v5858_v63, %v2481_v28  ;;  %v1385_v25 = vadd.f32 %v5996_v39, %v4765_v9 }
 0x359   :  { %v2544_v11 = vmul.f32 %v5814_v2, %v2478_v56  ;;  %v2545_v34 = vmul.f32 %v5858_v63, %v2479_v58  ;;  %v2235_v15 = vsel %vm2234_vm11, %v6053_v53, %v2231_v22  ;;  %v2241_v62 = vmul.f32 %v6111_v52, %v2240_v7  ;;  %v6176_v8 = vpop.f32.mrf.mxu1  ;;  %v7229_v58 = vld [vmem:[#allocation40_spill] sm:$0xff]  ;;  %v7230_v22 = vld [vmem:[#allocation15_spill] sm:$0xff] }
 0x35a   :  { %2035 = vadd.xlane.f32.xlu2 %v2034_v54  ;;  %3809 = vrsqrt.f32 %v6155_v13  ;;  %v1805_v20 = vadd.f32 %v7012_v29, %v7013_v60  ;;  %v6186_v53 = vadd.f32 %v6009_v37, %v1563_v16  ;;  %v2612_v38 = vadd.f32 %v5846_v27, %v2546_v32 }
 0x35b   :  { %v2021_v55 = vpop.xlane.xlu0 %2020  ;;  %v2610_v28 = vadd.f32 %v5846_v27, %v2544_v11  ;;  %v2611_v39 = vadd.f32 %v5863_v14, %v2545_v34  ;;  %v2482_v54 = vmul.f32 %v2235_v15, %v7229_v58  ;;  %v2483_v7 = vmul.f32 %v2235_v15, %v7230_v22 }
 0x35c   :  { %v1789_v26 = vpop.xlane.xlu2 %1788  ;;  %v2093_v4 = vmul.f32 %v2021_v55, %v4127_v33  ;;  %v2613_v34 = vadd.f32 %v5863_v14, %v2547_v40  ;;  %v6201_v0 = vadd.f32 %v6016_v18, %v1385_v25  ;;  %v2245_v16 = vsel %vm2244_vm14, %v6111_v52, %v2241_v62 }
 0x35d   :  { %v1845_v44 = vmul.f32 %v1789_v26, %v4127_v33  ;;  %v7231_v32 = vmax.f32 %v5791_v50, 0.0  ;;  %v7232_v15 = vmax.f32 %v5768_v43, 0.0  ;;  %v2668_v40 = vpack.c.bf16 %v2612_v38, %v2610_v28  ;;  %v7233_v28 = vld [vmem:[#allocation28_spill] sm:$0xff] }
 0x35e   :  { %v1572_v56 = vpop.f32.mrf.mxu2  ;;  %v6195_v11 = vadd.f32 1e-05, %v2093_v4  ;;  %v2669_v58 = vpack.c.bf16 %v2613_v34, %v2611_v39  ;;  %v7014_v43 = vmax.f32 %v6186_v53, 0.0  ;;  %v2484_v39 = vmul.f32 %v2245_v16, %v7233_v28 }
 0x35f   :  { %v6206_v55 = vsub.f32 %v7231_v32, %v1845_v44  ;;  %v6210_v26 = vsub.f32 %v7232_v15, %v1845_v44  ;;  %v1661_v62 = vpop.f32.mrf.mxu3  ;;  %v2548_v44 = vmul.f32 %v5814_v2, %v2482_v54  ;;  %v1392_v38 = vadd.f32 %v6099_v6, %v4765_v9  ;;  %v7234_v32 = vld [vmem:[#allocation21_spill] sm:$0xff] }
 0x360   :  { %v6198_v37 = vpop.eup %3809  ;;  %3811 = vrsqrt.f32 %v6195_v11  ;;  %v6215_v18 = vpop.f32.mrf.mxu0  ;;  %v7015_v34 = vmax.f32 %v6201_v0, 0.0  ;;  %v2485_v15 = vmul.f32 %v2245_v16, %v7234_v32  ;;  %v1570_v29 = vadd.f32 %v6135_v30, %v4787_v23 }
 0x361   :  { %v2247_v4 = vmul.f32 %v6198_v37, %v6155_v13  ;;  %v1960_v52 = vmul.f32 %v6206_v55, %v6206_v55  ;;  %v1961_v50 = vmul.f32 %v6210_v26, %v6210_v26  ;;  %v6232_v60 = vpop.f32.mrf.mxu1  ;;  %vm2252_vm15 = vweird.f32 %v6155_v13 }
 0x362   :  { %1806 = vadd.xlane.f32.xlu2 %v1805_v20  ;;  %2911 = vmatmul.bf16.gmra.mxu0 %v2668_v40  ;;  %v2549_v20 = vmul.f32 %v5858_v63, %v2483_v7  ;;  %v1808_v6 = vadd.f32 %v7014_v43, %v7015_v34  ;;  %v2614_v7 = vadd.f32 %v5846_v27, %v2548_v44  ;;  %vm2253_vm0 = vweird.f32 %v6198_v37 }
 0x363   :  { %v2248_v25 = vmul.f32 %v6198_v37, %v2247_v4  ;;  %3000 = vmatmul.bf16.gmra.mxu1 %v2669_v58  ;;  %v2043_v22 = vadd.f32 %v1961_v50, %v1960_v52  ;;  %3089 = vmatmul.bf16.gmra.mxu2 %v2668_v40  ;;  %v6248_v28 = vadd.f32 %v6160_v36, %v1570_v29  ;;  %vm2254_vm2 = vmor %vm2252_vm15, %vm2253_vm0  ;;  %vm2262_vm3 = vweird.f32 %v6195_v11 }
 0x364   :  { %3178 = vmatmul.bf16.gmra.mxu3 %v2669_v58  ;;  %v2615_v40 = vadd.f32 %v5863_v14, %v2549_v20  ;;  %v6241_v58 = vadd.f32 %v6123_v12, %v1392_v38  ;;  %v2551_v12 = vmul.f32 %v5858_v63, %v2485_v15  ;;  %v1573_v29 = vadd.f32 %v1572_v56, %v4787_v23 }
 0x365   :  { %v2249_v4 = vmul.f32 0.5, %v2248_v25  ;;  %2044 = vadd.xlane.f32.xlu1 %v2043_v22  ;;  %v2550_v25 = vmul.f32 %v5814_v2, %v2484_v39  ;;  %v1395_v22 = vadd.f32 %v6157_v19, %v4765_v9  ;;  %v7235_v19 = vmax.f32 %v5835_v57, 0.0 }
 0x366   :  { %v3812_v54 = vpop.eup %3811  ;;  %v1792_v30 = vpop.xlane.xlu2 %1791  ;;  %v7236_v39 = vmax.f32 %v5849_v24, 0.0 }
 0x367   :  { %v2250_v16 = vsub.f32 1.5, %v2249_v4  ;;  %v2257_v52 = vmul.f32 %v3812_v54, %v6195_v11  ;;  %v6244_v50 = vpop.f32.mrf.mxu2  ;;  %v1846_v44 = vmul.f32 %v1792_v30, %v4127_v33  ;;  %v2024_v20 = vpop.xlane.xlu0 %2023  ;;  %v6257_v4 = vperm.slane %v5811_v10, 5 }
 0x368   :  { %v2094_v32 = vmul.f32 %v2024_v20, %v4127_v33  ;;  %v2616_v10 = vadd.f32 %v5846_v27, %v2550_v25  ;;  %vm2263_vm1 = vweird.f32 %v3812_v54  ;;  %v6273_v43 = vpop.f32.mrf.mxu3  ;;  %v6299_v13 = vadd.f32 %v6176_v8, %v1395_v22 }
 0x369   :  { %v2258_v38 = vmul.f32 %v3812_v54, %v2257_v52  ;;  %v6263_v36 = vsub.f32 %v7235_v19, %v1846_v44  ;;  %v2251_v15 = vmul.f32 %v6198_v37, %v2250_v16  ;;  %vm2264_vm4 = vmor %vm2262_vm3, %vm2263_vm1  ;;  %v7238_v8 = vmax.f32 %v6248_v28, 0.0 }
 0x36a   :  { %1809 = vadd.xlane.f32.xlu2 %v1808_v6  ;;  %v6267_v6 = vsub.f32 %v7236_v39, %v1846_v44  ;;  %v6270_v30 = vadd.f32 1e-05, %v2094_v32  ;;  %v2897_v20 = vpop.f32.mrf.mxu0  ;;  %v2027_v56 = vpop.xlane.xlu1 %2026  ;;  %v2617_v44 = vadd.f32 %v5863_v14, %v2551_v12  ;;  %v6289_v32 = vadd.f32 %v1661_v62, %v1573_v29 }
 0x36b   :  { %v2259_v52 = vmul.f32 0.5, %v2258_v38  ;;  %v1962_v57 = vmul.f32 %v6263_v36, %v6263_v36  ;;  %v2095_v16 = vmul.f32 %v2027_v56, %v4127_v33  ;;  %v2898_v38 = vadd.f32 %v2897_v20, %v6257_v4 }
 0x36c   :  { %7237 = vst [vmem:[#allocation26_spill] sm:$0xff] %v6267_v6  ;;  %v1963_v24 = vmul.f32 %v6267_v6, %v6267_v6  ;;  %3813 = vrsqrt.f32 %v6270_v30  ;;  %v2255_v12 = vsel %vm2254_vm2, %v6198_v37, %v2251_v15  ;;  %v6295_v56 = vperm.slane %v5855_v45, 5 }
 0x36d   :  { %v2260_v19 = vsub.f32 1.5, %v2259_v52  ;;  %v6292_v34 = vadd.f32 1e-05, %v2095_v16  ;;  %v7016_v20 = vmax.f32 %v6241_v58, 0.0  ;;  %v2670_v62 = vpack.c.bf16 %v2616_v10, %v2614_v7  ;;  %v3855_v10 = vld [vmem:[#allocation2] sm:$0xff] }
 0x36e   :  { %v2046_v39 = vadd.f32 %v1963_v24, %v1962_v57  ;;  %v2671_v57 = vpack.c.bf16 %v2617_v44, %v2615_v40  ;;  %v2486_v45 = vmul.f32 %v2255_v12, %v5760_v47  ;;  %v7239_v47 = vld [vmem:[#allocation29_spill] sm:$0xff]  ;;  %vm2272_vm5 = vweird.f32 %v6270_v30 }
 0x36f   :  { %v2261_v52 = vmul.f32 %v3812_v54, %v2260_v19  ;;  %v2986_v25 = vpop.f32.mrf.mxu1  ;;  %v1795_v11 = vpop.xlane.xlu0 %1794  ;;  %3815 = vrsqrt.f32 %v6292_v34  ;;  %v1817_v22 = vadd.f32 %v7238_v8, %v7016_v20  ;;  %vm2282_vm6 = vweird.f32 %v6292_v34 }
 0x370   :  { %2047 = vadd.xlane.f32.xlu1 %v2046_v39  ;;  %v2987_v37 = vadd.f32 %v2986_v25, %v2898_v38  ;;  %v3075_v15 = vpop.f32.mrf.mxu2  ;;  %v1847_v24 = vmul.f32 %v1795_v11, %v4127_v33  ;;  %v7240_v39 = vmax.f32 %v5913_v1, 0.0 }
 0x371   :  { %v2265_v29 = vsel %vm2264_vm4, %v3812_v54, %v2261_v52  ;;  %v7018_v54 = vmax.f32 %v6289_v32, 0.0  ;;  %v3076_v40 = vadd.f32 %v3075_v15, %v6295_v56 }
 0x372   :  { %2916 = vmatmul.bf16.gmra.mxu0 %v2670_v62  ;;  %v6309_v19 = vpop.eup %3813  ;;  %v2488_v7 = vmul.f32 %v2265_v29, %v5798_v31  ;;  %v3244_v16 = vadd.f32 %v3855_v10, %v2987_v37  ;;  %v2899_v44 = vpop.f32.mrf.mxu0  ;;  %v2489_v38 = vmul.f32 %v2265_v29, %v7239_v47  ;;  %v6319_v52 = vsub.f32 %v7240_v39, %v1847_v24  ;;  %v7242_v37 = vld [vmem:[#allocation22_spill] sm:$0xff] }
 0x373   :  { %3005 = vmatmul.bf16.gmra.mxu1 %v2671_v57  ;;  %3094 = vmatmul.bf16.gmra.mxu2 %v2670_v62  ;;  %v2267_v25 = vmul.f32 %v6309_v19, %v6270_v30  ;;  %v7241_v31 = vmax.f32 %v5905_v35, 0.0  ;;  %v6325_v8 = vpop.xlane.xlu1 %2029  ;;  %v2487_v15 = vmul.f32 %v2255_v12, %v7242_v37  ;;  %v7021_v62 = vmax.f32 %v6299_v13, 0.0 }
 0x374   :  { %3183 = vmatmul.bf16.gmra.mxu3 %v2671_v57  ;;  %v1575_v29 = vadd.f32 %v6244_v50, %v4787_v23  ;;  %3308 = vst [vmem:[#allocation10] sm:$0xff] %v3244_v16  ;;  %v2900_v10 = vadd.f32 %v2899_v44, %v6257_v4  ;;  %v1964_v35 = vmul.f32 %v6319_v52, %v6319_v52  ;;  %vm2273_vm8 = vweird.f32 %v6309_v19 }
 0x375   :  { %v6323_v11 = vsub.f32 %v7241_v31, %v1847_v24  ;;  %v2268_v1 = vmul.f32 %v6309_v19, %v2267_v25  ;;  %v3164_v47 = vpop.f32.mrf.mxu3  ;;  %v2552_v57 = vmul.f32 %v5814_v2, %v2486_v45  ;;  %v6338_v12 = vpop.eup %3815  ;;  %v1397_v39 = vadd.f32 %v6215_v18, %v4765_v9  ;;  %v3856_v18 = vld [vmem:[#allocation2 + $0x8] sm:$0xff]  ;;  %vm2274_vm10 = vmor %vm2272_vm5, %vm2273_vm8 }
 0x376   :  { %v3165_v23 = vadd.f32 %v3164_v47, %v3076_v40  ;;  %v1820_v50 = vadd.f32 %v7018_v54, %v7021_v62  ;;  %v2554_v16 = vmul.f32 %v5814_v2, %v2488_v7  ;;  %v2277_v25 = vmul.f32 %v6338_v12, %v6292_v34 }
 0x377   :  { %v1965_v24 = vmul.f32 %v6323_v11, %v6323_v11  ;;  %v2269_v44 = vmul.f32 0.5, %v2268_v1  ;;  %v2988_v31 = vpop.f32.mrf.mxu1  ;;  %v1798_v37 = vpop.xlane.xlu0 %1797  ;;  %v2555_v20 = vmul.f32 %v5858_v63, %v2489_v38  ;;  %v6351_v9 = vadd.f32 %v6273_v43, %v1575_v29  ;;  %v3857_v38 = vld [vmem:[#allocation2 + $0x10] sm:$0xff] }
 0x378   :  { %1818 = vadd.xlane.f32.xlu1 %v1817_v22  ;;  %v3245_v40 = vadd.f32 %v3856_v18, %v3165_v23  ;;  %v2989_v47 = vadd.f32 %v2988_v31, %v2900_v10  ;;  %v3077_v6 = vpop.f32.mrf.mxu2  ;;  %v2553_v54 = vmul.f32 %v5858_v63, %v2487_v15  ;;  %v2278_v7 = vmul.f32 %v6338_v12, %v2277_v25 }
 0x379   :  { %v2049_v45 = vadd.f32 %v1965_v24, %v1964_v35  ;;  %v1848_v1 = vmul.f32 %v1798_v37, %v4127_v33  ;;  %v2618_v22 = vadd.f32 %v5846_v27, %v2552_v57  ;;  %v2270_v35 = vsub.f32 1.5, %v2269_v44 }
 0x37a   :  { %3309 = vst [vmem:[#allocation10 + $0x8] sm:$0xff] %v3245_v40  ;;  %v3246_v43 = vadd.f32 %v3857_v38, %v2989_v47  ;;  %v3078_v29 = vadd.f32 %v3077_v6, %v6295_v56  ;;  %v2902_v24 = vpop.f32.mrf.mxu0  ;;  %v2620_v10 = vadd.f32 %v5846_v27, %v2554_v16  ;;  %v2279_v23 = vmul.f32 0.5, %v2278_v7 }
 0x37b   :  { %2050 = vadd.xlane.f32.xlu2 %v2049_v45  ;;  %v7243_v15 = vmax.f32 %v5951_v3, 0.0  ;;  %v7244_v25 = vmax.f32 %v5939_v48, 0.0  ;;  %v1801_v45 = vpop.xlane.xlu1 %1800  ;;  %v2621_v57 = vadd.f32 %v5863_v14, %v2555_v20  ;;  %v2903_v44 = vadd.f32 %v2902_v24, %v6257_v4 }
 0x37c   :  { %3310 = vst [vmem:[#allocation10 + $0x10] sm:$0xff] %v3246_v43  ;;  %v1849_v6 = vmul.f32 %v1801_v45, %v4127_v33  ;;  %v2619_v16 = vadd.f32 %v5863_v14, %v2553_v54  ;;  %v2280_v18 = vsub.f32 1.5, %v2279_v23  ;;  %vm2283_vm7 = vweird.f32 %v6338_v12 }
 0x37d   :  { %v6362_v31 = vsub.f32 %v7243_v15, %v1848_v1  ;;  %v6366_v37 = vsub.f32 %v7244_v25, %v1848_v1  ;;  %v3166_v3 = vpop.f32.mrf.mxu3  ;;  %v2271_v20 = vmul.f32 %v6309_v19, %v2270_v35  ;;  %v7245_v7 = vmax.f32 %v5959_v59, 0.0  ;;  %vm2284_vm9 = vmor %vm2282_vm6, %vm2283_vm7  ;;  %v3858_v35 = vld [vmem:[#allocation2 + $0x18] sm:$0xff] }
 0x37e   :  { %v3167_v47 = vadd.f32 %v3166_v3, %v3078_v29  ;;  %v2281_v54 = vmul.f32 %v6338_v12, %v2280_v18  ;;  %v7246_v38 = vmax.f32 %v5956_v49, 0.0  ;;  %v2672_v23 = vpack.c.bf16 %v2620_v10, %v2618_v22  ;;  %v3859_v22 = vld [vmem:[#allocation2 + $0x20] sm:$0xff] }
 0x37f   :  { %v1966_v48 = vmul.f32 %v6362_v31, %v6362_v31  ;;  %v1967_v40 = vmul.f32 %v6366_v37, %v6366_v37  ;;  %v6382_v1 = vsub.f32 %v7245_v7, %v1849_v6  ;;  %v2991_v24 = vpop.f32.mrf.mxu1  ;;  %v2673_v15 = vpack.c.bf16 %v2621_v57, %v2619_v16  ;;  %v7248_v7 = vld [vmem:[#allocation31_spill] sm:$0xff] }
 0x380   :  { %v6387_v43 = vsub.f32 %v7246_v38, %v1849_v6  ;;  %1821 = vadd.xlane.f32.xlu1 %v1820_v50  ;;  %v3247_v25 = vadd.f32 %v3858_v35, %v3167_v47  ;;  %v2992_v29 = vadd.f32 %v2991_v24, %v2903_v44  ;;  %v3080_v59 = vpop.f32.mrf.mxu2  ;;  %v6394_v18 = vadd.f32 %v6232_v60, %v1397_v39  ;;  %v7249_v38 = vld [vmem:[#allocation20_spill] sm:$0xff] }
 0x381   :  { %v2052_v45 = vadd.f32 %v1967_v40, %v1966_v48  ;;  %v1968_v3 = vmul.f32 %v6382_v1, %v6382_v1  ;;  %v2285_v49 = vsel %vm2284_vm9, %v6338_v12, %v2281_v54  ;;  %v2275_v50 = vsel %vm2274_vm10, %v6309_v19, %v2271_v20  ;;  %v7247_v40 = vld [vmem:[#allocation33_spill] sm:$0xff] }
 0x382   :  { %v1969_v34 = vmul.f32 %v6387_v43, %v6387_v43  ;;  %2921 = vmatmul.bf16.gmra.mxu0 %v2672_v23  ;;  %3311 = vst [vmem:[#allocation10 + $0x18] sm:$0xff] %v3247_v25  ;;  %v3248_v10 = vadd.f32 %v3859_v22, %v2992_v29  ;;  %v3081_v60 = vadd.f32 %v3080_v59, %v6295_v56  ;;  %v2904_v39 = vpop.f32.mrf.mxu0  ;;  %v7019_v57 = vmax.f32 %v6351_v9, 0.0 }
 0x383   :  { %2053 = vadd.xlane.f32.xlu2 %v2052_v45  ;;  %3010 = vmatmul.bf16.gmra.mxu1 %v2673_v15  ;;  %v2492_v30 = vmul.f32 %v2285_v49, %v5894_v46  ;;  %v2493_v12 = vmul.f32 %v2285_v49, %v5898_v17  ;;  %v1804_v6 = vpop.xlane.xlu1 %1803  ;;  %v2905_v16 = vadd.f32 %v2904_v39, %v6257_v4  ;;  %v7020_v48 = vmax.f32 %v6394_v18, 0.0  ;;  %v3861_v39 = vld [vmem:[#allocation2 + $0x30] sm:$0xff] }
 0x384   :  { %v2055_v44 = vadd.f32 %v1969_v34, %v1968_v3  ;;  %3099 = vmatmul.bf16.gmra.mxu2 %v2672_v23  ;;  %3188 = vmatmul.bf16.gmra.mxu3 %v2673_v15  ;;  %3312 = vst [vmem:[#allocation10 + $0x20] sm:$0xff] %v3248_v10  ;;  %v1850_v19 = vmul.f32 %v1804_v6, %v4127_v33  ;;  %v7250_v17 = vmax.f32 %v7249_v38, 0.0  ;;  %v7252_v23 = vld [vmem:[#allocation30_spill] sm:$0xff]  ;;  %v3862_v38 = vld [vmem:[#allocation2 + $0x38] sm:$0xff] }
 0x385   :  { %v2490_v20 = vmul.f32 %v2275_v50, %v7247_v40  ;;  %v3169_v47 = vpop.f32.mrf.mxu3  ;;  %v2491_v54 = vmul.f32 %v2275_v50, %v7248_v7  ;;  %v7253_v15 = vmax.f32 %v7252_v23, 0.0  ;;  %v1823_v29 = vadd.f32 %v7019_v57, %v7020_v48  ;;  %v3860_v3 = vld [vmem:[#allocation2 + $0x28] sm:$0xff]  ;;  %v7268_v48 = vld [vmem:[#allocation37_spill] sm:$0xff] }
 0x386   :  { %2056 = vadd.xlane.f32.xlu0 %v2055_v44  ;;  %v3170_v46 = vadd.f32 %v3169_v47, %v3081_v60  ;;  %v6415_v24 = vsub.f32 %v7250_v17, %v1850_v19  ;;  %v2558_v45 = vmul.f32 %v5814_v2, %v2492_v30  ;;  %v2559_v59 = vmul.f32 %v5858_v63, %v2493_v12 }
 0x387   :  { %v6419_v35 = vsub.f32 %v7253_v15, %v1850_v19  ;;  %v2993_v25 = vpop.f32.mrf.mxu1  ;;  %v2556_v60 = vmul.f32 %v5814_v2, %v2490_v20  ;;  %v2557_v12 = vmul.f32 %v5858_v63, %v2491_v54  ;;  %v2096_v54 = vmul.f32 %v6325_v8, %v4127_v33 }
 0x388   :  { %7251 = vst [vmem:[#allocation39_spill] sm:$0xff] %v6415_v24  ;;  %v3249_v49 = vadd.f32 %v3860_v3, %v3170_v46  ;;  %v2994_v34 = vadd.f32 %v2993_v25, %v2905_v16  ;;  %v3082_v50 = vpop.f32.mrf.mxu2  ;;  %v1970_v22 = vmul.f32 %v6415_v24, %v6415_v24  ;;  %v2624_v19 = vadd.f32 %v5846_v27, %v2558_v45 }
 0x389   :  { %7254 = vst [vmem:[#allocation23_spill] sm:$0xff] %v6419_v35  ;;  %v1971_v10 = vmul.f32 %v6419_v35, %v6419_v35  ;;  %v3083_v30 = vadd.f32 %v3082_v50, %v6295_v56  ;;  %v2625_v16 = vadd.f32 %v5863_v14, %v2559_v59  ;;  %v2622_v47 = vadd.f32 %v5846_v27, %v2556_v60  ;;  %v7255_v60 = vld [vmem:[#allocation18_spill] sm:$0xff] }
 0x38a   :  { %3313 = vst [vmem:[#allocation10 + $0x28] sm:$0xff] %v3249_v49  ;;  %v3250_v6 = vadd.f32 %v3861_v39, %v2994_v34  ;;  %v2623_v20 = vadd.f32 %v5863_v14, %v2557_v12  ;;  %v2128_v15 = vadd.f32 1e-05, %v2096_v54  ;;  %v7256_v39 = vmax.f32 %v7255_v60, 0.0  ;;  %v3864_v35 = vld [vmem:[#allocation2 + $0x48] sm:$0xff] }
 0x38b   :  { %1824 = vadd.xlane.f32.xlu2 %v1823_v29  ;;  %v2058_v44 = vadd.f32 %v1971_v10, %v1970_v22  ;;  %v2674_v46 = vpack.c.bf16 %v2624_v19, %v2622_v47 }
 0x38c   :  { %3314 = vst [vmem:[#allocation10 + $0x30] sm:$0xff] %v3250_v6  ;;  %v2675_v23 = vpack.c.bf16 %v2625_v16, %v2623_v20  ;;  %3817 = vrsqrt.f32 %v2128_v15  ;;  %v7258_v6 = vld [vmem:[#allocation36_spill] sm:$0xff]  ;;  %vm2292_vm12 = vweird.f32 %v2128_v15 }
 0x38d   :  { %v3171_v40 = vpop.f32.mrf.mxu3 }
 0x38e   :  { %2059 = vadd.xlane.f32.xlu0 %v2058_v44  ;;  %v3172_v7 = vadd.f32 %v3171_v40, %v3083_v30  ;;  %v7259_v30 = vmax.f32 %v7258_v6, 0.0 }
 0x390   :  { %v3251_v17 = vadd.f32 %v3862_v38, %v3172_v7 }
 0x392   :  { %2926 = vmatmul.bf16.gmra.mxu0 %v2674_v46  ;;  %3315 = vst [vmem:[#allocation10 + $0x38] sm:$0xff] %v3251_v17  ;;  %v3818_v29 = vpop.eup %3817 }
 0x393   :  { %3015 = vmatmul.bf16.gmra.mxu1 %v2675_v23  ;;  %v2287_v3 = vmul.f32 %v3818_v29, %v2128_v15  ;;  %vm2293_vm11 = vweird.f32 %v3818_v29 }
 0x394   :  { %3104 = vmatmul.bf16.gmra.mxu2 %v2674_v46  ;;  %3193 = vmatmul.bf16.gmra.mxu3 %v2675_v23  ;;  %vm2294_vm13 = vmor %vm2292_vm12, %vm2293_vm11 }
 0x395   :  { %v2288_v34 = vmul.f32 %v3818_v29, %v2287_v3  ;;  %v7261_v3 = vld [vmem:[#allocation24_spill] sm:$0xff] }
 0x397   :  { %v2289_v10 = vmul.f32 0.5, %v2288_v34 }
 0x399   :  { %v2290_v16 = vsub.f32 1.5, %v2289_v10 }
 0x39b   :  { %v2291_v38 = vmul.f32 %v3818_v29, %v2290_v16 }
 0x3aa   :  { %v2039_v25 = vpop.xlane.xlu0 %2038 }
 0x3ab   :  { %v2099_v59 = vmul.f32 %v2039_v25, %v4127_v33  ;;  %v2295_v25 = vsel %vm2294_vm13, %v3818_v29, %v2291_v38 }
 0x3ac   :  { %v2494_v34 = vmul.f32 %v2295_v25, %v7261_v3  ;;  %v3863_v3 = vld [vmem:[#allocation2 + $0x40] sm:$0xff] }
 0x3ad   :  { %v6441_v49 = vadd.f32 1e-05, %v2099_v59 }
 0x3af   :  { %3819 = vrsqrt.f32 %v6441_v49  ;;  %vm2322_vm0 = vweird.f32 %v6441_v49 }
 0x3b2   :  { %v2042_v45 = vpop.xlane.xlu0 %2041 }
 0x3b3   :  { %v2100_v40 = vmul.f32 %v2042_v45, %v4127_v33 }
 0x3b5   :  { %v6458_v7 = vpop.eup %3819  ;;  %v6463_v23 = vadd.f32 1e-05, %v2100_v40  ;;  %v2560_v40 = vmul.f32 %v5814_v2, %v2494_v34 }
 0x3b6   :  { %v2317_v17 = vmul.f32 %v6458_v7, %v6441_v49  ;;  %vm2323_vm14 = vweird.f32 %v6458_v7 }
 0x3b7   :  { %vm2324_vm4 = vmor %vm2322_vm0, %vm2323_vm14  ;;  %vm2332_vm9 = vweird.f32 %v6463_v23 }
 0x3b8   :  { %v2318_v45 = vmul.f32 %v6458_v7, %v2317_v17 }
 0x3ba   :  { %v1813_v50 = vpop.xlane.xlu0 %1812  ;;  %v2319_v60 = vmul.f32 0.5, %v2318_v45 }
 0x3bb   :  { %v1853_v22 = vmul.f32 %v1813_v50, %v4127_v33  ;;  %v7262_v50 = vld [vmem:[#allocation25_spill] sm:$0xff] }
 0x3bd   :  { %v6447_v8 = vsub.f32 %v7256_v39, %v1853_v22  ;;  %v6451_v12 = vsub.f32 %v7259_v30, %v1853_v22  ;;  %v2495_v22 = vmul.f32 %v2295_v25, %v7262_v50 }
 0x3bf   :  { %7257 = vst [vmem:[#allocation19_spill] sm:$0xff] %v6447_v8  ;;  %v1976_v44 = vmul.f32 %v6447_v8, %v6447_v8  ;;  %v1977_v19 = vmul.f32 %v6451_v12, %v6451_v12 }
 0x3c0   :  { %7260 = vst [vmem:[#allocation27_spill] sm:$0xff] %v6451_v12 }
 0x3c1   :  { %v2067_v47 = vadd.f32 %v1977_v19, %v1976_v44 }
 0x3c3   :  { %2068 = vadd.xlane.f32.xlu0 %v2067_v47  ;;  %v2561_v47 = vmul.f32 %v5858_v63, %v2495_v22 }
 0x3c4   :  { %v1816_v6 = vpop.xlane.xlu0 %1815 }
 0x3c5   :  { %v2033_v20 = vpop.xlane.xlu2 %2032  ;;  %v1854_v17 = vmul.f32 %v1816_v6, %v4127_v33  ;;  %v6486_v34 = vadd.f32 %v5863_v14, %v2561_v47 }
 0x3c6   :  { %v2097_v46 = vmul.f32 %v2033_v20, %v4127_v33  ;;  %v2320_v20 = vsub.f32 1.5, %v2319_v60 }
 0x3c8   :  { %v2129_v54 = vadd.f32 1e-05, %v2097_v46  ;;  %v6489_v22 = vmul.f32 %v6458_v7, %v2320_v20  ;;  %v7266_v20 = vmax.f32 %v6141_v21, 0.0 }
 0x3ca   :  { %3821 = vrsqrt.f32 %v2129_v54  ;;  %vm2302_vm1 = vweird.f32 %v2129_v54 }
 0x3cb   :  { %3823 = vrsqrt.f32 %v6463_v23 }
 0x3cd   :  { %v2036_v59 = vpop.xlane.xlu2 %2035 }
 0x3ce   :  { %v2098_v10 = vmul.f32 %v2036_v59, %v4127_v33 }
 0x3cf   :  { %v2907_v29 = vpop.f32.mrf.mxu0 }
 0x3d0   :  { %v3822_v39 = vpop.eup %3821  ;;  %v6470_v30 = vadd.f32 1e-05, %v2098_v10  ;;  %v2996_v19 = vpop.f32.mrf.mxu1  ;;  %v2908_v16 = vadd.f32 %v2907_v29, %v6257_v4  ;;  %v6483_v29 = vadd.f32 %v5846_v27, %v2560_v40  ;;  %v7264_v40 = vmax.f32 %v6138_v51, 0.0 }
 0x3d1   :  { %v6472_v15 = vpop.eup %3823  ;;  %v2297_v44 = vmul.f32 %v3822_v39, %v2129_v54  ;;  %vm2303_vm15 = vweird.f32 %v3822_v39  ;;  %v7267_v51 = vmax.f32 %v6088_v41, 0.0  ;;  %v7269_v41 = vld [vmem:[#allocation16_spill] sm:$0xff] }
 0x3d2   :  { %3825 = vrsqrt.f32 %v6470_v30  ;;  %v2327_v38 = vmul.f32 %v6472_v15, %v6463_v23  ;;  %v2997_v25 = vadd.f32 %v2996_v19, %v2908_v16  ;;  %v7263_v19 = vmax.f32 %v6073_v42, 0.0  ;;  %vm2304_vm2 = vmor %vm2302_vm1, %vm2303_vm15 }
 0x3d3   :  { %v2298_v46 = vmul.f32 %v3822_v39, %v2297_v44  ;;  %vm2312_vm5 = vweird.f32 %v6470_v30  ;;  %vm2333_vm7 = vweird.f32 %v6472_v15  ;;  %v7274_v23 = vmax.f32 %v6241_v58, 0.0 }
 0x3d4   :  { %v3252_v50 = vadd.f32 %v3863_v3, %v2997_v25  ;;  %v6496_v44 = vmul.f32 %v6472_v15, %v2327_v38  ;;  %v6500_v16 = vsub.f32 %v7263_v19, %v1854_v17  ;;  %vm2334_vm10 = vmor %vm2332_vm9, %vm2333_vm7 }
 0x3d5   :  { %v2299_v45 = vmul.f32 0.5, %v2298_v46  ;;  %v1807_v59 = vpop.xlane.xlu2 %1806 }
 0x3d6   :  { %v1851_v10 = vmul.f32 %v1807_v59, %v4127_v33  ;;  %3316 = vst [vmem:[#allocation10 + $0x40] sm:$0xff] %v3252_v50  ;;  %v3085_v25 = vpop.f32.mrf.mxu2  ;;  %v6516_v50 = vsub.f32 %v7267_v51, %v1854_v17 }
 0x3d7   :  { %v2300_v60 = vsub.f32 1.5, %v2299_v45  ;;  %v3174_v45 = vpop.f32.mrf.mxu3  ;;  %v3086_v42 = vadd.f32 %v3085_v25, %v6295_v56  ;;  %v2909_v3 = vpop.f32.mrf.mxu0 }
 0x3d8   :  { %v6492_v6 = vpop.eup %3825  ;;  %v6504_v47 = vsub.f32 %v7264_v40, %v1851_v10  ;;  %v6508_v46 = vsub.f32 %v7266_v20, %v1851_v10  ;;  %v2998_v19 = vpop.f32.mrf.mxu1  ;;  %v2910_v10 = vadd.f32 %v2909_v3, %v6257_v4 }
 0x3d9   :  { %v2301_v59 = vmul.f32 %v3822_v39, %v2300_v60  ;;  %v2307_v38 = vmul.f32 %v6492_v6, %v6470_v30  ;;  %v2045_v21 = vpop.xlane.xlu1 %2044  ;;  %v3175_v57 = vadd.f32 %v3174_v45, %v3086_v42  ;;  %vm2313_vm3 = vweird.f32 %v6492_v6 }
 0x3da   :  { %7265 = vst [vmem:[#allocation38_spill] sm:$0xff] %v6504_v47  ;;  %v1972_v60 = vmul.f32 %v6504_v47, %v6504_v47  ;;  %v1973_v54 = vmul.f32 %v6508_v46, %v6508_v46  ;;  %v2101_v25 = vmul.f32 %v2045_v21, %v4127_v33  ;;  %v2999_v51 = vadd.f32 %v2998_v19, %v2910_v10  ;;  %vm2314_vm6 = vmor %vm2312_vm5, %vm2313_vm3 }
 0x3db   :  { %v2305_v40 = vsel %vm2304_vm2, %v3822_v39, %v2301_v59  ;;  %v2308_v20 = vmul.f32 %v6492_v6, %v2307_v38  ;;  %v3253_v47 = vadd.f32 %v3864_v35, %v3175_v57  ;;  %v1978_v39 = vmul.f32 %v6500_v16, %v6500_v16  ;;  %v3865_v59 = vld [vmem:[#allocation2 + $0x50] sm:$0xff] }
 0x3dc   :  { %v2496_v62 = vmul.f32 %v2305_v40, %v7268_v48  ;;  %v2497_v17 = vmul.f32 %v2305_v40, %v7269_v41  ;;  %v2061_v12 = vadd.f32 %v1973_v54, %v1972_v60  ;;  %v6527_v3 = vadd.f32 1e-05, %v2101_v25 }
 0x3dd   :  { %v2309_v8 = vmul.f32 0.5, %v2308_v20  ;;  %v1810_v24 = vpop.xlane.xlu2 %1809  ;;  %v3254_v38 = vadd.f32 %v3865_v59, %v2999_v51  ;;  %3317 = vst [vmem:[#allocation10 + $0x48] sm:$0xff] %v3253_v47  ;;  %v1979_v57 = vmul.f32 %v6516_v50, %v6516_v50  ;;  %v7270_v35 = vmax.f32 %v6201_v0, 0.0 }
 0x3de   :  { %v1852_v21 = vmul.f32 %v1810_v24, %v4127_v33  ;;  %2062 = vadd.xlane.f32.xlu1 %v2061_v12  ;;  %v2562_v48 = vmul.f32 %v5814_v2, %v2496_v62  ;;  %v2563_v45 = vmul.f32 %v5858_v63, %v2497_v17  ;;  %3827 = vrsqrt.f32 %v6527_v3  ;;  %v3087_v62 = vpop.f32.mrf.mxu2 }
 0x3df   :  { %v2310_v42 = vsub.f32 1.5, %v2309_v8  ;;  %3318 = vst [vmem:[#allocation10 + $0x50] sm:$0xff] %v3254_v38  ;;  %v7271_v24 = vmax.f32 %v6186_v53, 0.0  ;;  %v3176_v10 = vpop.f32.mrf.mxu3  ;;  %v3088_v0 = vadd.f32 %v3087_v62, %v6295_v56  ;;  %v2912_v53 = vpop.f32.mrf.mxu0  ;;  %v2325_v41 = vsel %vm2324_vm4, %v6458_v7, %v6489_v22  ;;  %v3866_v7 = vld [vmem:[#allocation2 + $0x58] sm:$0xff] }
 0x3e0   :  { %v6540_v19 = vsub.f32 %v7270_v35, %v1852_v21  ;;  %v2628_v8 = vadd.f32 %v5846_v27, %v2562_v48  ;;  %v2629_v60 = vadd.f32 %v5863_v14, %v2563_v45  ;;  %v3001_v54 = vpop.f32.mrf.mxu1  ;;  %v2913_v25 = vadd.f32 %v2912_v53, %v6257_v4 }
 0x3e1   :  { %v6544_v12 = vsub.f32 %v7271_v24, %v1852_v21  ;;  %v2311_v47 = vmul.f32 %v6492_v6, %v2310_v42  ;;  %v3177_v17 = vadd.f32 %v3176_v10, %v3088_v0  ;;  %v2329_v59 = vmul.f32 0.5, %v6496_v44  ;;  %v7272_v24 = vld [vmem:[#allocation34_spill] sm:$0xff] }
 0x3e2   :  { %v2676_v40 = vpack.c.bf16 %v2628_v8, %v6483_v29  ;;  %v2677_v20 = vpack.c.bf16 %v2629_v60, %v6486_v34  ;;  %v1974_v49 = vmul.f32 %v6540_v19, %v6540_v19  ;;  %v3002_v34 = vadd.f32 %v3001_v54, %v2913_v25 }
 0x3e3   :  { %v2315_v30 = vsel %vm2314_vm6, %v6492_v6, %v2311_v47  ;;  %v1975_v51 = vmul.f32 %v6544_v12, %v6544_v12  ;;  %v2070_v38 = vadd.f32 %v1979_v57, %v1978_v39  ;;  %v2048_v45 = vpop.xlane.xlu1 %2047  ;;  %v3255_v22 = vadd.f32 %v3866_v7, %v3177_v17  ;;  %v7273_v57 = vld [vmem:[#allocation32_spill] sm:$0xff] }
 0x3e4   :  { %v2498_v29 = vmul.f32 %v2315_v30, %v6127_v5  ;;  %2931 = vmatmul.bf16.gmra.mxu0 %v2676_v40  ;;  %3020 = vmatmul.bf16.gmra.mxu1 %v2677_v20  ;;  %v6569_v21 = vpop.eup %3827  ;;  %v2499_v48 = vmul.f32 %v2315_v30, %v6131_v61  ;;  %v2102_v44 = vmul.f32 %v2048_v45, %v4127_v33  ;;  %v3867_v5 = vld [vmem:[#allocation2 + $0x60] sm:$0xff]  ;;  %v2330_v61 = vsub.f32 1.5, %v2329_v59 }
 0x3e5   :  { %3109 = vmatmul.bf16.gmra.mxu2 %v2676_v40  ;;  %3198 = vmatmul.bf16.gmra.mxu3 %v2677_v20  ;;  %v2064_v6 = vadd.f32 %v1975_v51, %v1974_v49  ;;  %v2337_v42 = vmul.f32 %v6569_v21, %v6527_v3  ;;  %v3256_v35 = vadd.f32 %v3867_v5, %v3002_v34  ;;  %vm2343_vm8 = vweird.f32 %v6569_v21 }
 0x3e6   :  { %2071 = vadd.xlane.f32.xlu1 %v2070_v38  ;;  %v2500_v39 = vmul.f32 %v2325_v41, %v7272_v24  ;;  %v2501_v62 = vmul.f32 %v2325_v41, %v7273_v57  ;;  %3319 = vst [vmem:[#allocation10 + $0x58] sm:$0xff] %v3255_v22  ;;  %v6578_v8 = vadd.f32 1e-05, %v2102_v44  ;;  %v3090_v60 = vpop.f32.mrf.mxu2  ;;  %v2564_v40 = vmul.f32 %v5814_v2, %v2498_v29  ;;  %v3868_v38 = vld [vmem:[#allocation2 + $0x68] sm:$0xff] }
 0x3e7   :  { %2065 = vadd.xlane.f32.xlu2 %v2064_v6  ;;  %v2338_v10 = vmul.f32 %v6569_v21, %v2337_v42  ;;  %3320 = vst [vmem:[#allocation10 + $0x60] sm:$0xff] %v3256_v35  ;;  %v3179_v47 = vpop.f32.mrf.mxu3  ;;  %v3091_v0 = vadd.f32 %v3090_v60, %v6295_v56  ;;  %v2914_v53 = vpop.f32.mrf.mxu0  ;;  %v2565_v20 = vmul.f32 %v5858_v63, %v2499_v48  ;;  %v3869_v42 = vld [vmem:[#allocation2 + $0x70] sm:$0xff]  ;;  %vm2342_vm11 = vweird.f32 %v6527_v3 }
 0x3e8   :  { %v3003_v54 = vpop.f32.mrf.mxu1  ;;  %3829 = vrsqrt.f32 %v6578_v8  ;;  %v2915_v49 = vadd.f32 %v2914_v53, %v6257_v4  ;;  %v2566_v30 = vmul.f32 %v5814_v2, %v2500_v39  ;;  %v2567_v17 = vmul.f32 %v5858_v63, %v2501_v62  ;;  %vm2344_vm12 = vmor %vm2342_vm11, %vm2343_vm8 }
 0x3e9   :  { %v2339_v25 = vmul.f32 0.5, %v2338_v10  ;;  %v3180_v41 = vadd.f32 %v3179_v47, %v3091_v0  ;;  %v2331_v51 = vmul.f32 %v6472_v15, %v2330_v61  ;;  %v2630_v45 = vadd.f32 %v5846_v27, %v2564_v40 }
 0x3ea   :  { %v3004_v34 = vadd.f32 %v3003_v54, %v2915_v49  ;;  %v2631_v7 = vadd.f32 %v5863_v14, %v2565_v20  ;;  %v2632_v35 = vadd.f32 %v5846_v27, %v2566_v30  ;;  %v2633_v24 = vadd.f32 %v5863_v14, %v2567_v17 }
 0x3eb   :  { %v2340_v59 = vsub.f32 1.5, %v2339_v25  ;;  %v1819_v29 = vpop.xlane.xlu1 %1818  ;;  %v3257_v48 = vadd.f32 %v3868_v38, %v3180_v41  ;;  %v2335_v57 = vsel %vm2334_vm10, %v6472_v15, %v2331_v51  ;;  %v7275_v61 = vmax.f32 %v6248_v28, 0.0  ;;  %v7276_v51 = vld [vmem:[#allocation35_spill] sm:$0xff] }
 0x3ec   :  { %v1855_v6 = vmul.f32 %v1819_v29, %v4127_v33  ;;  %v3258_v44 = vadd.f32 %v3869_v42, %v3004_v34  ;;  %v2678_v53 = vpack.c.bf16 %v2632_v35, %v2630_v45  ;;  %v2679_v54 = vpack.c.bf16 %v2633_v24, %v2631_v7  ;;  %v3870_v7 = vld [vmem:[#allocation2 + $0x78] sm:$0xff] }
 0x3ed   :  { %v2341_v22 = vmul.f32 %v6569_v21, %v2340_v59  ;;  %3321 = vst [vmem:[#allocation10 + $0x68] sm:$0xff] %v3257_v48  ;;  %v2502_v59 = vmul.f32 %v2335_v57, %v7276_v51  ;;  %v7278_v24 = vmax.f32 %v6299_v13, 0.0  ;;  %vm2352_vm13 = vweird.f32 %v6578_v8 }
 0x3ee   :  { %v2051_v5 = vpop.xlane.xlu2 %2050  ;;  %v6598_v39 = vpop.eup %3829  ;;  %v6605_v62 = vsub.f32 %v7274_v23, %v1855_v6  ;;  %v6609_v3 = vsub.f32 %v7275_v61, %v1855_v6  ;;  %3322 = vst [vmem:[#allocation10 + $0x70] sm:$0xff] %v3258_v44  ;;  %v7277_v6 = vld [vmem:[#allocation17_spill] sm:$0xff] }
 0x3ef   :  { %v2103_v10 = vmul.f32 %v2051_v5, %v4127_v33  ;;  %v3092_v60 = vpop.f32.mrf.mxu2  ;;  %v3181_v47 = vpop.f32.mrf.mxu3  ;;  %v2345_v0 = vsel %vm2344_vm12, %v6569_v21, %v2341_v22  ;;  %v2347_v15 = vmul.f32 %v6598_v39, %v6578_v8  ;;  %v2503_v42 = vmul.f32 %v2335_v57, %v7277_v6  ;;  %v3871_v44 = vld [vmem:[#allocation2 + $0x80] sm:$0xff]  ;;  %v3872_v6 = vld [vmem:[#allocation2 + $0x88] sm:$0xff] }
 0x3f0   :  { %v2917_v40 = vpop.f32.mrf.mxu0  ;;  %v1980_v28 = vmul.f32 %v6605_v62, %v6605_v62  ;;  %v1981_v20 = vmul.f32 %v6609_v3, %v6609_v3  ;;  %v3093_v25 = vadd.f32 %v3092_v60, %v6295_v56  ;;  %v3006_v49 = vpop.f32.mrf.mxu1  ;;  %v2504_v34 = vmul.f32 %v2345_v0, %v6206_v55 }
 0x3f1   :  { %v6615_v58 = vadd.f32 1e-05, %v2103_v10  ;;  %v2918_v41 = vadd.f32 %v2917_v40, %v6257_v4  ;;  %v2348_v21 = vmul.f32 %v6598_v39, %v2347_v15  ;;  %v2505_v48 = vmul.f32 %v2345_v0, %v6210_v26 }
 0x3f2   :  { %v2073_v30 = vadd.f32 %v1981_v20, %v1980_v28  ;;  %v3182_v17 = vadd.f32 %v3181_v47, %v3093_v25  ;;  %v7279_v55 = vmax.f32 %v6289_v32, 0.0  ;;  %v2568_v15 = vmul.f32 %v5814_v2, %v2502_v59 }
 0x3f3   :  { %3831 = vrsqrt.f32 %v6615_v58  ;;  %v1822_v29 = vpop.xlane.xlu1 %1821  ;;  %v3007_v38 = vadd.f32 %v3006_v49, %v2918_v41  ;;  %v2349_v35 = vmul.f32 0.5, %v2348_v21  ;;  %v2570_v13 = vmul.f32 %v5814_v2, %v2504_v34 }
 0x3f4   :  { %2936 = vmatmul.bf16.gmra.mxu0 %v2678_v53  ;;  %3025 = vmatmul.bf16.gmra.mxu1 %v2679_v54  ;;  %v1856_v45 = vmul.f32 %v1822_v29, %v4127_v33  ;;  %v3259_v22 = vadd.f32 %v3870_v7, %v3182_v17  ;;  %v2571_v20 = vmul.f32 %v5858_v63, %v2505_v48  ;;  %vm2353_vm14 = vweird.f32 %v6598_v39 }
 0x3f5   :  { %3114 = vmatmul.bf16.gmra.mxu2 %v2678_v53  ;;  %3203 = vmatmul.bf16.gmra.mxu3 %v2679_v54  ;;  %v3260_v5 = vadd.f32 %v3871_v44, %v3007_v38  ;;  %v2569_v21 = vmul.f32 %v5858_v63, %v2503_v42  ;;  %v2634_v29 = vadd.f32 %v5846_v27, %v2568_v15  ;;  %vm2362_vm0 = vweird.f32 %v6615_v58  ;;  %vm2354_vm1 = vmor %vm2352_vm13, %vm2353_vm14 }
 0x3f6   :  { %2074 = vadd.xlane.f32.xlu2 %v2073_v30  ;;  %v6632_v23 = vsub.f32 %v7278_v24, %v1856_v45  ;;  %v6636_v61 = vsub.f32 %v7279_v55, %v1856_v45  ;;  %v2054_v10 = vpop.xlane.xlu2 %2053  ;;  %3323 = vst [vmem:[#allocation10 + $0x78] sm:$0xff] %v3259_v22  ;;  %v2350_v30 = vsub.f32 1.5, %v2349_v35  ;;  %v2636_v45 = vadd.f32 %v5846_v27, %v2570_v13  ;;  %v3873_v24 = vld [vmem:[#allocation2 + $0x90] sm:$0xff] }
 0x3f7   :  { %v3095_v26 = vpop.f32.mrf.mxu2  ;;  %v2104_v60 = vmul.f32 %v2054_v10, %v4127_v33  ;;  %3324 = vst [vmem:[#allocation10 + $0x80] sm:$0xff] %v3260_v5  ;;  %v3184_v57 = vpop.f32.mrf.mxu3  ;;  %v2637_v7 = vadd.f32 %v5863_v14, %v2571_v20  ;;  %v2635_v44 = vadd.f32 %v5863_v14, %v2569_v21  ;;  %v7280_v20 = vmax.f32 %v6394_v18, 0.0 }
 0x3f8   :  { %v3096_v47 = vadd.f32 %v3095_v26, %v6295_v56  ;;  %v2919_v0 = vpop.f32.mrf.mxu0  ;;  %v1982_v32 = vmul.f32 %v6632_v23, %v6632_v23  ;;  %v1983_v54 = vmul.f32 %v6636_v61, %v6636_v61  ;;  %v3008_v28 = vpop.f32.mrf.mxu1  ;;  %v2351_v5 = vmul.f32 %v6598_v39, %v2350_v30 }
 0x3f9   :  { %v3832_v53 = vpop.eup %3831  ;;  %v2920_v40 = vadd.f32 %v2919_v0, %v6257_v4  ;;  %v6649_v49 = vadd.f32 1e-05, %v2104_v60  ;;  %v2057_v41 = vpop.xlane.xlu0 %2056  ;;  %v2680_v15 = vpack.c.bf16 %v2636_v45, %v2634_v29  ;;  %v2681_v13 = vpack.c.bf16 %v2637_v7, %v2635_v44  ;;  %v7282_v44 = vld [vmem:[#allocation26_spill] sm:$0xff] }
 0x3fa   :  { %v2357_v25 = vmul.f32 %v3832_v53, %v6615_v58  ;;  %v2105_v17 = vmul.f32 %v2057_v41, %v4127_v33  ;;  %v2076_v51 = vadd.f32 %v1983_v54, %v1982_v32  ;;  %v3185_v34 = vadd.f32 %v3184_v57, %v3096_v47 }
 0x3fb   :  { %3833 = vrsqrt.f32 %v6649_v49  ;;  %v3009_v48 = vadd.f32 %v3008_v28, %v2920_v40  ;;  %vm2363_vm15 = vweird.f32 %v3832_v53  ;;  %v7281_v58 = vmax.f32 %v6351_v9, 0.0 }
 0x3fc   :  { %v2358_v59 = vmul.f32 %v3832_v53, %v2357_v25  ;;  %v6655_v38 = vadd.f32 1e-05, %v2105_v17  ;;  %2077 = vadd.xlane.f32.xlu0 %v2076_v51  ;;  %v3261_v42 = vadd.f32 %v3872_v6, %v3185_v34  ;;  %v2355_v30 = vsel %vm2354_vm1, %v6598_v39, %v2351_v5  ;;  %vm2364_vm2 = vmor %vm2362_vm0, %vm2363_vm15 }
 0x3fd   :  { %v3262_v55 = vadd.f32 %v3873_v24, %v3009_v48  ;;  %v2507_v5 = vmul.f32 %v2355_v30, %v7282_v44  ;;  %vm2372_vm7 = vweird.f32 %v6649_v49 }
 0x3fe   :  { %v2359_v22 = vmul.f32 0.5, %v2358_v59  ;;  %v1825_v35 = vpop.xlane.xlu2 %1824  ;;  %3835 = vrsqrt.f32 %v6655_v38  ;;  %3325 = vst [vmem:[#allocation10 + $0x88] sm:$0xff] %v3261_v42  ;;  %v3874_v59 = vld [vmem:[#allocation2 + $0x98] sm:$0xff]  ;;  %v2506_v42 = vmul.f32 %v2355_v30, %v6263_v36  ;;  %vm2382_vm5 = vweird.f32 %v6655_v38 }
 0x3ff   :  { %v3097_v10 = vpop.f32.mrf.mxu2  ;;  %v1857_v60 = vmul.f32 %v1825_v35, %v4127_v33  ;;  %v3186_v57 = vpop.f32.mrf.mxu3  ;;  %3326 = vst [vmem:[#allocation10 + $0x90] sm:$0xff] %v3262_v55 }
 0x400   :  { %v2360_v26 = vsub.f32 1.5, %v2359_v22  ;;  %v3098_v47 = vadd.f32 %v3097_v10, %v6295_v56  ;;  %v2922_v0 = vpop.f32.mrf.mxu0  ;;  %v3011_v54 = vpop.f32.mrf.mxu1  ;;  %v3875_v22 = vld [vmem:[#allocation2 + $0xa0] sm:$0xff] }
 0x401   :  { %v2923_v32 = vadd.f32 %v2922_v0, %v6257_v4  ;;  %v6668_v40 = vpop.eup %3833  ;;  %v6676_v25 = vsub.f32 %v7280_v20, %v1857_v60  ;;  %v6680_v41 = vsub.f32 %v7281_v58, %v1857_v60  ;;  %v3876_v20 = vld [vmem:[#allocation2 + $0xa8] sm:$0xff] }
 0x402   :  { %v2361_v28 = vmul.f32 %v3832_v53, %v2360_v26  ;;  %v3187_v21 = vadd.f32 %v3186_v57, %v3098_v47  ;;  %v2367_v17 = vmul.f32 %v6668_v40, %v6649_v49  ;;  %vm2373_vm4 = vweird.f32 %v6668_v40 }
 0x403   :  { %v3012_v8 = vadd.f32 %v3011_v54, %v2923_v32  ;;  %v1984_v18 = vmul.f32 %v6676_v25, %v6676_v25  ;;  %v1985_v9 = vmul.f32 %v6680_v41, %v6680_v41  ;;  %vm2374_vm8 = vmor %vm2372_vm7, %vm2373_vm4 }
 0x404   :  { %2941 = vmatmul.bf16.gmra.mxu0 %v2680_v15  ;;  %3030 = vmatmul.bf16.gmra.mxu1 %v2681_v13  ;;  %v2365_v51 = vsel %vm2364_vm2, %v3832_v53, %v2361_v28  ;;  %v3263_v34 = vadd.f32 %v3874_v59, %v3187_v21  ;;  %v3836_v29 = vpop.eup %3835  ;;  %v2368_v45 = vmul.f32 %v6668_v40, %v2367_v17 }
 0x405   :  { %3119 = vmatmul.bf16.gmra.mxu2 %v2680_v15  ;;  %v2508_v39 = vmul.f32 %v2365_v51, %v6319_v52  ;;  %v2509_v48 = vmul.f32 %v2365_v51, %v6323_v11  ;;  %3208 = vmatmul.bf16.gmra.mxu3 %v2681_v13  ;;  %v2377_v7 = vmul.f32 %v3836_v29, %v6655_v38  ;;  %vm2383_vm3 = vweird.f32 %v3836_v29 }
 0x406   :  { %v2079_v53 = vadd.f32 %v1985_v9, %v1984_v18  ;;  %3327 = vst [vmem:[#allocation10 + $0x98] sm:$0xff] %v3263_v34  ;;  %v3264_v6 = vadd.f32 %v3875_v22, %v3012_v8  ;;  %v2369_v35 = vmul.f32 0.5, %v2368_v45  ;;  %v2572_v15 = vmul.f32 %v5814_v2, %v2506_v42  ;;  %v3877_v8 = vld [vmem:[#allocation2 + $0xb0] sm:$0xff]  ;;  %vm2384_vm6 = vmor %vm2382_vm5, %vm2383_vm3 }
 0x407   :  { %v2378_v24 = vmul.f32 %v3836_v29, %v2377_v7  ;;  %v3100_v52 = vpop.f32.mrf.mxu2  ;;  %v3189_v55 = vpop.f32.mrf.mxu3  ;;  %v2574_v60 = vmul.f32 %v5814_v2, %v2508_v39  ;;  %v2575_v47 = vmul.f32 %v5858_v63, %v2509_v48  ;;  %v2573_v13 = vmul.f32 %v5858_v63, %v2507_v5 }
 0x408   :  { %2080 = vadd.xlane.f32.xlu1 %v2079_v53  ;;  %3328 = vst [vmem:[#allocation10 + $0xa0] sm:$0xff] %v3264_v6  ;;  %v3101_v11 = vadd.f32 %v3100_v52, %v6295_v56  ;;  %v2924_v10 = vpop.f32.mrf.mxu0  ;;  %v3013_v26 = vpop.f32.mrf.mxu1  ;;  %v2370_v32 = vsub.f32 1.5, %v2369_v35  ;;  %v2638_v18 = vadd.f32 %v5846_v27, %v2572_v15  ;;  %v3878_v52 = vld [vmem:[#allocation2 + $0xb8] sm:$0xff] }
 0x409   :  { %v2379_v57 = vmul.f32 0.5, %v2378_v24  ;;  %v2925_v0 = vadd.f32 %v2924_v10, %v6257_v4  ;;  %v2640_v21 = vadd.f32 %v5846_v27, %v2574_v60  ;;  %v2641_v30 = vadd.f32 %v5863_v14, %v2575_v47 }
 0x40a   :  { %v3190_v36 = vadd.f32 %v3189_v55, %v3101_v11  ;;  %v2639_v9 = vadd.f32 %v5863_v14, %v2573_v13  ;;  %v2371_v59 = vmul.f32 %v6668_v40, %v2370_v32  ;;  %v3879_v11 = vld [vmem:[#allocation2 + $0xc0] sm:$0xff]  ;;  %v3880_v13 = vld [vmem:[#allocation2 + $0xc8] sm:$0xff] }
 0x40b   :  { %v2380_v54 = vsub.f32 1.5, %v2379_v57  ;;  %v3014_v28 = vadd.f32 %v3013_v26, %v2925_v0  ;;  %v2682_v45 = vpack.c.bf16 %v2640_v21, %v2638_v18 }
 0x40c   :  { %v3265_v58 = vadd.f32 %v3876_v20, %v3190_v36  ;;  %v2683_v7 = vpack.c.bf16 %v2641_v30, %v2639_v9  ;;  %v2375_v38 = vsel %vm2374_vm8, %v6668_v40, %v2371_v59  ;;  %v3881_v20 = vld [vmem:[#allocation2 + $0xd0] sm:$0xff] }
 0x40d   :  { %v2381_v17 = vmul.f32 %v3836_v29, %v2380_v54  ;;  %v3266_v51 = vadd.f32 %v3877_v8, %v3014_v28  ;;  %v2511_v10 = vmul.f32 %v2375_v38, %v6366_v37 }
 0x40e   :  { %3329 = vst [vmem:[#allocation10 + $0xa8] sm:$0xff] %v3265_v58 }
 0x40f   :  { %v3102_v34 = vpop.f32.mrf.mxu2  ;;  %v3191_v39 = vpop.f32.mrf.mxu3  ;;  %3330 = vst [vmem:[#allocation10 + $0xb0] sm:$0xff] %v3266_v51  ;;  %v2385_v6 = vsel %vm2384_vm6, %v3836_v29, %v2381_v17  ;;  %v2510_v29 = vmul.f32 %v2375_v38, %v6362_v31  ;;  %v2577_v31 = vmul.f32 %v5858_v63, %v2511_v10 }
 0x410   :  { %v3103_v48 = vadd.f32 %v3102_v34, %v6295_v56  ;;  %v2927_v53 = vpop.f32.mrf.mxu0  ;;  %v3016_v22 = vpop.f32.mrf.mxu1  ;;  %v2512_v35 = vmul.f32 %v2385_v6, %v6382_v1  ;;  %v2513_v24 = vmul.f32 %v2385_v6, %v6387_v43  ;;  %v3882_v34 = vld [vmem:[#allocation2 + $0xd8] sm:$0xff] }
 0x411   :  { %v2928_v42 = vadd.f32 %v2927_v53, %v6257_v4  ;;  %v2576_v15 = vmul.f32 %v5814_v2, %v2510_v29  ;;  %v2643_v30 = vadd.f32 %v5863_v14, %v2577_v31 }
 0x412   :  { %v3192_v44 = vadd.f32 %v3191_v39, %v3103_v48  ;;  %v2578_v1 = vmul.f32 %v5814_v2, %v2512_v35  ;;  %v2579_v43 = vmul.f32 %v5858_v63, %v2513_v24  ;;  %v2060_v48 = vpop.xlane.xlu0 %2059 }
 0x413   :  { %v3017_v5 = vadd.f32 %v3016_v22, %v2928_v42  ;;  %v2642_v21 = vadd.f32 %v5846_v27, %v2576_v15 }
 0x414   :  { %2946 = vmatmul.bf16.gmra.mxu0 %v2682_v45  ;;  %3035 = vmatmul.bf16.gmra.mxu1 %v2683_v7  ;;  %v3267_v55 = vadd.f32 %v3878_v52, %v3192_v44  ;;  %v2644_v54 = vadd.f32 %v5846_v27, %v2578_v1  ;;  %v2645_v28 = vadd.f32 %v5863_v14, %v2579_v43 }
 0x415   :  { %3124 = vmatmul.bf16.gmra.mxu2 %v2682_v45  ;;  %3213 = vmatmul.bf16.gmra.mxu3 %v2683_v7  ;;  %v3268_v49 = vadd.f32 %v3879_v11, %v3017_v5  ;;  %v2106_v45 = vmul.f32 %v2060_v48, %v4127_v33 }
 0x416   :  { %3331 = vst [vmem:[#allocation10 + $0xb8] sm:$0xff] %v3267_v55  ;;  %v2684_v51 = vpack.c.bf16 %v2644_v54, %v2642_v21  ;;  %v2685_v18 = vpack.c.bf16 %v2645_v28, %v2643_v30 }
 0x417   :  { %3332 = vst [vmem:[#allocation10 + $0xc0] sm:$0xff] %v3268_v49  ;;  %v3105_v26 = vpop.f32.mrf.mxu2  ;;  %v3194_v60 = vpop.f32.mrf.mxu3  ;;  %v2138_v7 = vadd.f32 1e-05, %v2106_v45  ;;  %v7285_v45 = vld [vmem:[#allocation38_spill] sm:$0xff] }
 0x418   :  { %v3106_v40 = vadd.f32 %v3105_v26, %v6295_v56  ;;  %v2929_v47 = vpop.f32.mrf.mxu0  ;;  %v3018_v36 = vpop.f32.mrf.mxu1 }
 0x419   :  { %v2930_v57 = vadd.f32 %v2929_v47, %v6257_v4  ;;  %3837 = vrsqrt.f32 %v2138_v7  ;;  %vm2392_vm10 = vweird.f32 %v2138_v7 }
 0x41a   :  { %v3195_v0 = vadd.f32 %v3194_v60, %v3106_v40 }
 0x41b   :  { %v3019_v37 = vadd.f32 %v3018_v36, %v2930_v57  ;;  %v7283_v36 = vld [vmem:[#allocation39_spill] sm:$0xff] }
 0x41c   :  { %v3269_v32 = vadd.f32 %v3880_v13, %v3195_v0 }
 0x41d   :  { %v3270_v58 = vadd.f32 %v3881_v20, %v3019_v37  ;;  %v7284_v37 = vld [vmem:[#allocation23_spill] sm:$0xff] }
 0x41e   :  { %3333 = vst [vmem:[#allocation10 + $0xc8] sm:$0xff] %v3269_v32 }
 0x41f   :  { %3334 = vst [vmem:[#allocation10 + $0xd0] sm:$0xff] %v3270_v58  ;;  %v3107_v17 = vpop.f32.mrf.mxu2  ;;  %v3196_v9 = vpop.f32.mrf.mxu3 }
 0x420   :  { %v3108_v8 = vadd.f32 %v3107_v17, %v6295_v56  ;;  %v3838_v53 = vpop.eup %3837 }
 0x421   :  { %v2387_v22 = vmul.f32 %v3838_v53, %v2138_v7  ;;  %vm2393_vm9 = vweird.f32 %v3838_v53 }
 0x422   :  { %v3197_v59 = vadd.f32 %v3196_v9, %v3108_v8  ;;  %vm2394_vm11 = vmor %vm2392_vm10, %vm2393_vm9 }
 0x423   :  { %v2388_v44 = vmul.f32 %v3838_v53, %v2387_v22 }
 0x424   :  { %2951 = vmatmul.bf16.gmra.mxu0 %v2684_v51  ;;  %3040 = vmatmul.bf16.gmra.mxu1 %v2685_v18  ;;  %v3271_v39 = vadd.f32 %v3882_v34, %v3197_v59  ;;  %v3883_v34 = vld [vmem:[#allocation2 + $0xe0] sm:$0xff] }
 0x425   :  { %3129 = vmatmul.bf16.gmra.mxu2 %v2684_v51  ;;  %3218 = vmatmul.bf16.gmra.mxu3 %v2685_v18  ;;  %v2389_v5 = vmul.f32 0.5, %v2388_v44 }
 0x426   :  { %3335 = vst [vmem:[#allocation10 + $0xd8] sm:$0xff] %v3271_v39 }
 0x427   :  { %v2390_v55 = vsub.f32 1.5, %v2389_v5 }
 0x429   :  { %v2391_v11 = vmul.f32 %v3838_v53, %v2390_v55 }
 0x42b   :  { %v2395_v47 = vsel %vm2394_vm11, %v3838_v53, %v2391_v11 }
 0x42c   :  { %v2514_v15 = vmul.f32 %v2395_v47, %v7283_v36  ;;  %v2515_v13 = vmul.f32 %v2395_v47, %v7284_v37 }
 0x42e   :  { %v2580_v17 = vmul.f32 %v5814_v2, %v2514_v15  ;;  %v2581_v9 = vmul.f32 %v5858_v63, %v2515_v13  ;;  %v3884_v13 = vld [vmem:[#allocation2 + $0xe8] sm:$0xff] }
 0x430   :  { %v2647_v55 = vadd.f32 %v5863_v14, %v2581_v9 }
 0x436   :  { %v2069_v6 = vpop.xlane.xlu0 %2068 }
 0x437   :  { %v2109_v42 = vmul.f32 %v2069_v6, %v4127_v33 }
 0x439   :  { %v6730_v38 = vadd.f32 1e-05, %v2109_v42 }
 0x43b   :  { %3839 = vrsqrt.f32 %v6730_v38  ;;  %vm2422_vm2 = vweird.f32 %v6730_v38 }
 0x441   :  { %v6734_v29 = vpop.eup %3839 }
 0x442   :  { %v2417_v1 = vmul.f32 %v6734_v29, %v6730_v38  ;;  %vm2423_vm15 = vweird.f32 %v6734_v29 }
 0x443   :  { %vm2424_vm4 = vmor %vm2422_vm2, %vm2423_vm15 }
 0x444   :  { %v2418_v32 = vmul.f32 %v6734_v29, %v2417_v1 }
 0x446   :  { %v2419_v51 = vmul.f32 0.5, %v2418_v32 }
 0x448   :  { %v2420_v44 = vsub.f32 1.5, %v2419_v51 }
 0x44a   :  { %v2421_v15 = vmul.f32 %v6734_v29, %v2420_v44 }
 0x451   :  { %v2063_v35 = vpop.xlane.xlu1 %2062 }
 0x452   :  { %v2107_v24 = vmul.f32 %v2063_v35, %v4127_v33 }
 0x454   :  { %v2139_v52 = vadd.f32 1e-05, %v2107_v24 }
 0x456   :  { %3841 = vrsqrt.f32 %v2139_v52  ;;  %vm2402_vm13 = vweird.f32 %v2139_v52 }
 0x459   :  { %v2072_v49 = vpop.xlane.xlu1 %2071 }
 0x45a   :  { %v2066_v10 = vpop.xlane.xlu2 %2065  ;;  %v2110_v40 = vmul.f32 %v2072_v49, %v4127_v33 }
 0x45b   :  { %v2108_v26 = vmul.f32 %v2066_v10, %v4127_v33 }
 0x45c   :  { %v3842_v60 = vpop.eup %3841  ;;  %v6744_v31 = vadd.f32 1e-05, %v2110_v40 }
 0x45d   :  { %v2397_v43 = vmul.f32 %v3842_v60, %v2139_v52  ;;  %v6740_v57 = vadd.f32 1e-05, %v2108_v26  ;;  %vm2403_vm12 = vweird.f32 %v3842_v60  ;;  %v2646_v52 = vadd.f32 %v5846_v27, %v2580_v17 }
 0x45e   :  { %vm2404_vm14 = vmor %vm2402_vm13, %vm2403_vm12  ;;  %vm2432_vm9 = vweird.f32 %v6744_v31 }
 0x45f   :  { %v2398_v0 = vmul.f32 %v3842_v60, %v2397_v43  ;;  %3843 = vrsqrt.f32 %v6740_v57  ;;  %vm2412_vm1 = vweird.f32 %v6740_v57 }
 0x460   :  { %3845 = vrsqrt.f32 %v6744_v31 }
 0x461   :  { %v2399_v54 = vmul.f32 0.5, %v2398_v0  ;;  %v2932_v28 = vpop.f32.mrf.mxu0  ;;  %v3021_v20 = vpop.f32.mrf.mxu1 }
 0x462   :  { %v2933_v58 = vadd.f32 %v2932_v28, %v6257_v4 }
 0x463   :  { %v2400_v21 = vsub.f32 1.5, %v2399_v54 }
 0x464   :  { %v3022_v30 = vadd.f32 %v3021_v20, %v2933_v58  ;;  %v3885_v20 = vld [vmem:[#allocation2 + $0xf0] sm:$0xff] }
 0x465   :  { %v3844_v8 = vpop.eup %3843  ;;  %v2401_v18 = vmul.f32 %v3842_v60, %v2400_v21 }
 0x466   :  { %v2407_v59 = vmul.f32 %v3844_v8, %v6740_v57  ;;  %v3272_v39 = vadd.f32 %v3883_v34, %v3022_v30  ;;  %v6758_v11 = vpop.eup %3845  ;;  %vm2413_vm0 = vweird.f32 %v3844_v8  ;;  %v2425_v57 = vsel %vm2424_vm4, %v6734_v29, %v2421_v15 }
 0x467   :  { %v2405_v48 = vsel %vm2404_vm14, %v3842_v60, %v2401_v18  ;;  %v2427_v37 = vmul.f32 %v6758_v11, %v6744_v31  ;;  %vm2414_vm3 = vmor %vm2412_vm1, %vm2413_vm0  ;;  %vm2433_vm6 = vweird.f32 %v6758_v11 }
 0x468   :  { %v2516_v7 = vmul.f32 %v2405_v48, %v7285_v45  ;;  %v2517_v53 = vmul.f32 %v2405_v48, %v6508_v46  ;;  %v2408_v22 = vmul.f32 %v3844_v8, %v2407_v59  ;;  %3336 = vst [vmem:[#allocation10 + $0xe0] sm:$0xff] %v3272_v39  ;;  %v3110_v6 = vpop.f32.mrf.mxu2  ;;  %v3199_v42 = vpop.f32.mrf.mxu3  ;;  %vm2434_vm10 = vmor %vm2432_vm9, %vm2433_vm6 }
 0x469   :  { %v2075_v5 = vpop.xlane.xlu2 %2074  ;;  %v3111_v35 = vadd.f32 %v3110_v6, %v6295_v56  ;;  %v2934_v24 = vpop.f32.mrf.mxu0  ;;  %v2428_v9 = vmul.f32 %v6758_v11, %v2427_v37 }
 0x46a   :  { %v2409_v49 = vmul.f32 0.5, %v2408_v22  ;;  %v2111_v10 = vmul.f32 %v2075_v5, %v4127_v33  ;;  %v2935_v46 = vadd.f32 %v2934_v24, %v6257_v4  ;;  %v3023_v26 = vpop.f32.mrf.mxu1  ;;  %v2582_v60 = vmul.f32 %v5814_v2, %v2516_v7  ;;  %v7286_v22 = vld [vmem:[#allocation19_spill] sm:$0xff] }
 0x46b   :  { %v3200_v40 = vadd.f32 %v3199_v42, %v3111_v35  ;;  %v2583_v47 = vmul.f32 %v5858_v63, %v2517_v53  ;;  %v2520_v6 = vmul.f32 %v2425_v57, %v7286_v22  ;;  %v7287_v42 = vld [vmem:[#allocation27_spill] sm:$0xff]  ;;  %v2429_v24 = vmul.f32 0.5, %v2428_v9 }
 0x46c   :  { %v2410_v1 = vsub.f32 1.5, %v2409_v49  ;;  %v6765_v43 = vadd.f32 1e-05, %v2111_v10  ;;  %v3024_v0 = vadd.f32 %v3023_v26, %v2935_v46  ;;  %v2648_v36 = vadd.f32 %v5846_v27, %v2582_v60  ;;  %v3887_v10 = vld [vmem:[#allocation2 + $0x100] sm:$0xff] }
 0x46d   :  { %v3273_v32 = vadd.f32 %v3884_v13, %v3200_v40  ;;  %v2649_v54 = vadd.f32 %v5863_v14, %v2583_v47  ;;  %v2521_v44 = vmul.f32 %v2425_v57, %v7287_v42  ;;  %v2586_v47 = vmul.f32 %v5814_v2, %v2520_v6 }
 0x46e   :  { %v2411_v28 = vmul.f32 %v3844_v8, %v2410_v1  ;;  %3847 = vrsqrt.f32 %v6765_v43  ;;  %v3274_v58 = vadd.f32 %v3885_v20, %v3024_v0  ;;  %v2686_v21 = vpack.c.bf16 %v2648_v36, %v2646_v52 }
 0x46f   :  { %3337 = vst [vmem:[#allocation10 + $0xe8] sm:$0xff] %v3273_v32  ;;  %v2687_v30 = vpack.c.bf16 %v2649_v54, %v2647_v55  ;;  %v2078_v59 = vpop.xlane.xlu0 %2077  ;;  %v3886_v55 = vld [vmem:[#allocation2 + $0xf8] sm:$0xff]  ;;  %v2587_v1 = vmul.f32 %v5858_v63, %v2521_v44  ;;  %v2430_v0 = vsub.f32 1.5, %v2429_v24  ;;  %vm2442_vm7 = vweird.f32 %v6765_v43 }
 0x470   :  { %v2415_v17 = vsel %vm2414_vm3, %v3844_v8, %v2411_v28  ;;  %3338 = vst [vmem:[#allocation10 + $0xf0] sm:$0xff] %v3274_v58  ;;  %v3112_v51 = vpop.f32.mrf.mxu2  ;;  %v3201_v18 = vpop.f32.mrf.mxu3  ;;  %2956 = vmatmul.bf16.gmra.mxu0 %v2686_v21  ;;  %v2112_v39 = vmul.f32 %v2078_v59, %v4127_v33  ;;  %3134 = vmatmul.bf16.gmra.mxu2 %v2686_v21 }
 0x471   :  { %v3113_v34 = vadd.f32 %v3112_v51, %v6295_v56  ;;  %3045 = vmatmul.bf16.gmra.mxu1 %v2687_v30  ;;  %v2937_v38 = vpop.f32.mrf.mxu0  ;;  %3223 = vmatmul.bf16.gmra.mxu3 %v2687_v30  ;;  %v2518_v45 = vmul.f32 %v2415_v17, %v6540_v19  ;;  %v2519_v7 = vmul.f32 %v2415_v17, %v6544_v12 }
 0x472   :  { %v2938_v48 = vadd.f32 %v2937_v38, %v6257_v4  ;;  %v3026_v8 = vpop.f32.mrf.mxu1  ;;  %v6787_v5 = vadd.f32 1e-05, %v2112_v39  ;;  %v2652_v51 = vadd.f32 %v5846_v27, %v2586_v47  ;;  %v2431_v57 = vmul.f32 %v6758_v11, %v2430_v0  ;;  %v3888_v38 = vld [vmem:[#allocation2 + $0x108] sm:$0xff] }
 0x473   :  { %v3202_v29 = vadd.f32 %v3201_v18, %v3113_v34  ;;  %v2584_v12 = vmul.f32 %v5814_v2, %v2518_v45  ;;  %v2585_v26 = vmul.f32 %v5858_v63, %v2519_v7  ;;  %v2653_v18 = vadd.f32 %v5863_v14, %v2587_v1 }
 0x474   :  { %v3848_v53 = vpop.eup %3847  ;;  %v3027_v35 = vadd.f32 %v3026_v8, %v2938_v48  ;;  %3849 = vrsqrt.f32 %v6787_v5  ;;  %v3889_v48 = vld [vmem:[#allocation2 + $0x110] sm:$0xff]  ;;  %v2435_v44 = vsel %vm2434_vm10, %v6758_v11, %v2431_v57  ;;  %vm2452_vm13 = vweird.f32 %v6787_v5 }
 0x475   :  { %v2437_v52 = vmul.f32 %v3848_v53, %v6765_v43  ;;  %v3275_v49 = vadd.f32 %v3886_v55, %v3202_v29  ;;  %v2650_v20 = vadd.f32 %v5846_v27, %v2584_v12  ;;  %v2651_v58 = vadd.f32 %v5863_v14, %v2585_v26  ;;  %v3891_v26 = vld [vmem:[#allocation2 + $0x120] sm:$0xff] }
 0x476   :  { %v3276_v19 = vadd.f32 %v3887_v10, %v3027_v35  ;;  %vm2443_vm5 = vweird.f32 %v3848_v53  ;;  %v2522_v10 = vmul.f32 %v2435_v44, %v6500_v16 }
 0x477   :  { %v2438_v46 = vmul.f32 %v3848_v53, %v2437_v52  ;;  %3339 = vst [vmem:[#allocation10 + $0xf8] sm:$0xff] %v3275_v49  ;;  %vm2444_vm8 = vmor %vm2442_vm7, %vm2443_vm5  ;;  %v2688_v7 = vpack.c.bf16 %v2652_v51, %v2650_v20  ;;  %v2689_v29 = vpack.c.bf16 %v2653_v18, %v2651_v58  ;;  %v3892_v51 = vld [vmem:[#allocation2 + $0x128] sm:$0xff] }
 0x478   :  { %3340 = vst [vmem:[#allocation10 + $0x100] sm:$0xff] %v3276_v19  ;;  %v3115_v60 = vpop.f32.mrf.mxu2  ;;  %v3204_v40 = vpop.f32.mrf.mxu3  ;;  %v2523_v19 = vmul.f32 %v2435_v44, %v6516_v50  ;;  %v2588_v50 = vmul.f32 %v5814_v2, %v2522_v10  ;;  %v3895_v10 = vld [vmem:[#allocation2 + $0x140] sm:$0xff] }
 0x479   :  { %v2439_v36 = vmul.f32 0.5, %v2438_v46  ;;  %v3116_v15 = vadd.f32 %v3115_v60, %v6295_v56  ;;  %v2939_v37 = vpop.f32.mrf.mxu0  ;;  %v3890_v46 = vld [vmem:[#allocation2 + $0x118] sm:$0xff] }
 0x47a   :  { %v2940_v13 = vadd.f32 %v2939_v37, %v6257_v4  ;;  %v3028_v32 = vpop.f32.mrf.mxu1  ;;  %v6799_v21 = vpop.eup %3849  ;;  %v2654_v57 = vadd.f32 %v5846_v27, %v2588_v50  ;;  %v3897_v50 = vld [vmem:[#allocation2 + $0x150] sm:$0xff] }
 0x47b   :  { %v2440_v54 = vsub.f32 1.5, %v2439_v36  ;;  %v3205_v28 = vadd.f32 %v3204_v40, %v3116_v15  ;;  %v2081_v30 = vpop.xlane.xlu1 %2080  ;;  %v2447_v34 = vmul.f32 %v6799_v21, %v6787_v5  ;;  %v2589_v15 = vmul.f32 %v5858_v63, %v2523_v19 }
 0x47c   :  { %v3029_v17 = vadd.f32 %v3028_v32, %v2940_v13  ;;  %v2113_v59 = vmul.f32 %v2081_v30, %v4127_v33  ;;  %vm2453_vm11 = vweird.f32 %v6799_v21 }
 0x47d   :  { %v2441_v9 = vmul.f32 %v3848_v53, %v2440_v54  ;;  %v3277_v39 = vadd.f32 %v3888_v38, %v3205_v28  ;;  %v2448_v35 = vmul.f32 %v6799_v21, %v2447_v34  ;;  %v3893_v38 = vld [vmem:[#allocation2 + $0x130] sm:$0xff]  ;;  %vm2454_vm14 = vmor %vm2452_vm13, %vm2453_vm11 }
 0x47e   :  { %v3278_v8 = vadd.f32 %v3889_v48, %v3029_v17  ;;  %v6810_v45 = vadd.f32 1e-05, %v2113_v59 }
 0x47f   :  { %v2445_v22 = vsel %vm2444_vm8, %v3848_v53, %v2441_v9  ;;  %3341 = vst [vmem:[#allocation10 + $0x108] sm:$0xff] %v3277_v39  ;;  %v2449_v11 = vmul.f32 0.5, %v2448_v35  ;;  %v2655_v9 = vadd.f32 %v5863_v14, %v2589_v15 }
 0x480   :  { %v3117_v33 = vpop.f32.mrf.mxu2  ;;  %v3206_v6 = vpop.f32.mrf.mxu3  ;;  %3851 = vrsqrt.f32 %v6810_v45  ;;  %3342 = vst [vmem:[#allocation10 + $0x110] sm:$0xff] %v3278_v8  ;;  %2961 = vmatmul.bf16.gmra.mxu0 %v2688_v7  ;;  %3139 = vmatmul.bf16.gmra.mxu2 %v2688_v7  ;;  %v2524_v24 = vmul.f32 %v2445_v22, %v6605_v62  ;;  %v2525_v52 = vmul.f32 %v2445_v22, %v6609_v3  ;;  %vm2462_vm15 = vweird.f32 %v6810_v45 }
 0x481   :  { %v3118_v43 = vadd.f32 %v3117_v33, %v6295_v56  ;;  %3050 = vmatmul.bf16.gmra.mxu1 %v2689_v29  ;;  %v2942_v42 = vpop.f32.mrf.mxu0  ;;  %3228 = vmatmul.bf16.gmra.mxu3 %v2689_v29  ;;  %v2450_v37 = vsub.f32 1.5, %v2449_v11 }
 0x482   :  { %v2943_v31 = vadd.f32 %v2942_v42, %v6257_v4  ;;  %v3031_v53 = vpop.f32.mrf.mxu1  ;;  %v2590_v47 = vmul.f32 %v5814_v2, %v2524_v24  ;;  %v2591_v1 = vmul.f32 %v5858_v63, %v2525_v52 }
 0x483   :  { %v3207_v55 = vadd.f32 %v3206_v6, %v3118_v43  ;;  %v2451_v59 = vmul.f32 %v6799_v21, %v2450_v37 }
 0x484   :  { %v3032_v49 = vadd.f32 %v3031_v53, %v2943_v31  ;;  %v2656_v20 = vadd.f32 %v5846_v27, %v2590_v47  ;;  %v2657_v58 = vadd.f32 %v5863_v14, %v2591_v1 }
 0x485   :  { %v3279_v12 = vadd.f32 %v3890_v46, %v3207_v55  ;;  %v2455_v43 = vsel %vm2454_vm14, %v6799_v21, %v2451_v59  ;;  %v3894_v55 = vld [vmem:[#allocation2 + $0x138] sm:$0xff] }
 0x486   :  { %v3280_v60 = vadd.f32 %v3891_v26, %v3032_v49  ;;  %v3852_v40 = vpop.eup %3851  ;;  %v2690_v48 = vpack.c.bf16 %v2656_v20, %v2654_v57  ;;  %v2691_v8 = vpack.c.bf16 %v2657_v58, %v2655_v9  ;;  %v2526_v24 = vmul.f32 %v2455_v43, %v6632_v23  ;;  %v3898_v58 = vld [vmem:[#allocation2 + $0x158] sm:$0xff] }
 0x487   :  { %3343 = vst [vmem:[#allocation10 + $0x118] sm:$0xff] %v3279_v12  ;;  %v2457_v62 = vmul.f32 %v3852_v40, %v6810_v45  ;;  %vm2463_vm12 = vweird.f32 %v3852_v40  ;;  %v2527_v52 = vmul.f32 %v2455_v43, %v6636_v61 }
 0x488   :  { %3344 = vst [vmem:[#allocation10 + $0x120] sm:$0xff] %v3280_v60  ;;  %v3120_v3 = vpop.f32.mrf.mxu2  ;;  %v3209_v16 = vpop.f32.mrf.mxu3  ;;  %vm2464_vm0 = vmor %vm2462_vm15, %vm2463_vm12  ;;  %v2592_v26 = vmul.f32 %v5814_v2, %v2526_v24  ;;  %v3903_v24 = vld [vmem:[#allocation2 + $0x180] sm:$0xff] }
 0x489   :  { %v3121_v0 = vadd.f32 %v3120_v3, %v6295_v56  ;;  %v2944_v36 = vpop.f32.mrf.mxu0  ;;  %v2458_v13 = vmul.f32 %v3852_v40, %v2457_v62  ;;  %v2593_v23 = vmul.f32 %v5858_v63, %v2527_v52  ;;  %v3896_v3 = vld [vmem:[#allocation2 + $0x148] sm:$0xff] }
 0x48a   :  { %v2945_v32 = vadd.f32 %v2944_v36, %v6257_v4  ;;  %v3033_v54 = vpop.f32.mrf.mxu1 }
 0x48b   :  { %v3210_v28 = vadd.f32 %v3209_v16, %v3121_v0  ;;  %v2459_v30 = vmul.f32 0.5, %v2458_v13  ;;  %v2658_v16 = vadd.f32 %v5846_v27, %v2592_v26  ;;  %v2659_v36 = vadd.f32 %v5863_v14, %v2593_v23  ;;  %v3905_v26 = vld [vmem:[#allocation2 + $0x190] sm:$0xff] }
 0x48c   :  { %v3034_v17 = vadd.f32 %v3033_v54, %v2945_v32 }
 0x48d   :  { %v3281_v18 = vadd.f32 %v3892_v51, %v3210_v28  ;;  %v2460_v34 = vsub.f32 1.5, %v2459_v30 }
 0x48e   :  { %v3282_v39 = vadd.f32 %v3893_v38, %v3034_v17  ;;  %v3899_v17 = vld [vmem:[#allocation2 + $0x160] sm:$0xff] }
 0x48f   :  { %3345 = vst [vmem:[#allocation10 + $0x128] sm:$0xff] %v3281_v18  ;;  %v2461_v7 = vmul.f32 %v3852_v40, %v2460_v34 }
 0x490   :  { %3346 = vst [vmem:[#allocation10 + $0x130] sm:$0xff] %v3282_v39  ;;  %v3122_v29 = vpop.f32.mrf.mxu2  ;;  %v3211_v33 = vpop.f32.mrf.mxu3  ;;  %2966 = vmatmul.bf16.gmra.mxu0 %v2690_v48  ;;  %3144 = vmatmul.bf16.gmra.mxu2 %v2690_v48 }
 0x491   :  { %v3123_v22 = vadd.f32 %v3122_v29, %v6295_v56  ;;  %3055 = vmatmul.bf16.gmra.mxu1 %v2691_v8  ;;  %v2947_v6 = vpop.f32.mrf.mxu0  ;;  %v2465_v42 = vsel %vm2464_vm0, %v3852_v40, %v2461_v7  ;;  %3233 = vmatmul.bf16.gmra.mxu3 %v2691_v8  ;;  %v3900_v8 = vld [vmem:[#allocation2 + $0x168] sm:$0xff]  ;;  %v3901_v29 = vld [vmem:[#allocation2 + $0x170] sm:$0xff] }
 0x492   :  { %v2948_v5 = vadd.f32 %v2947_v6, %v6257_v4  ;;  %v3036_v44 = vpop.f32.mrf.mxu1  ;;  %v2528_v35 = vmul.f32 %v2465_v42, %v6676_v25  ;;  %v2529_v45 = vmul.f32 %v2465_v42, %v6680_v41 }
 0x493   :  { %v3212_v31 = vadd.f32 %v3211_v33, %v3123_v22 }
 0x494   :  { %v3037_v53 = vadd.f32 %v3036_v44, %v2948_v5  ;;  %v2594_v19 = vmul.f32 %v5814_v2, %v2528_v35  ;;  %v2595_v46 = vmul.f32 %v5858_v63, %v2529_v45  ;;  %v3902_v5 = vld [vmem:[#allocation2 + $0x178] sm:$0xff] }
 0x495   :  { %v3283_v49 = vadd.f32 %v3894_v55, %v3212_v31 }
 0x496   :  { %v3284_v21 = vadd.f32 %v3895_v10, %v3037_v53  ;;  %v2660_v47 = vadd.f32 %v5846_v27, %v2594_v19  ;;  %v2661_v1 = vadd.f32 %v5863_v14, %v2595_v46 }
 0x497   :  { %3347 = vst [vmem:[#allocation10 + $0x138] sm:$0xff] %v3283_v49 }
 0x498   :  { %3348 = vst [vmem:[#allocation10 + $0x140] sm:$0xff] %v3284_v21  ;;  %v3125_v12 = vpop.f32.mrf.mxu2  ;;  %v3214_v41 = vpop.f32.mrf.mxu3  ;;  %v2692_v2 = vpack.c.bf16 %v2660_v47, %v2658_v16  ;;  %v2693_v63 = vpack.c.bf16 %v2661_v1, %v2659_v36  ;;  %v3906_v16 = vld [vmem:[#allocation2 + $0x198] sm:$0xff] }
 0x499   :  { %v3126_v25 = vadd.f32 %v3125_v12, %v6295_v56  ;;  %v2949_v11 = vpop.f32.mrf.mxu0 }
 0x49a   :  { %v2950_v61 = vadd.f32 %v2949_v11, %v6257_v4  ;;  %v3038_v60 = vpop.f32.mrf.mxu1 }
 0x49b   :  { %v3215_v40 = vadd.f32 %v3214_v41, %v3126_v25  ;;  %v3904_v41 = vld [vmem:[#allocation2 + $0x188] sm:$0xff] }
 0x49c   :  { %v3039_v62 = vadd.f32 %v3038_v60, %v2950_v61 }
 0x49d   :  { %v3285_v0 = vadd.f32 %v3896_v3, %v3215_v40 }
 0x49e   :  { %v3286_v15 = vadd.f32 %v3897_v50, %v3039_v62  ;;  %v3907_v50 = vld [vmem:[#allocation2 + $0x1a0] sm:$0xff] }
 0x49f   :  { %3349 = vst [vmem:[#allocation10 + $0x148] sm:$0xff] %v3285_v0 }
 0x4a0   :  { %3350 = vst [vmem:[#allocation10 + $0x150] sm:$0xff] %v3286_v15  ;;  %v3127_v37 = vpop.f32.mrf.mxu2  ;;  %v3216_v32 = vpop.f32.mrf.mxu3  ;;  %2971 = vmatmul.bf16.gmra.mxu0 %v2692_v2  ;;  %3149 = vmatmul.bf16.gmra.mxu2 %v2692_v2 }
 0x4a1   :  { %v3128_v13 = vadd.f32 %v3127_v37, %v6295_v56  ;;  %3060 = vmatmul.bf16.gmra.mxu1 %v2693_v63  ;;  %v2952_v54 = vpop.f32.mrf.mxu0  ;;  %3238 = vmatmul.bf16.gmra.mxu3 %v2693_v63 }
 0x4a2   :  { %v2953_v28 = vadd.f32 %v2952_v54, %v6257_v4  ;;  %v3041_v27 = vpop.f32.mrf.mxu1 }
 0x4a3   :  { %v3217_v20 = vadd.f32 %v3216_v32, %v3128_v13 }
 0x4a4   :  { %v3042_v14 = vadd.f32 %v3041_v27, %v2953_v28 }
 0x4a5   :  { %v3287_v30 = vadd.f32 %v3898_v58, %v3217_v20  ;;  %v3908_v20 = vld [vmem:[#allocation2 + $0x1a8] sm:$0xff]  ;;  %v3909_v58 = vld [vmem:[#allocation2 + $0x1b0] sm:$0xff] }
 0x4a6   :  { %v3288_v51 = vadd.f32 %v3899_v17, %v3042_v14 }
 0x4a7   :  { %3351 = vst [vmem:[#allocation10 + $0x158] sm:$0xff] %v3287_v30 }
 0x4a8   :  { %3352 = vst [vmem:[#allocation10 + $0x160] sm:$0xff] %v3288_v51  ;;  %v3130_v18 = vpop.f32.mrf.mxu2  ;;  %v3219_v9 = vpop.f32.mrf.mxu3 }
 0x4a9   :  { %v3131_v57 = vadd.f32 %v3130_v18, %v6295_v56  ;;  %v2954_v59 = vpop.f32.mrf.mxu0 }
 0x4aa   :  { %v2955_v34 = vadd.f32 %v2954_v59, %v6257_v4  ;;  %v3043_v39 = vpop.f32.mrf.mxu1 }
 0x4ab   :  { %v3220_v38 = vadd.f32 %v3219_v9, %v3131_v57 }
 0x4ac   :  { %v3044_v48 = vadd.f32 %v3043_v39, %v2955_v34  ;;  %v3910_v39 = vld [vmem:[#allocation2 + $0x1b8] sm:$0xff] }
 0x4ad   :  { %v3289_v7 = vadd.f32 %v3900_v8, %v3220_v38  ;;  %v3911_v8 = vld [vmem:[#allocation2 + $0x1c0] sm:$0xff] }
 0x4ae   :  { %v3290_v22 = vadd.f32 %v3901_v29, %v3044_v48 }
 0x4af   :  { %3353 = vst [vmem:[#allocation10 + $0x168] sm:$0xff] %v3289_v7 }
 0x4b0   :  { %3354 = vst [vmem:[#allocation10 + $0x170] sm:$0xff] %v3290_v22  ;;  %v3132_v33 = vpop.f32.mrf.mxu2  ;;  %v3221_v43 = vpop.f32.mrf.mxu3 }
 0x4b1   :  { %v3133_v6 = vadd.f32 %v3132_v33, %v6295_v56 }
 0x4b3   :  { %v3222_v42 = vadd.f32 %v3221_v43, %v3133_v6 }
 0x4b5   :  { %v3291_v44 = vadd.f32 %v3902_v5, %v3222_v42 }
 0x4b7   :  { %3355 = vst [vmem:[#allocation10 + $0x178] sm:$0xff] %v3291_v44 }
 0x4ed   :  { %v2957_v35 = vpop.f32.mrf.mxu0 }
 0x4ee   :  { %v3046_v45 = vpop.f32.mrf.mxu1  ;;  %v2958_v31 = vadd.f32 %v2957_v35, %v6257_v4  ;;  %v3912_v35 = vld [vmem:[#allocation2 + $0x1c8] sm:$0xff] }
 0x4f0   :  { %v3047_v53 = vadd.f32 %v3046_v45, %v2958_v31  ;;  %v3913_v31 = vld [vmem:[#allocation2 + $0x1d0] sm:$0xff] }
 0x4f2   :  { %v3292_v52 = vadd.f32 %v3903_v24, %v3047_v53 }
 0x4f3   :  { %v3135_v55 = vpop.f32.mrf.mxu2 }
 0x4f4   :  { %3356 = vst [vmem:[#allocation10 + $0x180] sm:$0xff] %v3292_v52  ;;  %v3224_v49 = vpop.f32.mrf.mxu3  ;;  %v3136_v10 = vadd.f32 %v3135_v55, %v6295_v56 }
 0x4f5   :  { %v2959_v21 = vpop.f32.mrf.mxu0 }
 0x4f6   :  { %v3048_v19 = vpop.f32.mrf.mxu1  ;;  %v2960_v46 = vadd.f32 %v2959_v21, %v6257_v4  ;;  %v3225_v12 = vadd.f32 %v3224_v49, %v3136_v10 }
 0x4f8   :  { %v3049_v25 = vadd.f32 %v3048_v19, %v2960_v46  ;;  %v3293_v11 = vadd.f32 %v3904_v41, %v3225_v12  ;;  %v3914_v12 = vld [vmem:[#allocation2 + $0x1d8] sm:$0xff]  ;;  %v3915_v41 = vld [vmem:[#allocation2 + $0x1e0] sm:$0xff] }
 0x4fa   :  { %v3294_v23 = vadd.f32 %v3905_v26, %v3049_v25  ;;  %3357 = vst [vmem:[#allocation10 + $0x188] sm:$0xff] %v3293_v11 }
 0x4fb   :  { %v3137_v61 = vpop.f32.mrf.mxu2 }
 0x4fc   :  { %3358 = vst [vmem:[#allocation10 + $0x190] sm:$0xff] %v3294_v23  ;;  %v3226_v60 = vpop.f32.mrf.mxu3  ;;  %v3138_v40 = vadd.f32 %v3137_v61, %v6295_v56 }
 0x4fd   :  { %v2962_v47 = vpop.f32.mrf.mxu0 }
 0x4fe   :  { %v3051_v1 = vpop.f32.mrf.mxu1  ;;  %v2963_v62 = vadd.f32 %v2962_v47, %v6257_v4  ;;  %v3227_v3 = vadd.f32 %v3226_v60, %v3138_v40 }
 0x500   :  { %v3052_v0 = vadd.f32 %v3051_v1, %v2963_v62  ;;  %v3295_v36 = vadd.f32 %v3906_v16, %v3227_v3  ;;  %v3916_v3 = vld [vmem:[#allocation2 + $0x1e8] sm:$0xff]  ;;  %v3917_v16 = vld [vmem:[#allocation2 + $0x1f0] sm:$0xff] }
 0x502   :  { %v3296_v15 = vadd.f32 %v3907_v50, %v3052_v0  ;;  %3359 = vst [vmem:[#allocation10 + $0x198] sm:$0xff] %v3295_v36 }
 0x503   :  { %v3140_v2 = vpop.f32.mrf.mxu2 }
 0x504   :  { %3360 = vst [vmem:[#allocation10 + $0x1a0] sm:$0xff] %v3296_v15  ;;  %v3229_v63 = vpop.f32.mrf.mxu3  ;;  %v3141_v37 = vadd.f32 %v3140_v2, %v6295_v56 }
 0x505   :  { %v2964_v13 = vpop.f32.mrf.mxu0 }
 0x506   :  { %v3053_v32 = vpop.f32.mrf.mxu1  ;;  %v2965_v54 = vadd.f32 %v2964_v13, %v6257_v4  ;;  %v3230_v28 = vadd.f32 %v3229_v63, %v3141_v37  ;;  %v3918_v63 = vld [vmem:[#allocation2 + $0x1f8] sm:$0xff] }
 0x508   :  { %v3054_v27 = vadd.f32 %v3053_v32, %v2965_v54  ;;  %v3297_v14 = vadd.f32 %v3908_v20, %v3230_v28 }
 0x50a   :  { %v3298_v30 = vadd.f32 %v3909_v58, %v3054_v27  ;;  %3361 = vst [vmem:[#allocation10 + $0x1a8] sm:$0xff] %v3297_v14 }
 0x50b   :  { %v3142_v17 = vpop.f32.mrf.mxu2 }
 0x50c   :  { %3362 = vst [vmem:[#allocation10 + $0x1b0] sm:$0xff] %v3298_v30  ;;  %v3231_v51 = vpop.f32.mrf.mxu3  ;;  %v3143_v18 = vadd.f32 %v3142_v17, %v6295_v56 }
 0x50d   :  { %v2967_v57 = vpop.f32.mrf.mxu0 }
 0x50e   :  { %v3056_v9 = vpop.f32.mrf.mxu1  ;;  %v2968_v59 = vadd.f32 %v2967_v57, %v6257_v4  ;;  %v3232_v34 = vadd.f32 %v3231_v51, %v3143_v18 }
 0x510   :  { %v3057_v38 = vadd.f32 %v3056_v9, %v2968_v59  ;;  %v3299_v48 = vadd.f32 %v3910_v39, %v3232_v34 }
 0x512   :  { %v3300_v7 = vadd.f32 %v3911_v8, %v3057_v38  ;;  %3363 = vst [vmem:[#allocation10 + $0x1b8] sm:$0xff] %v3299_v48 }
 0x513   :  { %v3145_v29 = vpop.f32.mrf.mxu2 }
 0x514   :  { %3364 = vst [vmem:[#allocation10 + $0x1c0] sm:$0xff] %v3300_v7  ;;  %v3234_v22 = vpop.f32.mrf.mxu3  ;;  %v3146_v33 = vadd.f32 %v3145_v29, %v6295_v56 }
 0x515   :  { %v2969_v6 = vpop.f32.mrf.mxu0 }
 0x516   :  { %v3058_v43 = vpop.f32.mrf.mxu1  ;;  %v2970_v42 = vadd.f32 %v2969_v6, %v6257_v4  ;;  %v3235_v5 = vadd.f32 %v3234_v22, %v3146_v33 }
 0x518   :  { %v3059_v44 = vadd.f32 %v3058_v43, %v2970_v42  ;;  %v3301_v45 = vadd.f32 %v3912_v35, %v3235_v5 }
 0x51a   :  { %v3302_v53 = vadd.f32 %v3913_v31, %v3059_v44  ;;  %3365 = vst [vmem:[#allocation10 + $0x1c8] sm:$0xff] %v3301_v45 }
 0x51b   :  { %v3147_v24 = vpop.f32.mrf.mxu2 }
 0x51c   :  { %3366 = vst [vmem:[#allocation10 + $0x1d0] sm:$0xff] %v3302_v53  ;;  %v3236_v52 = vpop.f32.mrf.mxu3  ;;  %v3148_v55 = vadd.f32 %v3147_v24, %v6295_v56 }
 0x51d   :  { %v2972_v49 = vpop.f32.mrf.mxu0 }
 0x51e   :  { %v3061_v10 = vpop.f32.mrf.mxu1  ;;  %v2973_v21 = vadd.f32 %v2972_v49, %v6257_v4  ;;  %v3237_v19 = vadd.f32 %v3236_v52, %v3148_v55 }
 0x520   :  { %v3062_v46 = vadd.f32 %v3061_v10, %v2973_v21  ;;  %v3303_v25 = vadd.f32 %v3914_v12, %v3237_v19 }
 0x522   :  { %v3304_v11 = vadd.f32 %v3915_v41, %v3062_v46  ;;  %3367 = vst [vmem:[#allocation10 + $0x1d8] sm:$0xff] %v3303_v25 }
 0x523   :  { %v3150_v26 = vpop.f32.mrf.mxu2 }
 0x524   :  { %3368 = vst [vmem:[#allocation10 + $0x1e0] sm:$0xff] %v3304_v11  ;;  %v3239_v23 = vpop.f32.mrf.mxu3  ;;  %v3151_v61 = vadd.f32 %v3150_v26, %v6295_v56 }
 0x525   :  { %v2974_v60 = vpop.f32.mrf.mxu0 }
 0x526   :  { %v2975_v40 = vadd.f32 %v2974_v60, %v6257_v4  ;;  %v3240_v47 = vadd.f32 %v3239_v23, %v3151_v61  ;;  %v3063_v1 = vpop.f32.mrf.mxu1 }
 0x528   :  { %v3064_v62 = vadd.f32 %v3063_v1, %v2975_v40  ;;  %v3305_v0 = vadd.f32 %v3916_v3, %v3240_v47 }
 0x52a   :  { %v3306_v36 = vadd.f32 %v3917_v16, %v3064_v62  ;;  %3369 = vst [vmem:[#allocation10 + $0x1e8] sm:$0xff] %v3305_v0 }
 0x52b   :  { %v3152_v50 = vpop.f32.mrf.mxu2 }
 0x52c   :  { %3370 = vst [vmem:[#allocation10 + $0x1f0] sm:$0xff] %v3306_v36  ;;  %v3153_v15 = vadd.f32 %v3152_v50, %v6295_v56  ;;  %v3241_v2 = vpop.f32.mrf.mxu3 }
 0x52e   :  { %v3242_v4 = vadd.f32 %v3241_v2, %v3153_v15 }
 0x530   :  { %v3307_v37 = vadd.f32 %v3918_v63, %v3242_v4 }
 0x532   :  { %3371 = vst [vmem:[#allocation10 + $0x1f8] sm:$0xff] %v3307_v37 }
 0x533   :  { %3384 = dma.vmem_to_hbm [thread:$0]  %s3377_s3, 8192, %s3379_s13, [#allocation4], %s4051_s27, %s4051_s27, %s4052_s28  }
 0x534   :  { %4045 = dma.done.wait [#allocation4], 8192  }
 0x535   :  { %4046 = vsyncadd [#allocation4], 4294959104 }
 0x536   :  { %3389 = vsyncpa [#allocation3], 1 }
 0x537   :  { %3390 = vsyncpa [#allocation6], 1 }
 0x538   :  { %3391 = vsyncpa [#allocation9], 1 }
 0x539   :  { %3392 = vsyncpa [#allocation4], 1 }

</bundles_post_ra>
